<compile_context>
chip_gen: v7x
topology: tpu7x:2x2x1
jax: 0.10.0
libtpu: 0.0.40
codegen_flags: <defaults>
</compile_context>

<pallas_src>
import jax
import jax.numpy as jnp
from jax.experimental import pallas as pl
from jax.experimental.pallas import tpu as pltpu


def _conv3x3_im2col(pad_ref, w_ref, masks, H, W, C):
    """One 3x3 conv (pad=1, stride=1) as a single MXU matmul.

    pad_ref : (H+2, W+2, C) f32 VMEM scratch whose interior [1:H+1, 1:W+1]
              holds the conv input; the 1-pixel border is *garbage* and gets
              zeroed via `masks` after the shifted reads (no zero-fill stores).
    w_ref   : (9*C, C) bf16 flattened weights, k-index = (3*dy + dx)*C + cin.
    masks   : dict[(dy, dx)] -> (H, W, C) bool validity mask, or None (center).
    """
    taps = []
    for dy in range(3):
        for dx in range(3):
            tap = pad_ref[dy:dy + H, dx:dx + W, :]            # (H, W, C) f32
            m = masks[(dy, dx)]
            if m is not None:
                tap = jnp.where(m, tap, 0.0)
            taps.append(tap)
    # Lane-aligned concat (each tap is an exact multiple of 128 lanes); cast to
    # bf16 only at the matmul boundary, accumulate in f32 on the MXU.
    slab = jnp.concatenate(taps, axis=-1).astype(jnp.bfloat16)  # (H, W, 9C)
    return jnp.einsum('hwk,ko->hwo', slab, w_ref[...],
                      preferred_element_type=jnp.float32)       # (H, W, C) f32


def basic_block_kernel(x_ref, w1_ref, s1_ref, b1_ref, w2_ref, s2_ref, b2_ref,
                       o_ref, pad_ref):
    # x_ref block: (1, H, W, C) f32, one image per grid step.
    H, W, C = x_ref.shape[1], x_ref.shape[2], x_ref.shape[3]

    # Static halo-validity masks, built once (hoisted) and reused by both convs.
    # Tap (dy, dx) reads source pixel (h + dy - 1, w + dx - 1).
    h_idx = jax.lax.broadcasted_iota(jnp.int32, (H, W, C), 0)
    w_idx = jax.lax.broadcasted_iota(jnp.int32, (H, W, C), 1)

    def valid(idx, d, n):
        if d == 0:
            return idx >= 1          # source index >= 0
        if d == 2:
            return idx < n - 1       # source index <= n - 1
        return None                  # d == 1: always in bounds

    masks = {}
    for dy in range(3):
        for dx in range(3):
            vh, vw = valid(h_idx, dy, H), valid(w_idx, dx, W)
            if vh is None:
                masks[(dy, dx)] = vw
            elif vw is None:
                masks[(dy, dx)] = vh
            else:
                masks[(dy, dx)] = vh & vw

    # ---- conv1 (3x3, pad=1, stride=1): one im2col matmul, K = 9*C ------------
    pad_ref[1:H + 1, 1:W + 1, :] = x_ref[0]
    y1 = _conv3x3_im2col(pad_ref, w1_ref, masks, H, W, C)

    # ---- bn1 (folded scale/shift) + relu: single f32 per-channel FMA ---------
    a1 = jnp.maximum(y1 * s1_ref[0] + b1_ref[0], 0.0)

    # ---- conv2 ----------------------------------------------------------------
    pad_ref[1:H + 1, 1:W + 1, :] = a1
    y2 = _conv3x3_im2col(pad_ref, w2_ref, masks, H, W, C)

    # ---- bn2 + identity residual + final relu ---------------------------------
    # Re-read x from the VMEM-resident input block here (keeps its live range
    # short instead of carrying it across both convs).
    out = jnp.maximum(y2 * s2_ref[0] + b2_ref[0] + x_ref[0], 0.0)
    o_ref[0] = out.astype(o_ref.dtype)


def basic_block(x_nhwc, w1_flat, s1, b1, w2_flat, s2, b2):
    """Fused BasicBlock forward.  x_nhwc: (N, H, W, C) f32; w*_flat: (9C, C)
    bf16 tap-major flattened conv weights; s*/b*: (1, C) f32 folded BN."""
    N, H, W, C = x_nhwc.shape
    assert C % 128 == 0, "keep the channel (lane) dim a multiple of 128"
    assert w1_flat.shape == (9 * C, C) and w2_flat.shape == (9 * C, C)

    full = lambda shape: pl.BlockSpec(shape, lambda n: (0,) * len(shape))
    grid_spec = pltpu.PrefetchScalarGridSpec(
        num_scalar_prefetch=0,
        grid=(N,),
        in_specs=[
            pl.BlockSpec((1, H, W, C), lambda n: (n, 0, 0, 0)),  # x
            full((9 * C, C)),                                    # conv1 weight (bf16)
            full((1, C)),                                        # bn1 scale
            full((1, C)),                                        # bn1 shift
            full((9 * C, C)),                                    # conv2 weight (bf16)
            full((1, C)),                                        # bn2 scale
            full((1, C)),                                        # bn2 shift
        ],
        out_specs=pl.BlockSpec((1, H, W, C), lambda n: (n, 0, 0, 0)),
        scratch_shapes=[
            # Single shared halo scratch (never zero-filled; border is masked).
            pltpu.VMEM((H + 2, W + 2, C), jnp.float32),
        ],
    )
    return pl.pallas_call(
        basic_block_kernel,
        out_shape=jax.ShapeDtypeStruct((N, H, W, C), x_nhwc.dtype),
        grid_spec=grid_spec,
        compiler_params=pltpu.CompilerParams(
            dimension_semantics=("parallel",),  # one image per TensorCore on v7x
        ),
    )(x_nhwc, w1_flat, s1, b1, w2_flat, s2, b2)


# ------------------------- pure-JAX reference (NCHW) --------------------------
def ref_basic_block(x_nchw, w1_oihw, bn1, w2_oihw, bn2, eps, conv_dtype):
    """BasicBlock.forward with inference-mode BN.  `conv_dtype` selects the
    conv operand precision (f32, or bf16-operand / f32-accumulate to match the
    kernel's MXU path)."""
    def conv(x, w):
        return jax.lax.conv_general_dilated(
            x.astype(conv_dtype), w.astype(conv_dtype),
            window_strides=(1, 1), padding=((1, 1), (1, 1)),
            dimension_numbers=('NCHW', 'OIHW', 'NCHW'),
            preferred_element_type=jnp.float32)

    def bn(y, g, b, m, v):
        c = lambda t: t[None, :, None, None]
        return (y - c(m)) * (c(g) / jnp.sqrt(c(v) + eps)) + c(b)

    out = jnp.maximum(bn(conv(x_nchw, w1_oihw), *bn1), 0.0)
    out = bn(conv(out, w2_oihw), *bn2)
    return jnp.maximum(out + x_nchw, 0.0)


if __name__ == "__main__":
    # BasicBlock config of ResNet.layer2's non-first blocks: 128 channels,
    # stride 1, identity residual.  Small spatial extent keeps the demo tiny.
    N, C, H, Wsp = 2, 128, 16, 16
    eps = 1e-5

    key = jax.random.PRNGKey(0)
    k = jax.random.split(key, 11)
    x_nchw = jax.random.normal(k[0], (N, C, H, Wsp), jnp.float32)

    # Conv weights: kaiming_normal(fan_out, relu) scale, as in the module init.
    w_std = (2.0 / (9 * C)) ** 0.5
    w1_oihw = w_std * jax.random.normal(k[1], (C, C, 3, 3), jnp.float32)
    w2_oihw = w_std * jax.random.normal(k[2], (C, C, 3, 3), jnp.float32)

    # BatchNorm (inference) parameters / running stats.
    g1 = 1.0 + 0.1 * jax.random.normal(k[3], (C,), jnp.float32)
    be1 = 0.1 * jax.random.normal(k[4], (C,), jnp.float32)
    m1 = 0.1 * jax.random.normal(k[5], (C,), jnp.float32)
    v1 = jax.random.uniform(k[6], (C,), jnp.float32, minval=0.5, maxval=1.5)
    g2 = 1.0 + 0.1 * jax.random.normal(k[7], (C,), jnp.float32)
    be2 = 0.1 * jax.random.normal(k[8], (C,), jnp.float32)
    m2 = 0.1 * jax.random.normal(k[9], (C,), jnp.float32)
    v2 = jax.random.uniform(k[10], (C,), jnp.float32, minval=0.5, maxval=1.5)

    # Fold BN (inference form) into per-channel scale/shift for the kernel.
    s1 = (g1 / jnp.sqrt(v1 + eps)).reshape(1, C)
    b1 = (be1 - m1 * g1 / jnp.sqrt(v1 + eps)).reshape(1, C)
    s2 = (g2 / jnp.sqrt(v2 + eps)).reshape(1, C)
    b2 = (be2 - m2 * g2 / jnp.sqrt(v2 + eps)).reshape(1, C)

    # NCHW -> NHWC; OIHW -> HWIO -> (9C, C) tap-major flatten, bf16 MXU operand.
    x_nhwc = jnp.transpose(x_nchw, (0, 2, 3, 1))
    flat = lambda w: jnp.transpose(w, (2, 3, 1, 0)).reshape(9 * C, C).astype(jnp.bfloat16)
    w1_flat, w2_flat = flat(w1_oihw), flat(w2_oihw)

    out_nhwc = jax.block_until_ready(
        basic_block(x_nhwc, w1_flat, s1, b1, w2_flat, s2, b2))
    out_nchw = jnp.transpose(out_nhwc, (0, 3, 1, 2))
    assert out_nchw.shape == (N, C, H, Wsp)

    # Tight check vs a reference at the same matmul precision (bf16 operands,
    # f32 accumulation): remaining differences are accumulation-order only.
    ref_bf = ref_basic_block(x_nchw, w1_oihw, (g1, be1, m1, v1),
                             w2_oihw, (g2, be2, m2, v2), eps, jnp.bfloat16)
    err_tight = float(jnp.max(jnp.abs(out_nchw - ref_bf)))
    assert err_tight < 1e-2, err_tight

    # Sanity bound vs the full-f32 reference (bf16 operand-rounding envelope).
    ref_f32 = ref_basic_block(x_nchw, w1_oihw, (g1, be1, m1, v1),
                              w2_oihw, (g2, be2, m2, v2), eps, jnp.float32)
    scale = float(jnp.max(jnp.abs(ref_f32)))
    err_f32 = float(jnp.max(jnp.abs(out_nchw - ref_f32)))
    assert err_f32 < 0.05 * max(scale, 1.0), (err_f32, scale)

    print("KERNEL_OK")
</pallas_src>

<mosaic_0001>
module attributes {stable_mosaic.version = 11 : i64} {
  func.func @basic_block_kernel(%arg0: i32, %arg1: memref<1x16x16x128xf32, #tpu.memory_space<vmem>>, %arg2: memref<1152x128xbf16, #tpu.memory_space<vmem>>, %arg3: memref<1x128xf32, #tpu.memory_space<vmem>>, %arg4: memref<1x128xf32, #tpu.memory_space<vmem>>, %arg5: memref<1152x128xbf16, #tpu.memory_space<vmem>>, %arg6: memref<1x128xf32, #tpu.memory_space<vmem>>, %arg7: memref<1x128xf32, #tpu.memory_space<vmem>>, %arg8: memref<1x16x16x128xf32, #tpu.memory_space<vmem>>, %arg9: memref<18x18x128xf32, #tpu.memory_space<vmem>>) attributes {dimension_semantics = [#tpu.dimension_semantics<parallel>], iteration_bounds = array<i64: 2>, scalar_prefetch = 0 : i64, scratch_operands = 1 : i64, tpu.core_type = #tpu.core_type<tc>, window_params = [{transform_indices = @transform_0, window_bounds = array<i64: 1, 16, 16, 128>}, {pipeline_mode = #tpu.pipeline_mode<synchronous>, transform_indices = @transform_1, window_bounds = array<i64: 1152, 128>}, {pipeline_mode = #tpu.pipeline_mode<synchronous>, transform_indices = @transform_2, window_bounds = array<i64: 1, 128>}, {pipeline_mode = #tpu.pipeline_mode<synchronous>, transform_indices = @transform_3, window_bounds = array<i64: 1, 128>}, {pipeline_mode = #tpu.pipeline_mode<synchronous>, transform_indices = @transform_4, window_bounds = array<i64: 1152, 128>}, {pipeline_mode = #tpu.pipeline_mode<synchronous>, transform_indices = @transform_5, window_bounds = array<i64: 1, 128>}, {pipeline_mode = #tpu.pipeline_mode<synchronous>, transform_indices = @transform_6, window_bounds = array<i64: 1, 128>}, {transform_indices = @transform_7, window_bounds = array<i64: 1, 16, 16, 128>}]} {
    %0 = tpu.iota {dimensions = array<i32: 0>} : vector<16x16x128xi32>
    %1 = tpu.iota {dimensions = array<i32: 1>} : vector<16x16x128xi32>
    %c1_i32 = arith.constant 1 : i32
    %2 = vector.broadcast %c1_i32 : i32 to vector<16x16x128xi32>
    %3 = arith.cmpi sge, %0, %2 : vector<16x16x128xi32>
    %c1_i32_0 = arith.constant 1 : i32
    %4 = vector.broadcast %c1_i32_0 : i32 to vector<16x16x128xi32>
    %5 = arith.cmpi sge, %1, %4 : vector<16x16x128xi32>
    %6 = arith.andi %3, %5 : vector<16x16x128xi1>
    %c1_i32_1 = arith.constant 1 : i32
    %7 = vector.broadcast %c1_i32_1 : i32 to vector<16x16x128xi32>
    %8 = arith.cmpi sge, %0, %7 : vector<16x16x128xi32>
    %c1_i32_2 = arith.constant 1 : i32
    %9 = vector.broadcast %c1_i32_2 : i32 to vector<16x16x128xi32>
    %10 = arith.cmpi sge, %0, %9 : vector<16x16x128xi32>
    %c15_i32 = arith.constant 15 : i32
    %11 = vector.broadcast %c15_i32 : i32 to vector<16x16x128xi32>
    %12 = arith.cmpi slt, %1, %11 : vector<16x16x128xi32>
    %13 = arith.andi %10, %12 : vector<16x16x128xi1>
    %c1_i32_3 = arith.constant 1 : i32
    %14 = vector.broadcast %c1_i32_3 : i32 to vector<16x16x128xi32>
    %15 = arith.cmpi sge, %1, %14 : vector<16x16x128xi32>
    %c15_i32_4 = arith.constant 15 : i32
    %16 = vector.broadcast %c15_i32_4 : i32 to vector<16x16x128xi32>
    %17 = arith.cmpi slt, %1, %16 : vector<16x16x128xi32>
    %c15_i32_5 = arith.constant 15 : i32
    %18 = vector.broadcast %c15_i32_5 : i32 to vector<16x16x128xi32>
    %19 = arith.cmpi slt, %0, %18 : vector<16x16x128xi32>
    %c1_i32_6 = arith.constant 1 : i32
    %20 = vector.broadcast %c1_i32_6 : i32 to vector<16x16x128xi32>
    %21 = arith.cmpi sge, %1, %20 : vector<16x16x128xi32>
    %22 = arith.andi %19, %21 : vector<16x16x128xi1>
    %c15_i32_7 = arith.constant 15 : i32
    %23 = vector.broadcast %c15_i32_7 : i32 to vector<16x16x128xi32>
    %24 = arith.cmpi slt, %0, %23 : vector<16x16x128xi32>
    %c15_i32_8 = arith.constant 15 : i32
    %25 = vector.broadcast %c15_i32_8 : i32 to vector<16x16x128xi32>
    %26 = arith.cmpi slt, %0, %25 : vector<16x16x128xi32>
    %c15_i32_9 = arith.constant 15 : i32
    %27 = vector.broadcast %c15_i32_9 : i32 to vector<16x16x128xi32>
    %28 = arith.cmpi slt, %1, %27 : vector<16x16x128xi32>
    %29 = arith.andi %26, %28 : vector<16x16x128xi1>
    %c0 = arith.constant 0 : index
    %c0_10 = arith.constant 0 : index
    %c0_11 = arith.constant 0 : index
    %c0_12 = arith.constant 0 : index
    %30 = vector.load %arg1[%c0, %c0_10, %c0_11, %c0_12] : memref<1x16x16x128xf32, #tpu.memory_space<vmem>>, vector<1x16x16x128xf32>
    %31 = vector.shape_cast %30 : vector<1x16x16x128xf32> to vector<16x16x128xf32>
    %c1 = arith.constant 1 : index
    %c1_13 = arith.constant 1 : index
    %c0_14 = arith.constant 0 : index
    %32 = vector.load %arg9[%c1, %c1_13, %c0_14] : memref<18x18x128xf32, #tpu.memory_space<vmem>>, vector<16x16x128xf32>
    tpu.vector_store %arg9[%c1, %c1_13, %c0_14], %31 {strides = array<i32>} : memref<18x18x128xf32, #tpu.memory_space<vmem>>, vector<16x16x128xf32>,
    %c0_15 = arith.constant 0 : index
    %c0_16 = arith.constant 0 : index
    %c0_17 = arith.constant 0 : index
    %33 = vector.load %arg9[%c0_15, %c0_16, %c0_17] : memref<18x18x128xf32, #tpu.memory_space<vmem>>, vector<16x16x128xf32>
    %cst = arith.constant 0.000000e+00 : f32
    %34 = vector.broadcast %cst : f32 to vector<16x16x128xf32>
    %35 = arith.select %6, %33, %34 : vector<16x16x128xi1>, vector<16x16x128xf32>
    %c0_18 = arith.constant 0 : index
    %c1_19 = arith.constant 1 : index
    %c0_20 = arith.constant 0 : index
    %36 = vector.load %arg9[%c0_18, %c1_19, %c0_20] : memref<18x18x128xf32, #tpu.memory_space<vmem>>, vector<16x16x128xf32>
    %cst_21 = arith.constant 0.000000e+00 : f32
    %37 = vector.broadcast %cst_21 : f32 to vector<16x16x128xf32>
    %38 = arith.select %8, %36, %37 : vector<16x16x128xi1>, vector<16x16x128xf32>
    %c0_22 = arith.constant 0 : index
    %c2 = arith.constant 2 : index
    %c0_23 = arith.constant 0 : index
    %39 = vector.load %arg9[%c0_22, %c2, %c0_23] : memref<18x18x128xf32, #tpu.memory_space<vmem>>, vector<16x16x128xf32>
    %cst_24 = arith.constant 0.000000e+00 : f32
    %40 = vector.broadcast %cst_24 : f32 to vector<16x16x128xf32>
    %41 = arith.select %13, %39, %40 : vector<16x16x128xi1>, vector<16x16x128xf32>
    %c1_25 = arith.constant 1 : index
    %c0_26 = arith.constant 0 : index
    %c0_27 = arith.constant 0 : index
    %42 = vector.load %arg9[%c1_25, %c0_26, %c0_27] : memref<18x18x128xf32, #tpu.memory_space<vmem>>, vector<16x16x128xf32>
    %cst_28 = arith.constant 0.000000e+00 : f32
    %43 = vector.broadcast %cst_28 : f32 to vector<16x16x128xf32>
    %44 = arith.select %15, %42, %43 : vector<16x16x128xi1>, vector<16x16x128xf32>
    %c1_29 = arith.constant 1 : index
    %c1_30 = arith.constant 1 : index
    %c0_31 = arith.constant 0 : index
    %45 = vector.load %arg9[%c1_29, %c1_30, %c0_31] : memref<18x18x128xf32, #tpu.memory_space<vmem>>, vector<16x16x128xf32>
    %c1_32 = arith.constant 1 : index
    %c2_33 = arith.constant 2 : index
    %c0_34 = arith.constant 0 : index
    %46 = vector.load %arg9[%c1_32, %c2_33, %c0_34] : memref<18x18x128xf32, #tpu.memory_space<vmem>>, vector<16x16x128xf32>
    %cst_35 = arith.constant 0.000000e+00 : f32
    %47 = vector.broadcast %cst_35 : f32 to vector<16x16x128xf32>
    %48 = arith.select %17, %46, %47 : vector<16x16x128xi1>, vector<16x16x128xf32>
    %c2_36 = arith.constant 2 : index
    %c0_37 = arith.constant 0 : index
    %c0_38 = arith.constant 0 : index
    %49 = vector.load %arg9[%c2_36, %c0_37, %c0_38] : memref<18x18x128xf32, #tpu.memory_space<vmem>>, vector<16x16x128xf32>
    %cst_39 = arith.constant 0.000000e+00 : f32
    %50 = vector.broadcast %cst_39 : f32 to vector<16x16x128xf32>
    %51 = arith.select %22, %49, %50 : vector<16x16x128xi1>, vector<16x16x128xf32>
    %c2_40 = arith.constant 2 : index
    %c1_41 = arith.constant 1 : index
    %c0_42 = arith.constant 0 : index
    %52 = vector.load %arg9[%c2_40, %c1_41, %c0_42] : memref<18x18x128xf32, #tpu.memory_space<vmem>>, vector<16x16x128xf32>
    %cst_43 = arith.constant 0.000000e+00 : f32
    %53 = vector.broadcast %cst_43 : f32 to vector<16x16x128xf32>
    %54 = arith.select %24, %52, %53 : vector<16x16x128xi1>, vector<16x16x128xf32>
    %c2_44 = arith.constant 2 : index
    %c2_45 = arith.constant 2 : index
    %c0_46 = arith.constant 0 : index
    %55 = vector.load %arg9[%c2_44, %c2_45, %c0_46] : memref<18x18x128xf32, #tpu.memory_space<vmem>>, vector<16x16x128xf32>
    %cst_47 = arith.constant 0.000000e+00 : f32
    %56 = vector.broadcast %cst_47 : f32 to vector<16x16x128xf32>
    %57 = arith.select %29, %55, %56 : vector<16x16x128xi1>, vector<16x16x128xf32>
    %58 = tpu.concatenate %35, %38, %41, %44, %45, %48, %51, %54, %57 in 2 : vector<16x16x128xf32>, vector<16x16x128xf32>, vector<16x16x128xf32>, vector<16x16x128xf32>, vector<16x16x128xf32>, vector<16x16x128xf32>, vector<16x16x128xf32>, vector<16x16x128xf32>, vector<16x16x128xf32> -> vector<16x16x1152xf32>
    %59 = arith.truncf %58 : vector<16x16x1152xf32> to vector<16x16x1152xbf16>
    %c0_48 = arith.constant 0 : index
    %c0_49 = arith.constant 0 : index
    %60 = vector.load %arg2[%c0_48, %c0_49] : memref<1152x128xbf16, #tpu.memory_space<vmem>>, vector<1152x128xbf16>
    "tpu.trace_start"() <{level = 10 : i32, message = "hwk,ko->hwo"}> : () -> ()
    %cst_50 = arith.constant dense<0.000000e+00> : vector<16x16x128xf32>
    %61 = tpu.matmul %59, %60, %cst_50 {dimension_numbers = #tpu.dot_dimension_numbers<[2], [0], [0, 1], [1], [0, 0, 0, 1, 1, 1], [], []>} : vector<16x16x1152xbf16>, vector<1152x128xbf16>, vector<16x16x128xf32> -> vector<16x16x128xf32>
    "tpu.trace_stop"() : () -> ()
    %c0_51 = arith.constant 0 : index
    %c0_52 = arith.constant 0 : index
    %62 = vector.load %arg3[%c0_51, %c0_52] : memref<1x128xf32, #tpu.memory_space<vmem>>, vector<1x128xf32>
    %63 = vector.shape_cast %62 : vector<1x128xf32> to vector<128xf32>
    %64 = vector.shape_cast %63 : vector<128xf32> to vector<1x1x128xf32>
    %65 = vector.broadcast %64 : vector<1x1x128xf32> to vector<16x16x128xf32>
    %66 = arith.mulf %61, %65 : vector<16x16x128xf32>
    %c0_53 = arith.constant 0 : index
    %c0_54 = arith.constant 0 : index
    %67 = vector.load %arg4[%c0_53, %c0_54] : memref<1x128xf32, #tpu.memory_space<vmem>>, vector<1x128xf32>
    %68 = vector.shape_cast %67 : vector<1x128xf32> to vector<128xf32>
    %69 = vector.shape_cast %68 : vector<128xf32> to vector<1x1x128xf32>
    %70 = vector.broadcast %69 : vector<1x1x128xf32> to vector<16x16x128xf32>
    %71 = arith.addf %66, %70 : vector<16x16x128xf32>
    %cst_55 = arith.constant 0.000000e+00 : f32
    %72 = vector.broadcast %cst_55 : f32 to vector<16x16x128xf32>
    %73 = arith.maximumf %71, %72 : vector<16x16x128xf32>
    %c1_56 = arith.constant 1 : index
    %c1_57 = arith.constant 1 : index
    %c0_58 = arith.constant 0 : index
    %74 = vector.load %arg9[%c1_56, %c1_57, %c0_58] : memref<18x18x128xf32, #tpu.memory_space<vmem>>, vector<16x16x128xf32>
    tpu.vector_store %arg9[%c1_56, %c1_57, %c0_58], %73 {strides = array<i32>} : memref<18x18x128xf32, #tpu.memory_space<vmem>>, vector<16x16x128xf32>,
    %c0_59 = arith.constant 0 : index
    %c0_60 = arith.constant 0 : index
    %c0_61 = arith.constant 0 : index
    %75 = vector.load %arg9[%c0_59, %c0_60, %c0_61] : memref<18x18x128xf32, #tpu.memory_space<vmem>>, vector<16x16x128xf32>
    %cst_62 = arith.constant 0.000000e+00 : f32
    %76 = vector.broadcast %cst_62 : f32 to vector<16x16x128xf32>
    %77 = arith.select %6, %75, %76 : vector<16x16x128xi1>, vector<16x16x128xf32>
    %c0_63 = arith.constant 0 : index
    %c1_64 = arith.constant 1 : index
    %c0_65 = arith.constant 0 : index
    %78 = vector.load %arg9[%c0_63, %c1_64, %c0_65] : memref<18x18x128xf32, #tpu.memory_space<vmem>>, vector<16x16x128xf32>
    %cst_66 = arith.constant 0.000000e+00 : f32
    %79 = vector.broadcast %cst_66 : f32 to vector<16x16x128xf32>
    %80 = arith.select %8, %78, %79 : vector<16x16x128xi1>, vector<16x16x128xf32>
    %c0_67 = arith.constant 0 : index
    %c2_68 = arith.constant 2 : index
    %c0_69 = arith.constant 0 : index
    %81 = vector.load %arg9[%c0_67, %c2_68, %c0_69] : memref<18x18x128xf32, #tpu.memory_space<vmem>>, vector<16x16x128xf32>
    %cst_70 = arith.constant 0.000000e+00 : f32
    %82 = vector.broadcast %cst_70 : f32 to vector<16x16x128xf32>
    %83 = arith.select %13, %81, %82 : vector<16x16x128xi1>, vector<16x16x128xf32>
    %c1_71 = arith.constant 1 : index
    %c0_72 = arith.constant 0 : index
    %c0_73 = arith.constant 0 : index
    %84 = vector.load %arg9[%c1_71, %c0_72, %c0_73] : memref<18x18x128xf32, #tpu.memory_space<vmem>>, vector<16x16x128xf32>
    %cst_74 = arith.constant 0.000000e+00 : f32
    %85 = vector.broadcast %cst_74 : f32 to vector<16x16x128xf32>
    %86 = arith.select %15, %84, %85 : vector<16x16x128xi1>, vector<16x16x128xf32>
    %c1_75 = arith.constant 1 : index
    %c1_76 = arith.constant 1 : index
    %c0_77 = arith.constant 0 : index
    %87 = vector.load %arg9[%c1_75, %c1_76, %c0_77] : memref<18x18x128xf32, #tpu.memory_space<vmem>>, vector<16x16x128xf32>
    %c1_78 = arith.constant 1 : index
    %c2_79 = arith.constant 2 : index
    %c0_80 = arith.constant 0 : index
    %88 = vector.load %arg9[%c1_78, %c2_79, %c0_80] : memref<18x18x128xf32, #tpu.memory_space<vmem>>, vector<16x16x128xf32>
    %cst_81 = arith.constant 0.000000e+00 : f32
    %89 = vector.broadcast %cst_81 : f32 to vector<16x16x128xf32>
    %90 = arith.select %17, %88, %89 : vector<16x16x128xi1>, vector<16x16x128xf32>
    %c2_82 = arith.constant 2 : index
    %c0_83 = arith.constant 0 : index
    %c0_84 = arith.constant 0 : index
    %91 = vector.load %arg9[%c2_82, %c0_83, %c0_84] : memref<18x18x128xf32, #tpu.memory_space<vmem>>, vector<16x16x128xf32>
    %cst_85 = arith.constant 0.000000e+00 : f32
    %92 = vector.broadcast %cst_85 : f32 to vector<16x16x128xf32>
    %93 = arith.select %22, %91, %92 : vector<16x16x128xi1>, vector<16x16x128xf32>
    %c2_86 = arith.constant 2 : index
    %c1_87 = arith.constant 1 : index
    %c0_88 = arith.constant 0 : index
    %94 = vector.load %arg9[%c2_86, %c1_87, %c0_88] : memref<18x18x128xf32, #tpu.memory_space<vmem>>, vector<16x16x128xf32>
    %cst_89 = arith.constant 0.000000e+00 : f32
    %95 = vector.broadcast %cst_89 : f32 to vector<16x16x128xf32>
    %96 = arith.select %24, %94, %95 : vector<16x16x128xi1>, vector<16x16x128xf32>
    %c2_90 = arith.constant 2 : index
    %c2_91 = arith.constant 2 : index
    %c0_92 = arith.constant 0 : index
    %97 = vector.load %arg9[%c2_90, %c2_91, %c0_92] : memref<18x18x128xf32, #tpu.memory_space<vmem>>, vector<16x16x128xf32>
    %cst_93 = arith.constant 0.000000e+00 : f32
    %98 = vector.broadcast %cst_93 : f32 to vector<16x16x128xf32>
    %99 = arith.select %29, %97, %98 : vector<16x16x128xi1>, vector<16x16x128xf32>
    %100 = tpu.concatenate %77, %80, %83, %86, %87, %90, %93, %96, %99 in 2 : vector<16x16x128xf32>, vector<16x16x128xf32>, vector<16x16x128xf32>, vector<16x16x128xf32>, vector<16x16x128xf32>, vector<16x16x128xf32>, vector<16x16x128xf32>, vector<16x16x128xf32>, vector<16x16x128xf32> -> vector<16x16x1152xf32>
    %101 = arith.truncf %100 : vector<16x16x1152xf32> to vector<16x16x1152xbf16>
    %c0_94 = arith.constant 0 : index
    %c0_95 = arith.constant 0 : index
    %102 = vector.load %arg5[%c0_94, %c0_95] : memref<1152x128xbf16, #tpu.memory_space<vmem>>, vector<1152x128xbf16>
    "tpu.trace_start"() <{level = 10 : i32, message = "hwk,ko->hwo"}> : () -> ()
    %cst_96 = arith.constant dense<0.000000e+00> : vector<16x16x128xf32>
    %103 = tpu.matmul %101, %102, %cst_96 {dimension_numbers = #tpu.dot_dimension_numbers<[2], [0], [0, 1], [1], [0, 0, 0, 1, 1, 1], [], []>} : vector<16x16x1152xbf16>, vector<1152x128xbf16>, vector<16x16x128xf32> -> vector<16x16x128xf32>
    "tpu.trace_stop"() : () -> ()
    %c0_97 = arith.constant 0 : index
    %c0_98 = arith.constant 0 : index
    %104 = vector.load %arg6[%c0_97, %c0_98] : memref<1x128xf32, #tpu.memory_space<vmem>>, vector<1x128xf32>
    %105 = vector.shape_cast %104 : vector<1x128xf32> to vector<128xf32>
    %106 = vector.shape_cast %105 : vector<128xf32> to vector<1x1x128xf32>
    %107 = vector.broadcast %106 : vector<1x1x128xf32> to vector<16x16x128xf32>
    %108 = arith.mulf %103, %107 : vector<16x16x128xf32>
    %c0_99 = arith.constant 0 : index
    %c0_100 = arith.constant 0 : index
    %109 = vector.load %arg7[%c0_99, %c0_100] : memref<1x128xf32, #tpu.memory_space<vmem>>, vector<1x128xf32>
    %110 = vector.shape_cast %109 : vector<1x128xf32> to vector<128xf32>
    %111 = vector.shape_cast %110 : vector<128xf32> to vector<1x1x128xf32>
    %112 = vector.broadcast %111 : vector<1x1x128xf32> to vector<16x16x128xf32>
    %113 = arith.addf %108, %112 : vector<16x16x128xf32>
    %c0_101 = arith.constant 0 : index
    %c0_102 = arith.constant 0 : index
    %c0_103 = arith.constant 0 : index
    %c0_104 = arith.constant 0 : index
    %114 = vector.load %arg1[%c0_101, %c0_102, %c0_103, %c0_104] : memref<1x16x16x128xf32, #tpu.memory_space<vmem>>, vector<1x16x16x128xf32>
    %115 = vector.shape_cast %114 : vector<1x16x16x128xf32> to vector<16x16x128xf32>
    %116 = arith.addf %113, %115 : vector<16x16x128xf32>
    %cst_105 = arith.constant 0.000000e+00 : f32
    %117 = vector.broadcast %cst_105 : f32 to vector<16x16x128xf32>
    %118 = arith.maximumf %116, %117 : vector<16x16x128xf32>
    %c0_106 = arith.constant 0 : index
    %c0_107 = arith.constant 0 : index
    %c0_108 = arith.constant 0 : index
    %c0_109 = arith.constant 0 : index
    %119 = vector.load %arg8[%c0_106, %c0_107, %c0_108, %c0_109] : memref<1x16x16x128xf32, #tpu.memory_space<vmem>>, vector<1x16x16x128xf32>
    %120 = vector.shape_cast %119 : vector<1x16x16x128xf32> to vector<16x16x128xf32>
    %121 = vector.shape_cast %118 : vector<16x16x128xf32> to vector<1x16x16x128xf32>
    tpu.vector_store %arg8[%c0_106, %c0_107, %c0_108, %c0_109], %121 {strides = array<i32>} : memref<1x16x16x128xf32, #tpu.memory_space<vmem>>, vector<1x16x16x128xf32>,
    return
  }
  func.func @transform_0(%arg0: i32) -> (i32, i32, i32, i32) {
    %c0_i32 = arith.constant 0 : i32
    %c0_i32_0 = arith.constant 0 : i32
    %c0_i32_1 = arith.constant 0 : i32
    %c0_i32_2 = arith.constant 0 : i32
    return %arg0, %c0_i32, %c0_i32_0, %c0_i32_1 : i32, i32, i32, i32
  }
  func.func @transform_1(%arg0: i32) -> (i32, i32) {
    %c0_i32 = arith.constant 0 : i32
    %c0_i32_0 = arith.constant 0 : i32
    %c0_i32_1 = arith.constant 0 : i32
    return %c0_i32, %c0_i32_0 : i32, i32
  }
  func.func @transform_2(%arg0: i32) -> (i32, i32) {
    %c0_i32 = arith.constant 0 : i32
    %c0_i32_0 = arith.constant 0 : i32
    %c0_i32_1 = arith.constant 0 : i32
    return %c0_i32, %c0_i32_0 : i32, i32
  }
  func.func @transform_3(%arg0: i32) -> (i32, i32) {
    %c0_i32 = arith.constant 0 : i32
    %c0_i32_0 = arith.constant 0 : i32
    %c0_i32_1 = arith.constant 0 : i32
    return %c0_i32, %c0_i32_0 : i32, i32
  }
  func.func @transform_4(%arg0: i32) -> (i32, i32) {
    %c0_i32 = arith.constant 0 : i32
    %c0_i32_0 = arith.constant 0 : i32
    %c0_i32_1 = arith.constant 0 : i32
    return %c0_i32, %c0_i32_0 : i32, i32
  }
  func.func @transform_5(%arg0: i32) -> (i32, i32) {
    %c0_i32 = arith.constant 0 : i32
    %c0_i32_0 = arith.constant 0 : i32
    %c0_i32_1 = arith.constant 0 : i32
    return %c0_i32, %c0_i32_0 : i32, i32
  }
  func.func @transform_6(%arg0: i32) -> (i32, i32) {
    %c0_i32 = arith.constant 0 : i32
    %c0_i32_0 = arith.constant 0 : i32
    %c0_i32_1 = arith.constant 0 : i32
    return %c0_i32, %c0_i32_0 : i32, i32
  }
  func.func @transform_7(%arg0: i32) -> (i32, i32, i32, i32) {
    %c0_i32 = arith.constant 0 : i32
    %c0_i32_0 = arith.constant 0 : i32
    %c0_i32_1 = arith.constant 0 : i32
    %c0_i32_2 = arith.constant 0 : i32
    return %arg0, %c0_i32, %c0_i32_0, %c0_i32_1 : i32, i32, i32, i32
  }
}

</mosaic_0001>

<bundles_post_ra>
// kernel: tpu_custom_call.1
= control target key start
LH: loop header
LB: loop body
LE: loop exit
PB: predicated region body
PF: predicated region fallthrough
CT: control target
= control target key end

     0   :  { %12 = vsyncpa [#allocation4], 0  ;;  %s8946_s0 = inlined_call_operand.hbm [shape: f32[2,16,16,128], index: 0, kind: input, shape index: {}]   ;;  %s8947_s1 = inlined_call_operand.hbm [shape: bf16[1152,128], index: 1, kind: input, shape index: {}]   ;;  %s8948_s2 = inlined_call_operand.vmem [shape: f32[1,128], index: 2, kind: input, shape index: {}]   ;;  %s8949_s3 = inlined_call_operand.vmem [shape: f32[1,128], index: 3, kind: input, shape index: {}]   ;;  %s8950_s4 = inlined_call_operand.hbm [shape: bf16[1152,128], index: 4, kind: input, shape index: {}]   ;;  %s8951_s5 = inlined_call_operand.vmem [shape: f32[1,128], index: 5, kind: input, shape index: {}]   ;;  %s8952_s6 = inlined_call_operand.vmem [shape: f32[1,128], index: 6, kind: input, shape index: {}]   ;;  %s8953_s7 = inlined_call_operand.hbm [shape: f32[2,16,16,128], index: 7, kind: output, shape index: {}]  }
   0x1   :  { %14 = vsyncpa [#allocation4 + $0x1], 0 }
   0x2   :  { %15 = vsyncpa [#allocation7], 0 }
   0x3   :  { %16 = vsyncpa [#allocation5], 0 }
   0x4   :  { %18 = vsyncpa [#allocation5 + $0x1], 0  ;;  %s7189_s24 = smov 0   ;;  %s7191_s25 = smov 0  }
   0x5   :  { %s7193_s26 = smov 0   ;;  %s7195_s27 = smov 0  }
   0x6 LB: > { %s7210_s28 = sadd.s32 4294967295, %s7135_s27   ;;  %s5000_s29 = sadd.s32 4294967294, %s7135_s27   ;;  %s7135_s27 = sphi %s7195_s27, %s8977_s27   ;;  %s7131_s26 = sphi %s7193_s26, %s8976_s26   ;;  %s7127_s25 = sphi %s7191_s25, %s8975_s25   ;;  %s7123_s24 = sphi %s7189_s24, %s8974_s24  }
   0x7   : > { %p44_p0 = scmp.ne.s32.totalorder %s7127_s25, %s7123_s24  ;;  %p8954_p1 = scmp.eq.s32.totalorder %s7210_s28, 0 }
   0x8   : > { %p200_p3 = scmp.eq.s32.totalorder %s5000_s29, 1  ;;  %p5001_p5 = scmp.ge.s32.totalorder %s7135_s27, 1 }
   0x9   : > { %p7219_p4 = por %p8954_p1, %p44_p0  ;;  %p207_p7 = scmp.lt.s32.totalorder %s7135_s27, 3 }
   0xa   : > { %p7224_p6 = por %p200_p3, %p44_p0  ;;  %s7137_s10 = smov [#allocation6]  }
   0xb   : > { %s8957_s30 = scalar_select %p7219_p4, 1, 0 }
   0xc   : > { %s8958_s8 = scalar_select %p7224_p6, 1, 0 }
   0xd   : > { %p7229_p8 = pnand %p5001_p5, %p207_p7  ;;  %s219_s11 = sshll.u32 %s7137_s10, 4  ;;  %s7233_s11 = int_to_ptr.vmem [resolvable:$true] %s219_s11 }
   0xe   : > { %s7138_s13 = smov [#allocation8]   ;;  %s6979_s17 = scalar_lea.hbm %s8947_s1, 9216 }
   0xf   : > { %p6772_p9 = pneg %p7229_p8  ;;  %s238_s14 = sshll.u32 %s7138_s13, 4  ;;  %s7244_s14 = int_to_ptr.vmem [resolvable:$true] %s238_s14 }
  0x10   : > { %p6980_p12 = scmp.ne.s32.totalorder %s8947_s1, %s6979_s17  ;;  %p6986_p5 = scmp.lt.u32.totalorder %s6979_s17, %s8947_s1 }
  0x11   : > { %p7240_p11 = pnand %p6772_p9, %p8954_p1 }
  0x13   : > { %p6981_p13 = pneg %p7240_p11 }
  0x15   : > { %p6982_p0 = pnand %p6981_p13, %p6980_p12 }
  0x17   : > { %p6983_p3 = pneg %p6982_p0 }
  0x19   : > { %p6988_p7 = pnand %p6986_p5, %p6983_p3 }
  0x1b   : > { %6991 = shalt.err (!%p6988_p7)
}
  0x1c   : > { %s6992_s22 = scalar_lea.vmem %s7233_s11, 9216  ;;  %p7000_p2 = scmp.lt.s32.totalorder %s7233_s11, %s7233_s11 }
  0x1d   : > { %p6993_p9 = scmp.ne.s32.totalorder %s7233_s11, %s6992_s22  ;;  %p7001_p12 = scmp.lt.s32.totalorder %s6992_s22, %s6992_s22 }
  0x1f   : > { %p6995_p10 = pnand %p6993_p9, %p6981_p13  ;;  %p7002_p0 = por %p7001_p12, %p7000_p2 }
  0x21   : > { %p6996_p1 = pneg %p6995_p10 }
  0x23   : > { %p7003_p6 = pnand %p7002_p0, %p6996_p1 }
  0x25   : > { %7006 = shalt.err (!%p7003_p6)
}
  0x26   : > { %s7139_s23 = smov 64   ;;  %s7140_s29 = smov 4  }
  0x27   : > { %6775 = dma.hbm_to_vmem [thread:$0]  (!%p7240_p11), %s8947_s1, 9216, %s7233_s11, [#allocation7], %s7139_s23, %s7139_s23, %s7140_s29  }
  0x28   : > { %s7007_s17 = scalar_lea.hbm %s8950_s4, 9216 }
  0x29   : > { %p7008_p2 = scmp.ne.s32.totalorder %s8950_s4, %s7007_s17  ;;  %p7014_p10 = scmp.lt.u32.totalorder %s7007_s17, %s8950_s4 }
  0x2b   : > { %p7010_p1 = pnand %p7008_p2, %p6981_p13 }
  0x2d   : > { %p7011_p6 = pneg %p7010_p1 }
  0x2f   : > { %p7016_p3 = pnand %p7014_p10, %p7011_p6 }
  0x31   : > { %7019 = shalt.err (!%p7016_p3)
}
  0x32   : > { %s7020_s11 = scalar_lea.vmem %s7244_s14, 9216  ;;  %p7028_p12 = scmp.lt.s32.totalorder %s7244_s14, %s7244_s14 }
  0x33   : > { %p7021_p5 = scmp.ne.s32.totalorder %s7244_s14, %s7020_s11  ;;  %p7029_p0 = scmp.lt.s32.totalorder %s7020_s11, %s7020_s11 }
  0x35   : > { %p7023_p7 = pnand %p7021_p5, %p6981_p13  ;;  %p7030_p2 = por %p7029_p0, %p7028_p12 }
  0x37   : > { %p7024_p9 = pneg %p7023_p7 }
  0x39   : > { %p7031_p1 = pnand %p7030_p2, %p7024_p9 }
  0x3b   : > { %7034 = shalt.err (!%p7031_p1)
}
  0x3c   : > { %6778 = dma.hbm_to_vmem [thread:$0]  (!%p7240_p11), %s8950_s4, 9216, %s7244_s14, [#allocation7], %s7139_s23, %s7139_s23, %s7140_s29  }
  0x3d   : > { %s7299_s13 = sadd.s32 1, %s7135_s27   ;;  %s31_s12 = sadd.s32 1, %s7131_s26 }
  0x3e   : > { %s28_s15 = ssub.s32 %s7135_s27, %s7299_s13  ;;  %p38_p13 = scmp.ne.s32.totalorder %s7131_s26, %s7127_s25 }
  0x3f   : > { %p29_p6 = scmp.eq.s32.totalorder %s28_s15, 0  ;;  %p39_p10 = scmp.eq.s32.totalorder %s7135_s27, 0 }
  0x40   : > { %p8961_p3 = scmp.eq.s32.totalorder %s7210_s28, 1  ;;  %p6789_p7 = scmp.lt.s32.totalorder %s7135_s27, 2 }
  0x41   : > { %s7315_s17 = scalar_select %p29_p6, %s7131_s26, %s31_s12  }
  0x42   : > { %p7309_p5 = por %p8961_p3, %p38_p13  ;;  %p40_p9 = por %p39_p10, %p38_p13 }
  0x43   : > { %s258_s18 = sand.u32 1, %s7131_s26   ;;  %s5718_s14 = sshll.u32 %s7135_s27, 12 }
  0x44   : > { %s8962_s16 = scalar_select %p7309_p5, 1, 0 }
  0x45   : > { %s5005_s19 = sshll.u32 %s258_s18, 8  ;;  %s7322_s20 = scalar_lea.hbm %s8946_s0, %s5718_s14 }
  0x46   : > { %s262_s21 = scalar_lea.vmem [#allocation3], %s5005_s19  ;;  %p7326_p11 = pnand %p6789_p7, %p40_p9 }
  0x47   : > { %s269_s11 = sshll.u32 %s262_s21, 4  ;;  %s7330_s10 = scalar_lea.sflag [#allocation4], %s258_s18  ;;  %s7324_s11 = int_to_ptr.vmem [resolvable:$true] %s269_s11 }
  0x48   : > { %s7035_s12 = scalar_lea.hbm %s7322_s20, 4096  ;;  %p7037_p0 = pneg %p7326_p11 }
  0x49   : > { %p7036_p12 = scmp.ne.s32.totalorder %s7322_s20, %s7035_s12  ;;  %s7040_s14 = scalar_lea.hbm %s8946_s0, 8192 }
  0x4a   : > { %p7041_p13 = scmp.lt.u32.totalorder %s7322_s20, %s8946_s0  ;;  %p7042_p6 = scmp.lt.u32.totalorder %s7040_s14, %s7035_s12 }
  0x4b   : > { %p7038_p2 = pnand %p7037_p0, %p7036_p12  ;;  %p7044_p3 = scmp.lt.u32.totalorder %s7035_s12, %s7322_s20 }
  0x4c   : > { %p7043_p10 = por %p7042_p6, %p7041_p13 }
  0x4d   : > { %p7039_p1 = pneg %p7038_p2 }
  0x4e   : > { %p7045_p7 = por %p7044_p3, %p7043_p10 }
  0x50   : > { %p7046_p9 = pnand %p7045_p7, %p7039_p1 }
  0x52   : > { %7049 = shalt.err (!%p7046_p9)
}
  0x53   : > { %s7050_s18 = scalar_lea.vmem %s7324_s11, 4096  ;;  %s7141_s21 = smov [#allocation3]  }
  0x54   : > { %p7051_p12 = scmp.ne.s32.totalorder %s7324_s11, %s7050_s18  ;;  %s7055_s15 = sshll.u32 %s7141_s21, 4  ;;  %s7056_s15 = int_to_ptr.vmem [resolvable:$false] %s7055_s15 }
  0x55   : > { %s7057_s19 = scalar_lea.vmem %s7056_s15, 8192  ;;  %p7058_p4 = scmp.lt.s32.totalorder %s7324_s11, %s7056_s15 }
  0x56   : > { %p7053_p2 = pnand %p7051_p12, %p7037_p0  ;;  %p7059_p13 = scmp.lt.s32.totalorder %s7057_s19, %s7050_s18 }
  0x58   : > { %p7054_p5 = pneg %p7053_p2  ;;  %p7060_p6 = por %p7059_p13, %p7058_p4 }
  0x5a   : > { %p7061_p10 = pnand %p7060_p6, %p7054_p5 }
  0x5c   : > { %7064 = shalt.err (!%p7061_p10)
}
  0x5d   : > { %s7142_s12 = smov 128   ;;  %s7143_s14 = smov 8  }
  0x5e   : > { %6782 = dma.hbm_to_vmem [thread:$0]  (!%p7326_p11), %s7322_s20, 4096, %s7324_s11, %s7330_s10, %s7142_s12, %s7142_s12, %s7143_s14  }
  0x5f   : > { %281 = sbr.rel (%p7229_p8) target bundleno = 1173 (0x495), region = 48  ;;  %s7361_s23 = sand.u32 (!%p7229_p8), 1, %s7127_s25  }
  0x60   : > { %s5009_s29 = sshll.u32 (!%p7229_p8), %s7361_s23, 8  ;;  %s284_s18 = scalar_lea.sflag (!%p7229_p8), [#allocation4], %s7361_s23 }
  0x61   : > { %s7367_s21 = scalar_lea.vmem (!%p7229_p8), [#allocation3], %s5009_s29  ;;  %p8964_p4 = scmp.ne.s32.totalorder (!%p7229_p8), %s8957_s30, 0 }
  0x66   : > { %7110 = dma.done.wait (%p8964_p4), %s284_s18, 4096  }
  0x67   : > { %7112 = vsyncadd (%p8964_p4), %s284_s18, 4294963200  ;;  %p8965_p5 = scmp.eq.s32.totalorder %s7210_s28, 0 }
  0x69   : > { %7114 = dma.done.wait (%p8965_p5), [#allocation7], 18432   ;;  %p8966_p8 = pmov %p8965_p5 }
  0x6a   : > { %v7144_v0 = vmov 0.0|0.0   ;;  %v6835_v1 = vld [vmem:[#allocation6 + $0x40] sm:$0xff]   ;;  %v6839_v5 = vld [vmem:[#allocation6 + $0x48] sm:$0xff]   ;;  %v6843_v9 = vld [vmem:[#allocation6 + $0x50] sm:$0xff]   ;;  %v327_v31 = vlaneseq  ;;  %vm7145_vm1 = vmmov 1   ;;  %s8751_s12 = scalar_lea.vmem [#allocation9], %s5009_s29 }
  0x6b   : > { %7116 = vsyncadd (%p8966_p8), [#allocation7], 4294948864  ;;  %1704 = vmatprep.mubr.bf16.mxu0 %v7144_v0  ;;  %v6836_v2 = vld [vmem:[#allocation6 + $0xc0] sm:$0xff]   ;;  %5720 = vmatprep.subr.bf16.mxu0 %v6835_v1  ;;  %v6840_v6 = vld [vmem:[#allocation6 + $0xc8] sm:$0xff]   ;;  %s5719_s14 = sshll.u32 %s7210_s28, 12  ;;  %s4908_s29 = sshll.u32 %s8751_s12, 4  ;;  %s8899_s29 = int_to_ptr.vmem [resolvable:$true] %s4908_s29 }
  0x6c   : > { %v6837_v3 = vld [vmem:[#allocation6] sm:$0xff]   ;;  %5832 = vmatprep.subr.bf16.mxu1 %v6836_v2  ;;  %v6841_v7 = vld [vmem:[#allocation6 + $0x8] sm:$0xff]   ;;  %v6844_v10 = vld [vmem:[#allocation6 + $0xd0] sm:$0xff]   ;;  %v328_v36 = vshrl.u32 %v327_v31, 7  ;;  %s8897_s9 = scalar_lea.hbm %s8953_s7, %s5719_s14  ;;  %s4895_s28 = scalar_lea.sflag [#allocation5], %s7361_s23 }
  0x6d   : > { %v6838_v4 = vld [vmem:[#allocation6 + $0x80] sm:$0xff]   ;;  %5721 = vmatpush3.bf16.msra.mxu0 %v6837_v3  ;;  %v6842_v8 = vld [vmem:[#allocation6 + $0x88] sm:$0xff]   ;;  %v6845_v11 = vld [vmem:[#allocation6 + $0x10] sm:$0xff]   ;;  %p8971_p0 = scmp.ne.s32.totalorder %s8962_s16, 0  ;;  %s7146_s20 = smov [#allocation9]  }
  0x6e   : > { %5833 = vmatpush3.bf16.msra.mxu1 %v6838_v4  ;;  %5722 = vmatprep.subr.bf16.mxu0 %v6839_v5  ;;  %v6846_v12 = vld [vmem:[#allocation6 + $0x90] sm:$0xff]   ;;  %v6847_v13 = vld [vmem:[#allocation6 + $0x58] sm:$0xff]   ;;  %v6851_v17 = vld [vmem:[#allocation6 + $0x60] sm:$0xff]   ;;  %vm330_vm0 = vcmp.ge.s32.totalorder %v328_v36, 1  ;;  %v329_v55 = vadd.s32 8, %v328_v36  ;;  %s7069_s11 = sshll.u32 %s7146_s20, 4  ;;  %s7070_s11 = int_to_ptr.vmem [resolvable:$false] %s7069_s11 }
  0x6f   : > { %5834 = vmatprep.subr.bf16.mxu1 %v6840_v6  ;;  %v6848_v14 = vld [vmem:[#allocation6 + $0xd8] sm:$0xff]   ;;  %v6852_v18 = vld [vmem:[#allocation6 + $0xe0] sm:$0xff]   ;;  %v6855_v21 = vld [vmem:[#allocation6 + $0x68] sm:$0xff]   ;;  %s7071_s22 = scalar_lea.vmem %s7070_s11, 8192  ;;  %p7072_p7 = scmp.lt.s32.totalorder %s8899_s29, %s7070_s11 }
  0x70   : > { %v6849_v15 = vld [vmem:[#allocation6 + $0x18] sm:$0xff]   ;;  %v6853_v19 = vld [vmem:[#allocation6 + $0x20] sm:$0xff]   ;;  %v6856_v22 = vld [vmem:[#allocation6 + $0xe8] sm:$0xff]   ;;  %vm337_vm3 = vcmp.lt.s32.totalorder %v329_v55, 15 }
  0x71   : > { %5723 = vmatpush3.bf16.msra.mxu0 %v6841_v7  ;;  %v6850_v16 = vld [vmem:[#allocation6 + $0x98] sm:$0xff]   ;;  %v6854_v20 = vld [vmem:[#allocation6 + $0xa0] sm:$0xff]   ;;  %v6857_v23 = vld [vmem:[#allocation6 + $0x28] sm:$0xff]  }
  0x72   : > { %5835 = vmatpush3.bf16.msra.mxu1 %v6842_v8  ;;  %5724 = vmatprep.subr.bf16.mxu0 %v6843_v9  ;;  %v6858_v24 = vld [vmem:[#allocation6 + $0xa8] sm:$0xff]   ;;  %v6859_v25 = vld [vmem:[#allocation6 + $0x70] sm:$0xff]   ;;  %v6863_v29 = vld [vmem:[#allocation6 + $0x78] sm:$0xff]  }
  0x73   : > { %5836 = vmatprep.subr.bf16.mxu1 %v6844_v10  ;;  %v6860_v26 = vld [vmem:[#allocation6 + $0xf0] sm:$0xff]   ;;  %v6864_v30 = vld [vmem:[#allocation6 + $0xf8] sm:$0xff]   ;;  %v342_v34 = vld [vmem:[%s7367_s21] sm:$0xff] }
  0x74   : > { %v6861_v27 = vld [vmem:[#allocation6 + $0x30] sm:$0xff]   ;;  %v6865_v32 = vld [vmem:[#allocation6 + $0x38] sm:$0xff]   ;;  %v343_v35 = vld [vmem:[%s7367_s21 + $0x8] sm:$0xff]  ;;  %375 = vst [vmem:[#allocation2 + $0x19] sm:$0xff] %v342_v34 }
  0x75   : > { %5725 = vmatpush3.bf16.msra.mxu0 %v6845_v11  ;;  %v6862_v28 = vld [vmem:[#allocation6 + $0xb0] sm:$0xff]   ;;  %v6866_v33 = vld [vmem:[#allocation6 + $0xb8] sm:$0xff]   ;;  %376 = vst [vmem:[#allocation2 + $0x21] sm:$0xff] %v343_v35  ;;  %v6867_v37 = vld [vmem:[#allocation6 + $0x140] sm:$0xff]   ;;  %v7380_v38 = vpack.c.bf16 %v343_v35, %v342_v34 }
  0x76   : > { %5837 = vmatpush3.bf16.msra.mxu1 %v6846_v12  ;;  %5726 = vmatprep.subr.bf16.mxu0 %v6847_v13  ;;  %v6868_v39 = vld [vmem:[#allocation6 + $0x100] sm:$0xff]   ;;  %v344_v40 = vld [vmem:[%s7367_s21 + $0x10] sm:$0xff]  ;;  %v345_v41 = vld [vmem:[%s7367_s21 + $0x18] sm:$0xff] }
  0x77   : > { %5838 = vmatprep.subr.bf16.mxu1 %v6848_v14  ;;  %377 = vst [vmem:[#allocation2 + $0x31] sm:$0xff] %v344_v40  ;;  %v346_v42 = vld [vmem:[%s7367_s21 + $0x20] sm:$0xff]  ;;  %378 = vst [vmem:[#allocation2 + $0x39] sm:$0xff] %v345_v41  ;;  %v347_v43 = vld [vmem:[%s7367_s21 + $0x28] sm:$0xff]  ;;  %v7407_v53 = vpack.c.bf16 %v345_v41, %v344_v40 }
  0x78   : > { %379 = vst [vmem:[#allocation2 + $0x49] sm:$0xff] %v346_v42  ;;  %380 = vst [vmem:[#allocation2 + $0x51] sm:$0xff] %v347_v43  ;;  %v6869_v44 = vld [vmem:[#allocation6 + $0x148] sm:$0xff]   ;;  %v7389_v46 = vld [vmem:[%s7367_s21 + $0x30] sm:$0xff]  ;;  %v7433_v5 = vpack.c.bf16 %v347_v43, %v346_v42 }
  0x79   : > { %5727 = vmatpush3.bf16.msra.mxu0 %v6849_v15  ;;  %v6870_v45 = vld [vmem:[#allocation6 + $0x108] sm:$0xff]   ;;  %v7392_v47 = vld [vmem:[%s7367_s21 + $0x38] sm:$0xff]  ;;  %381 = vst [vmem:[#allocation2 + $0x61] sm:$0xff] %v7389_v46  ;;  %v7397_v48 = vld [vmem:[%s7367_s21 + $0x40] sm:$0xff] }
  0x7a   : > { %5839 = vmatpush3.bf16.msra.mxu1 %v6850_v16  ;;  %5728 = vmatprep.subr.bf16.mxu0 %v6851_v17  ;;  %382 = vst [vmem:[#allocation2 + $0x69] sm:$0xff] %v7392_v47  ;;  %v7400_v49 = vld [vmem:[%s7367_s21 + $0x48] sm:$0xff]  ;;  %vm7403_vm2 = vmpackc.low %vm7145_vm1, %vm330_vm0  ;;  %v6871_v56 = vld [vmem:[#allocation6 + $0x150] sm:$0xff]  }
  0x7b   : > { %5840 = vmatprep.subr.bf16.mxu1 %v6852_v18  ;;  %v599_v50 = vld [vmem:[#allocation2 + $0x18] sm:$0xff]  ;;  %383 = vst [vmem:[#allocation2 + $0x79] sm:$0xff] %v7397_v48  ;;  %384 = vst [vmem:[#allocation2 + $0x81] sm:$0xff] %v7400_v49  ;;  %v6872_v62 = vld [vmem:[#allocation6 + $0x110] sm:$0xff]   ;;  %v7513_v35 = vpack.c.bf16 %v7400_v49, %v7397_v48 }
  0x7c   : > { %v600_v51 = vld [vmem:[#allocation2 + $0x20] sm:$0xff]  ;;  %vm7427_vm4 = vmpackc.low %vm337_vm3, %vm7145_vm1  ;;  %v7436_v6 = vld [vmem:[%s7367_s21 + $0x58] sm:$0xff] }
  0x7d   : > { %5729 = vmatpush3.bf16.msra.mxu0 %v6853_v19  ;;  %v5131_v54 = vpack.c.bf16 %v600_v51, %v599_v50  ;;  %v537_v60 = vld [vmem:[#allocation2 + $0x1a] sm:$0xff]  ;;  %v538_v61 = vld [vmem:[#allocation2 + $0x22] sm:$0xff]  ;;  %386 = vst [vmem:[#allocation2 + $0x99] sm:$0xff] %v7436_v6  ;;  %v7442_v8 = vld [vmem:[%s7367_s21 + $0x60] sm:$0xff] }
  0x7e   : > { %5841 = vmatpush3.bf16.msra.mxu1 %v6854_v20  ;;  %5730 = vmatprep.subr.bf16.mxu0 %v6855_v21  ;;  %v601_v57 = vld [vmem:[#allocation2 + $0x30] sm:$0xff]  ;;  %v602_v58 = vld [vmem:[#allocation2 + $0x38] sm:$0xff]  ;;  %v7420_v63 = vld [vmem:[%s7367_s21 + $0x50] sm:$0xff]  ;;  %v7431_v4 = vpack.c.bf16 %v538_v61, %v537_v60  ;;  %387 = vst [vmem:[#allocation2 + $0xa9] sm:$0xff] %v7442_v8 }
  0x7f   : > { %5842 = vmatprep.subr.bf16.mxu1 %v6856_v22  ;;  %5132 = vmatprep.mubr.msk.bf16.mxu1 %vm7403_vm2, %v5131_v54  ;;  %v7416_v59 = vpack.c.bf16 %v602_v58, %v601_v57  ;;  %v603_v1 = vld [vmem:[#allocation2 + $0x48] sm:$0xff]  ;;  %v604_v2 = vld [vmem:[#allocation2 + $0x50] sm:$0xff]  ;;  %385 = vst [vmem:[#allocation2 + $0x91] sm:$0xff] %v7420_v63  ;;  %v7445_v9 = vld [vmem:[%s7367_s21 + $0x68] sm:$0xff] }
  0x80   : > { %v7438_v7 = vpack.c.bf16 %v604_v2, %v603_v1  ;;  %388 = vst [vmem:[#allocation2 + $0xb1] sm:$0xff] %v7445_v9  ;;  %v6873_v10 = vld [vmem:[#allocation6 + $0x158] sm:$0xff]   ;;  %v539_v11 = vld [vmem:[#allocation2 + $0x32] sm:$0xff]  ;;  %v540_v12 = vld [vmem:[#allocation2 + $0x3a] sm:$0xff] }
  0x81   : > { %5731 = vmatpush3.bf16.msra.mxu0 %v6857_v23  ;;  %v6874_v13 = vld [vmem:[#allocation6 + $0x118] sm:$0xff]   ;;  %v7453_v14 = vld [vmem:[%s7367_s21 + $0x70] sm:$0xff]  ;;  %v7464_v17 = vld [vmem:[%s7367_s21 + $0x80] sm:$0xff] }
  0x82   : > { %5843 = vmatpush3.bf16.msra.mxu1 %v6858_v24  ;;  %5732 = vmatprep.subr.bf16.mxu0 %v6859_v25  ;;  %v605_v15 = vld [vmem:[#allocation2 + $0x60] sm:$0xff]  ;;  %v7460_v16 = vld [vmem:[%s7367_s21 + $0x78] sm:$0xff]  ;;  %389 = vst [vmem:[#allocation2 + $0xc1] sm:$0xff] %v7453_v14  ;;  %v7467_v18 = vld [vmem:[%s7367_s21 + $0x88] sm:$0xff]  ;;  %v7481_v24 = vpack.c.bf16 %v540_v12, %v539_v11  ;;  %v7485_v25 = vpack.c.bf16 %v7392_v47, %v7389_v46 }
  0x83   : > { %5844 = vmatprep.subr.bf16.mxu1 %v6860_v26  ;;  %v606_v19 = vld [vmem:[#allocation2 + $0x68] sm:$0xff]  ;;  %390 = vst [vmem:[#allocation2 + $0xc9] sm:$0xff] %v7460_v16  ;;  %391 = vst [vmem:[#allocation2 + $0xd9] sm:$0xff] %v7464_v17  ;;  %v6875_v20 = vld [vmem:[#allocation6 + $0x160] sm:$0xff]   ;;  %v7573_v12 = vpack.c.bf16 %v7445_v9, %v7442_v8 }
  0x84   : > { %392 = vst [vmem:[#allocation2 + $0xe1] sm:$0xff] %v7467_v18  ;;  %v6876_v21 = vld [vmem:[#allocation6 + $0x120] sm:$0xff]   ;;  %v7476_v22 = vld [vmem:[%s7367_s21 + $0x90] sm:$0xff]  ;;  %v7479_v23 = vld [vmem:[%s7367_s21 + $0x98] sm:$0xff]  ;;  %v7489_v26 = vpack.c.bf16 %v606_v19, %v605_v15 }
  0x85   : > { %5733 = vmatpush3.bf16.msra.mxu0 %v6861_v27  ;;  %393 = vst [vmem:[#allocation2 + $0xf1] sm:$0xff] %v7476_v22  ;;  %394 = vst [vmem:[#allocation2 + $0xf9] sm:$0xff] %v7479_v23  ;;  %v7492_v27 = vld [vmem:[%s7367_s21 + $0xa0] sm:$0xff]  ;;  %v607_v31 = vld [vmem:[#allocation2 + $0x78] sm:$0xff] }
  0x86   : > { %5845 = vmatpush3.bf16.msra.mxu1 %v6862_v28  ;;  %5734 = vmatprep.subr.bf16.mxu0 %v6863_v29  ;;  %v7495_v28 = vld [vmem:[%s7367_s21 + $0xa8] sm:$0xff]  ;;  %395 = vst [vmem:[#allocation2 + $0x109] sm:$0xff] %v7492_v27  ;;  %v541_v29 = vld [vmem:[#allocation2 + $0x4a] sm:$0xff]  ;;  %v543_v42 = vld [vmem:[#allocation2 + $0x62] sm:$0xff] }
  0x87   : > { %5846 = vmatprep.subr.bf16.mxu1 %v6864_v30  ;;  %396 = vst [vmem:[#allocation2 + $0x111] sm:$0xff] %v7495_v28  ;;  %v542_v30 = vld [vmem:[#allocation2 + $0x52] sm:$0xff]  ;;  %v7521_v40 = vld [vmem:[%s7367_s21 + $0xb8] sm:$0xff]  ;;  %v6879_v47 = vld [vmem:[#allocation6 + $0x170] sm:$0xff]  }
  0x88   : > { %v7509_v34 = vpack.c.bf16 %v542_v30, %v541_v29  ;;  %v6878_v36 = vld [vmem:[#allocation6 + $0x128] sm:$0xff]   ;;  %v7524_v41 = vld [vmem:[%s7367_s21 + $0xc0] sm:$0xff]  ;;  %398 = vst [vmem:[#allocation2 + $0x129] sm:$0xff] %v7521_v40  ;;  %v6880_v48 = vld [vmem:[#allocation6 + $0x130] sm:$0xff]  }
  0x89   : > { %5735 = vmatpush3.bf16.msra.mxu0 %v6865_v32  ;;  %v608_v32 = vld [vmem:[#allocation2 + $0x80] sm:$0xff]  ;;  %399 = vst [vmem:[#allocation2 + $0x139] sm:$0xff] %v7524_v41  ;;  %v544_v43 = vld [vmem:[#allocation2 + $0x6a] sm:$0xff]  ;;  %v610_v46 = vld [vmem:[#allocation2 + $0x98] sm:$0xff] }
  0x8a   : > { %5847 = vmatpush3.bf16.msra.mxu1 %v6866_v33  ;;  %5944 = vmatprep.subr.bf16.mxu0 %v6867_v37  ;;  %v6877_v33 = vld [vmem:[#allocation6 + $0x168] sm:$0xff]   ;;  %v7515_v37 = vpack.c.bf16 %v608_v32, %v607_v31  ;;  %v6881_v49 = vld [vmem:[#allocation6 + $0x1c0] sm:$0xff]   ;;  %v7543_v51 = vpack.c.bf16 %v544_v43, %v543_v42  ;;  %v7556_v58 = vld [vmem:[%s7367_s21 + $0xd8] sm:$0xff] }
  0x8b   : > { %v6882_v50 = vld [vmem:[#allocation6 + $0x180] sm:$0xff]   ;;  %6056 = vmatprep.subr.bf16.mxu1 %v6881_v49  ;;  %v6883_v55 = vld [vmem:[#allocation6 + $0x1c8] sm:$0xff]   ;;  %v546_v61 = vld [vmem:[#allocation2 + $0x82] sm:$0xff]  ;;  %402 = vst [vmem:[#allocation2 + $0x159] sm:$0xff] %v7556_v58 }
  0x8c   : > { %1705 = vmatmul.mubr.bf16.vlgmr.msra.gmra.mrb[0].mxu0 %v7144_v0  ;;  %v545_v60 = vld [vmem:[#allocation2 + $0x7a] sm:$0xff]  ;;  %v547_v29 = vld [vmem:[#allocation2 + $0x92] sm:$0xff]  ;;  %v6889_v31 = vld [vmem:[#allocation6 + $0x178] sm:$0xff]  }
  0x8d   : > { %5945 = vmatpush3.bf16.msra.mxu0 %v6868_v39  ;;  %1712 = vmatprep.mubr.bf16.mxu0 %v7380_v38  ;;  %v7518_v39 = vld [vmem:[%s7367_s21 + $0xb0] sm:$0xff]  ;;  %v6884_v1 = vld [vmem:[#allocation6 + $0x188] sm:$0xff]   ;;  %v7569_v11 = vpack.c.bf16 %v546_v61, %v545_v60  ;;  %v614_v9 = vld [vmem:[#allocation2 + $0xc8] sm:$0xff] }
  0x8e   : > { %5946 = vmatprep.subr.bf16.mxu0 %v6869_v44  ;;  %1866 = vmatmul.mubr.bf16.vlgmr.msra.gmra.mrb[0].mxu1 %v7144_v0  ;;  %397 = vst [vmem:[#allocation2 + $0x121] sm:$0xff] %v7518_v39  ;;  %v7533_v44 = vld [vmem:[%s7367_s21 + $0xc8] sm:$0xff]  ;;  %v6885_v2 = vld [vmem:[#allocation6 + $0x1d0] sm:$0xff]   ;;  %v6890_v32 = vld [vmem:[#allocation6 + $0x138] sm:$0xff]  }
  0x8f   : > { %5135 = vmatprep.mubr.msk.bf16.mxu1 %vm7403_vm2, %v7416_v59  ;;  %400 = vst [vmem:[#allocation2 + $0x141] sm:$0xff] %v7533_v44  ;;  %6057 = vmatpush3.bf16.msra.mxu1 %v6882_v50  ;;  %v371_v15 = vld [vmem:[%s7367_s21 + $0xe8] sm:$0xff]  ;;  %v613_v8 = vld [vmem:[#allocation2 + $0xc0] sm:$0xff]  ;;  %v549_v50 = vld [vmem:[#allocation2 + $0xaa] sm:$0xff] }
  0x90   : > { %6058 = vmatprep.subr.bf16.mxu1 %v6883_v55  ;;  %404 = vst [vmem:[#allocation2 + $0x171] sm:$0xff] %v371_v15  ;;  %v548_v30 = vld [vmem:[#allocation2 + $0x9a] sm:$0xff]  ;;  %v550_v55 = vld [vmem:[#allocation2 + $0xb2] sm:$0xff] }
  0x91   : > { %5947 = vmatpush3.bf16.msra.mxu0 %v6870_v45  ;;  %v609_v45 = vld [vmem:[#allocation2 + $0x90] sm:$0xff]  ;;  %v6893_v42 = vld [vmem:[#allocation6 + $0x1e8] sm:$0xff]   ;;  %v7591_v43 = vpack.c.bf16 %v548_v30, %v547_v29  ;;  %v616_v60 = vld [vmem:[#allocation2 + $0xe0] sm:$0xff]  ;;  %v7642_v29 = vpack.c.bf16 %v7479_v23, %v7476_v22  ;;  %v7660_v23 = vpack.c.bf16 %v7495_v28, %v7492_v27  ;;  %v7678_v28 = vpack.c.bf16 %v7521_v40, %v7518_v39 }
  0x92   : > { %5948 = vmatprep.subr.bf16.mxu0 %v6871_v56  ;;  %v7550_v56 = vld [vmem:[%s7367_s21 + $0xd0] sm:$0xff]  ;;  %v7552_v57 = vpack.c.bf16 %v610_v46, %v609_v45  ;;  %v7595_v45 = vpack.c.bf16 %v7460_v16, %v7453_v14  ;;  %v6894_v49 = vld [vmem:[#allocation6 + $0x1a8] sm:$0xff]   ;;  %v7696_v40 = vpack.c.bf16 %v7533_v44, %v7524_v41 }
  0x93   : > { %401 = vst [vmem:[#allocation2 + $0x151] sm:$0xff] %v7550_v56  ;;  %6059 = vmatpush3.bf16.msra.mxu1 %v6884_v1  ;;  %v7598_v46 = vld [vmem:[%s7367_s21 + $0xf0] sm:$0xff]  ;;  %v615_v16 = vld [vmem:[#allocation2 + $0xd8] sm:$0xff]  ;;  %v7619_v1 = vpack.c.bf16 %v550_v55, %v549_v50  ;;  %v7714_v44 = vpack.c.bf16 %v7556_v58, %v7550_v56 }
  0x94   : > { %5087 = vmatmul.mubr.msk.bf16.gmra.mrb[4].mxu0 %vm7403_vm2, %v5131_v54  ;;  %v7547_v54 = vpack.c.bf16 %v7436_v6, %v7420_v63  ;;  %v612_v63 = vld [vmem:[#allocation2 + $0xb0] sm:$0xff]  ;;  %v6886_v6 = vld [vmem:[#allocation6 + $0x190] sm:$0xff]   ;;  %6060 = vmatprep.subr.bf16.mxu1 %v6885_v2  ;;  %405 = vst [vmem:[#allocation2 + $0x181] sm:$0xff] %v7598_v46  ;;  %v7623_v2 = vpack.c.bf16 %v7467_v18, %v7464_v17  ;;  %v618_v18 = vld [vmem:[#allocation2 + $0xf8] sm:$0xff] }
  0x95   : > { %1720 = vmatprep.mubr.bf16.mxu0 %v7407_v53  ;;  %5949 = vmatpush3.bf16.msra.mxu0 %v6872_v62  ;;  %v611_v62 = vld [vmem:[#allocation2 + $0xa8] sm:$0xff]  ;;  %v6895_v14 = vld [vmem:[#allocation6 + $0x1f0] sm:$0xff]   ;;  %v617_v17 = vld [vmem:[#allocation2 + $0xf0] sm:$0xff] }
  0x96   : > { %5138 = vmatmul.mubr.msk.bf16.gmra.mrb[4].mxu1 %vm7427_vm4, %v7431_v4  ;;  %5950 = vmatprep.subr.bf16.mxu0 %v6873_v10  ;;  %v6887_v10 = vld [vmem:[#allocation6 + $0x1d8] sm:$0xff]   ;;  %v7577_v19 = vpack.c.bf16 %v612_v63, %v611_v62  ;;  %v6896_v61 = vld [vmem:[#allocation6 + $0x1b0] sm:$0xff]   ;;  %v7617_v63 = vld [vmem:[#allocation6 + $0x200] sm:$0xff]   ;;  %v7644_v30 = vpack.c.bf16 %v618_v18, %v617_v17 }
  0x97   : > { %5141 = vmatprep.mubr.msk.bf16.mxu1 %vm7403_vm2, %v7438_v7  ;;  %6061 = vmatpush3.bf16.msra.mxu1 %v6886_v6  ;;  %v6897_v62 = vld [vmem:[#allocation6 + $0x1f8] sm:$0xff]   ;;  %v7625_v6 = vpack.c.bf16 %v616_v60, %v615_v16  ;;  %v558_v16 = vld [vmem:[#allocation2 + $0x112] sm:$0xff] }
  0x98   : > { %6062 = vmatprep.subr.bf16.mxu1 %v6887_v10  ;;  %v6898_v10 = vld [vmem:[#allocation6 + $0x1b8] sm:$0xff]   ;;  %v623_v60 = vld [vmem:[#allocation2 + $0x138] sm:$0xff] }
  0x99   : > { %5951 = vmatpush3.bf16.msra.mxu0 %v6874_v13  ;;  %v370_v13 = vld [vmem:[%s7367_s21 + $0xe0] sm:$0xff]  ;;  %v622_v50 = vld [vmem:[#allocation2 + $0x128] sm:$0xff] }
  0x9a   : > { %5952 = vmatprep.subr.bf16.mxu0 %v6875_v20  ;;  %403 = vst [vmem:[#allocation2 + $0x169] sm:$0xff] %v370_v13  ;;  %v7579_v20 = vpack.c.bf16 %v371_v15, %v370_v13  ;;  %v551_v13 = vld [vmem:[#allocation2 + $0xc2] sm:$0xff]  ;;  %v552_v15 = vld [vmem:[#allocation2 + $0xca] sm:$0xff]  ;;  %v626_v17 = vld [vmem:[#allocation2 + $0x158] sm:$0xff] }
  0x9c   : > { %5090 = vmatmul.mubr.msk.bf16.gmra.mrb[8].mxu0 %vm7403_vm2, %v7416_v59 }
  0x9d   : > { %1728 = vmatprep.mubr.bf16.mxu0 %v7433_v5  ;;  %5953 = vmatpush3.bf16.msra.mxu0 %v6876_v21  ;;  %v6888_v21 = vld [vmem:[#allocation6 + $0x198] sm:$0xff]  }
  0x9e   : > { %5144 = vmatmul.mubr.msk.bf16.gmra.mrb[8].mxu1 %vm7427_vm4, %v7481_v24  ;;  %5954 = vmatprep.subr.bf16.mxu0 %v6877_v33  ;;  %v6891_v33 = vld [vmem:[#allocation6 + $0x1e0] sm:$0xff]  }
  0x9f   : > { %5147 = vmatprep.mubr.msk.bf16.mxu1 %vm7403_vm2, %v7489_v26  ;;  %6063 = vmatpush3.bf16.msra.mxu1 %v6888_v21  ;;  %v7638_v21 = vpack.c.bf16 %v552_v15, %v551_v13  ;;  %v560_v13 = vld [vmem:[#allocation2 + $0x12a] sm:$0xff] }
  0xa0   : > { %6064 = vmatprep.subr.bf16.mxu1 %v6891_v33  ;;  %v625_v15 = vld [vmem:[#allocation2 + $0x150] sm:$0xff] }
  0xa1   : > { %5955 = vmatpush3.bf16.msra.mxu0 %v6878_v36  ;;  %v6892_v36 = vld [vmem:[#allocation6 + $0x1a0] sm:$0xff]   ;;  %v7716_v18 = vpack.c.bf16 %v626_v17, %v625_v15  ;;  %v6902_v15 = vld [vmem:[#allocation6 + $0x218] sm:$0xff]  }
  0xa2   : > { %5956 = vmatprep.subr.bf16.mxu0 %v6879_v47  ;;  %v7600_v47 = vpack.c.bf16 %v614_v9, %v613_v8  ;;  %v554_v8 = vld [vmem:[#allocation2 + $0xe2] sm:$0xff] }
  0xa3   : > { %6065 = vmatpush3.bf16.msra.mxu1 %v6892_v36  ;;  %v619_v9 = vld [vmem:[#allocation2 + $0x108] sm:$0xff]  ;;  %v555_v36 = vld [vmem:[#allocation2 + $0xf2] sm:$0xff] }
  0xa4   : > { %5093 = vmatmul.mubr.msk.bf16.gmra.mrb[12].mxu0 %vm7403_vm2, %v7438_v7  ;;  %6066 = vmatprep.subr.bf16.mxu1 %v6893_v42  ;;  %v556_v42 = vld [vmem:[#allocation2 + $0xfa] sm:$0xff] }
  0xa5   : > { %1736 = vmatprep.mubr.bf16.mxu0 %v7485_v25  ;;  %5957 = vmatpush3.bf16.msra.mxu0 %v6880_v48  ;;  %v7603_v48 = vld [vmem:[%s7367_s21 + $0xf8] sm:$0xff]  ;;  %v7674_v27 = vpack.c.bf16 %v556_v42, %v555_v36  ;;  %v563_v36 = vld [vmem:[#allocation2 + $0x152] sm:$0xff]  ;;  %v564_v42 = vld [vmem:[#allocation2 + $0x15a] sm:$0xff] }
  0xa6   : > { %5150 = vmatmul.mubr.msk.bf16.gmra.mrb[12].mxu1 %vm7427_vm4, %v7509_v34  ;;  %5958 = vmatprep.subr.bf16.mxu0 %v6889_v31  ;;  %406 = vst [vmem:[#allocation2 + $0x189] sm:$0xff] %v7603_v48  ;;  %v553_v31 = vld [vmem:[#allocation2 + $0xda] sm:$0xff] }
  0xa7   : > { %5153 = vmatprep.mubr.msk.bf16.mxu1 %vm7403_vm2, %v7515_v37  ;;  %6067 = vmatpush3.bf16.msra.mxu1 %v6894_v49  ;;  %v7656_v22 = vpack.c.bf16 %v554_v8, %v553_v31  ;;  %v621_v49 = vld [vmem:[#allocation2 + $0x120] sm:$0xff] }
  0xa8   : > { %6068 = vmatprep.subr.bf16.mxu1 %v6895_v14  ;;  %v7680_v55 = vpack.c.bf16 %v622_v50, %v621_v49  ;;  %v557_v14 = vld [vmem:[#allocation2 + $0x10a] sm:$0xff]  ;;  %v561_v31 = vld [vmem:[#allocation2 + $0x13a] sm:$0xff]  ;;  %v562_v8 = vld [vmem:[#allocation2 + $0x142] sm:$0xff] }
  0xa9   : > { %5959 = vmatpush3.bf16.msra.mxu0 %v6890_v32  ;;  %v620_v32 = vld [vmem:[#allocation2 + $0x110] sm:$0xff]  ;;  %v7692_v39 = vpack.c.bf16 %v558_v16, %v557_v14  ;;  %v7728_v56 = vpack.c.bf16 %v562_v8, %v561_v31  ;;  %v629_v49 = vld [vmem:[#allocation2 + $0x180] sm:$0xff]  ;;  %v7742_v14 = vpack.c.bf16 %v564_v42, %v563_v36 }
  0xaa   : > { %6664 = vmatprep.subr.bf16.mxu0 %v7617_v63  ;;  %v7662_v33 = vpack.c.bf16 %v620_v32, %v619_v9  ;;  %v627_v9 = vld [vmem:[#allocation2 + $0x168] sm:$0xff]  ;;  %v628_v32 = vld [vmem:[#allocation2 + $0x170] sm:$0xff] }
  0xab   : > { %6069 = vmatpush3.bf16.msra.mxu1 %v6896_v61  ;;  %v624_v61 = vld [vmem:[#allocation2 + $0x140] sm:$0xff]  ;;  %v7730_v58 = vpack.c.bf16 %v628_v32, %v627_v9  ;;  %v6908_v31 = vld [vmem:[#allocation8] sm:$0xff]  }
  0xac   : > { %5096 = vmatmul.mubr.msk.bf16.gmra.mrb[16].mxu0 %vm7403_vm2, %v7489_v26  ;;  %6070 = vmatprep.subr.bf16.mxu1 %v6897_v62  ;;  %v7698_v62 = vpack.c.bf16 %v624_v61, %v623_v60  ;;  %v565_v60 = vld [vmem:[#allocation2 + $0x16a] sm:$0xff]  ;;  %v566_v61 = vld [vmem:[#allocation2 + $0x172] sm:$0xff] }
  0xad   : > { %1744 = vmatprep.mubr.bf16.mxu0 %v7513_v35  ;;  %v630_v50 = vld [vmem:[#allocation2 + $0x188] sm:$0xff] }
  0xae   : > { %5156 = vmatmul.mubr.msk.bf16.gmra.mrb[16].mxu1 %vm7427_vm4, %v7543_v51  ;;  %v7744_v16 = vpack.c.bf16 %v630_v50, %v629_v49  ;;  %v725_v8 = vld [vmem:[#allocation2 + $0x182] sm:$0xff]  ;;  %v726_v9 = vld [vmem:[#allocation2 + $0x18a] sm:$0xff] }
  0xaf   : > { %5159 = vmatprep.mubr.msk.bf16.mxu1 %vm7403_vm2, %v7552_v57  ;;  %6071 = vmatpush3.bf16.msra.mxu1 %v6898_v10  ;;  %v559_v10 = vld [vmem:[#allocation2 + $0x122] sm:$0xff] }
  0xb0   : > { %v7710_v41 = vpack.c.bf16 %v560_v13, %v559_v10  ;;  %v7758_v10 = vpack.c.bf16 %v566_v61, %v565_v60  ;;  %v6900_v13 = vld [vmem:[#allocation6 + $0x208] sm:$0xff]  }
  0xb4   : > { %5099 = vmatmul.mubr.msk.bf16.gmra.mrb[20].mxu0 %vm7403_vm2, %v7515_v37 }
  0xb5   : > { %1752 = vmatprep.mubr.bf16.mxu0 %v7547_v54 }
  0xb6   : > { %5162 = vmatmul.mubr.msk.bf16.gmra.mrb[20].mxu1 %vm7427_vm4, %v7569_v11 }
  0xb7   : > { %5165 = vmatprep.mubr.msk.bf16.mxu1 %vm7403_vm2, %v7577_v19 }
  0xbc   : > { %5102 = vmatmul.mubr.msk.bf16.gmra.mrb[24].mxu0 %vm7403_vm2, %v7552_v57 }
  0xbd   : > { %1760 = vmatprep.mubr.bf16.mxu0 %v7573_v12 }
  0xbe   : > { %5168 = vmatmul.mubr.msk.bf16.gmra.mrb[24].mxu1 %vm7427_vm4, %v7591_v43 }
  0xbf   : > { %5171 = vmatprep.mubr.msk.bf16.mxu1 %vm7403_vm2, %v7600_v47 }
  0xc4   : > { %5105 = vmatmul.mubr.msk.bf16.gmra.mrb[28].mxu0 %vm7403_vm2, %v7577_v19 }
  0xc5   : > { %1768 = vmatprep.mubr.bf16.mxu0 %v7595_v45 }
  0xc6   : > { %5174 = vmatmul.mubr.msk.bf16.gmra.mrb[28].mxu1 %vm7427_vm4, %v7619_v1 }
  0xc7   : > { %5177 = vmatprep.mubr.msk.bf16.mxu1 %vm7403_vm2, %v7625_v6 }
  0xcc   : > { %5108 = vmatmul.mubr.msk.bf16.gmra.mrb[32].mxu0 %vm7403_vm2, %v7600_v47 }
  0xcd   : > { %1776 = vmatprep.mubr.bf16.mxu0 %v7623_v2 }
  0xce   : > { %5180 = vmatmul.mubr.msk.bf16.gmra.mrb[32].mxu1 %vm7427_vm4, %v7638_v21 }
  0xcf   : > { %5183 = vmatprep.mubr.msk.bf16.mxu1 %vm7403_vm2, %v7644_v30 }
  0xd4   : > { %5111 = vmatmul.mubr.msk.bf16.gmra.mrb[36].mxu0 %vm7403_vm2, %v7625_v6 }
  0xd5   : > { %1784 = vmatprep.mubr.bf16.mxu0 %v7642_v29 }
  0xd6   : > { %5186 = vmatmul.mubr.msk.bf16.gmra.mrb[36].mxu1 %vm7427_vm4, %v7656_v22 }
  0xd7   : > { %5189 = vmatprep.mubr.msk.bf16.mxu1 %vm7403_vm2, %v7662_v33 }
  0xdc   : > { %5114 = vmatmul.mubr.msk.bf16.gmra.mrb[40].mxu0 %vm7403_vm2, %v7644_v30 }
  0xdd   : > { %1792 = vmatprep.mubr.bf16.mxu0 %v7660_v23 }
  0xde   : > { %5192 = vmatmul.mubr.msk.bf16.gmra.mrb[40].mxu1 %vm7427_vm4, %v7674_v27 }
  0xdf   : > { %5195 = vmatprep.mubr.msk.bf16.mxu1 %vm7403_vm2, %v7680_v55 }
  0xe4   : > { %5117 = vmatmul.mubr.msk.bf16.gmra.mrb[44].mxu0 %vm7403_vm2, %v7662_v33 }
  0xe5   : > { %1800 = vmatprep.mubr.bf16.mxu0 %v7678_v28 }
  0xe6   : > { %5198 = vmatmul.mubr.msk.bf16.gmra.mrb[44].mxu1 %vm7427_vm4, %v7692_v39 }
  0xe7   : > { %5201 = vmatprep.mubr.msk.bf16.mxu1 %vm7403_vm2, %v7698_v62 }
  0xec   : > { %5120 = vmatmul.mubr.msk.bf16.gmra.mrb[48].mxu0 %vm7403_vm2, %v7680_v55 }
  0xed   : > { %1808 = vmatprep.mubr.bf16.mxu0 %v7696_v40 }
  0xee   : > { %5204 = vmatmul.mubr.msk.bf16.gmra.mrb[48].mxu1 %vm7427_vm4, %v7710_v41 }
  0xef   : > { %5207 = vmatprep.mubr.msk.bf16.mxu1 %vm7403_vm2, %v7716_v18 }
  0xf4   : > { %5123 = vmatmul.mubr.msk.bf16.gmra.mrb[52].mxu0 %vm7403_vm2, %v7698_v62 }
  0xf5   : > { %1816 = vmatprep.mubr.bf16.mxu0 %v7714_v44 }
  0xf6   : > { %5210 = vmatmul.mubr.msk.bf16.gmra.mrb[52].mxu1 %vm7427_vm4, %v7728_v56 }
  0xf7   : > { %5213 = vmatprep.mubr.msk.bf16.mxu1 %vm7403_vm2, %v7730_v58 }
  0xfc   : > { %5126 = vmatmul.mubr.msk.bf16.gmra.mrb[56].mxu0 %vm7403_vm2, %v7716_v18 }
  0xfd   : > { %1824 = vmatprep.mubr.bf16.mxu0 %v7579_v20 }
  0xfe   : > { %5216 = vmatmul.mubr.msk.bf16.gmra.mrb[56].mxu1 %vm7427_vm4, %v7742_v14 }
  0xff   : > { %5219 = vmatprep.mubr.msk.bf16.mxu1 %vm7403_vm2, %v7744_v16 }
 0x104   : > { %5129 = vmatmul.mubr.msk.bf16.gmra.mrb[60].mxu0 %vm7403_vm2, %v7730_v58 }
 0x105   : > { %5225 = vmatprep.mubr.msk.bf16.mxu0 %vm7427_vm4, %v7431_v4  ;;  %v6901_v4 = vld [vmem:[#allocation6 + $0x210] sm:$0xff]  }
 0x106   : > { %5222 = vmatmul.mubr.msk.bf16.gmra.mrb[60].mxu1 %vm7427_vm4, %v7758_v10 }
 0x107   : > { %2187 = vmatprep.mubr.bf16.mxu1 %v7407_v53 }
 0x10c   : > { %2027 = vmatmul.mubr.bf16.vlgmr.msra.gmra.mrb[64].mxu0 %v7380_v38  ;;  %v6903_v38 = vld [vmem:[#allocation6 + $0x220] sm:$0xff]  }
 0x10d   : > { %6665 = vmatpush3.bf16.msra.mxu0 %v7617_v63  ;;  %5228 = vmatprep.mubr.msk.bf16.mxu0 %vm7427_vm4, %v7481_v24  ;;  %v6904_v24 = vld [vmem:[#allocation6 + $0x228] sm:$0xff]  }
 0x10e   : > { %6666 = vmatprep.subr.bf16.mxu0 %v6900_v13  ;;  %5273 = vmatmul.mubr.msk.bf16.vlgmr.msra.gmra.mrb[64].mxu1 %vm7403_vm2, %v7416_v59  ;;  %v6906_v59 = vld [vmem:[#allocation6 + $0x238] sm:$0xff]  }
 0x10f   : > { %2195 = vmatprep.mubr.bf16.mxu1 %v7433_v5 }
 0x111   : > { %6667 = vmatpush3.bf16.msra.mxu0 %v6900_v13 }
 0x112   : > { %6668 = vmatprep.subr.bf16.mxu0 %v6901_v4 }
 0x114   : > { %2035 = vmatmul.mubr.bf16.gmra.mrb[68].mxu0 %v7407_v53  ;;  %v6905_v53 = vld [vmem:[#allocation6 + $0x230] sm:$0xff]  }
 0x115   : > { %5231 = vmatprep.mubr.msk.bf16.mxu0 %vm7427_vm4, %v7509_v34  ;;  %6669 = vmatpush3.bf16.msra.mxu0 %v6901_v4 }
 0x116   : > { %6670 = vmatprep.subr.bf16.mxu0 %v6902_v15  ;;  %5276 = vmatmul.mubr.msk.bf16.gmra.mrb[68].mxu1 %vm7403_vm2, %v7438_v7 }
 0x117   : > { %2203 = vmatprep.mubr.bf16.mxu1 %v7485_v25 }
 0x119   : > { %6671 = vmatpush3.bf16.msra.mxu0 %v6902_v15 }
 0x11a   : > { %6672 = vmatprep.subr.bf16.mxu0 %v6903_v38 }
 0x11c   : > { %2043 = vmatmul.mubr.bf16.gmra.mrb[72].mxu0 %v7433_v5 }
 0x11d   : > { %5234 = vmatprep.mubr.msk.bf16.mxu0 %vm7427_vm4, %v7543_v51  ;;  %6673 = vmatpush3.bf16.msra.mxu0 %v6903_v38 }
 0x11e   : > { %6674 = vmatprep.subr.bf16.mxu0 %v6904_v24  ;;  %5279 = vmatmul.mubr.msk.bf16.gmra.mrb[72].mxu1 %vm7403_vm2, %v7489_v26 }
 0x11f   : > { %2211 = vmatprep.mubr.bf16.mxu1 %v7513_v35 }
 0x121   : > { %6675 = vmatpush3.bf16.msra.mxu0 %v6904_v24  ;;  %v888_v24 = vld [vmem:[#allocation2 + $0x32] sm:$0xff] }
 0x122   : > { %6676 = vmatprep.subr.bf16.mxu0 %v6905_v53 }
 0x124   : > { %2051 = vmatmul.mubr.bf16.gmra.mrb[76].mxu0 %v7485_v25 }
 0x125   : > { %5237 = vmatprep.mubr.msk.bf16.mxu0 %vm7427_vm4, %v7569_v11  ;;  %6677 = vmatpush3.bf16.msra.mxu0 %v6905_v53  ;;  %v889_v53 = vld [vmem:[#allocation2 + $0x3a] sm:$0xff] }
 0x126   : > { %6678 = vmatprep.subr.bf16.mxu0 %v6906_v59  ;;  %5282 = vmatmul.mubr.msk.bf16.gmra.mrb[76].mxu1 %vm7403_vm2, %v7515_v37 }
 0x127   : > { %2219 = vmatprep.mubr.bf16.mxu1 %v7547_v54 }
 0x129   : > { %6679 = vmatpush3.bf16.msra.mxu0 %v6906_v59 }
 0x12c   : > { %2059 = vmatmul.mubr.bf16.gmra.mrb[80].mxu0 %v7513_v35 }
 0x12d   : > { %5240 = vmatprep.mubr.msk.bf16.mxu0 %vm7427_vm4, %v7591_v43 }
 0x12e   : > { %5285 = vmatmul.mubr.msk.bf16.gmra.mrb[80].mxu1 %vm7403_vm2, %v7552_v57 }
 0x12f   : > { %2227 = vmatprep.mubr.bf16.mxu1 %v7573_v12 }
 0x134   : > { %2067 = vmatmul.mubr.bf16.gmra.mrb[84].mxu0 %v7547_v54 }
 0x135   : > { %5243 = vmatprep.mubr.msk.bf16.mxu0 %vm7427_vm4, %v7619_v1 }
 0x136   : > { %5288 = vmatmul.mubr.msk.bf16.gmra.mrb[84].mxu1 %vm7403_vm2, %v7577_v19 }
 0x137   : > { %2235 = vmatprep.mubr.bf16.mxu1 %v7595_v45 }
 0x13c   : > { %2075 = vmatmul.mubr.bf16.gmra.mrb[88].mxu0 %v7573_v12 }
 0x13d   : > { %5246 = vmatprep.mubr.msk.bf16.mxu0 %vm7427_vm4, %v7638_v21 }
 0x13e   : > { %5291 = vmatmul.mubr.msk.bf16.gmra.mrb[88].mxu1 %vm7403_vm2, %v7600_v47 }
 0x13f   : > { %2243 = vmatprep.mubr.bf16.mxu1 %v7623_v2 }
 0x144   : > { %2083 = vmatmul.mubr.bf16.gmra.mrb[92].mxu0 %v7595_v45 }
 0x145   : > { %5249 = vmatprep.mubr.msk.bf16.mxu0 %vm7427_vm4, %v7656_v22 }
 0x146   : > { %5294 = vmatmul.mubr.msk.bf16.gmra.mrb[92].mxu1 %vm7403_vm2, %v7625_v6 }
 0x147   : > { %2251 = vmatprep.mubr.bf16.mxu1 %v7642_v29 }
 0x14c   : > { %2091 = vmatmul.mubr.bf16.gmra.mrb[96].mxu0 %v7623_v2 }
 0x14d   : > { %5252 = vmatprep.mubr.msk.bf16.mxu0 %vm7427_vm4, %v7674_v27 }
 0x14e   : > { %5297 = vmatmul.mubr.msk.bf16.gmra.mrb[96].mxu1 %vm7403_vm2, %v7644_v30 }
 0x14f   : > { %2259 = vmatprep.mubr.bf16.mxu1 %v7660_v23 }
 0x154   : > { %2099 = vmatmul.mubr.bf16.gmra.mrb[100].mxu0 %v7642_v29 }
 0x155   : > { %5255 = vmatprep.mubr.msk.bf16.mxu0 %vm7427_vm4, %v7692_v39 }
 0x156   : > { %5300 = vmatmul.mubr.msk.bf16.gmra.mrb[100].mxu1 %vm7403_vm2, %v7662_v33 }
 0x157   : > { %2267 = vmatprep.mubr.bf16.mxu1 %v7678_v28 }
 0x15c   : > { %2107 = vmatmul.mubr.bf16.gmra.mrb[104].mxu0 %v7660_v23 }
 0x15d   : > { %5258 = vmatprep.mubr.msk.bf16.mxu0 %vm7427_vm4, %v7710_v41  ;;  %v6907_v41 = vld [vmem:[#allocation8 + $0x40] sm:$0xff]  }
 0x15e   : > { %5303 = vmatmul.mubr.msk.bf16.gmra.mrb[104].mxu1 %vm7403_vm2, %v7680_v55  ;;  %6192 = vmatprep.subr.bf16.mxu1 %v6907_v41 }
 0x15f   : > { %v5736_v5 = vpop.f32.mrb[0].mxu0  ;;  %2275 = vmatprep.mubr.bf16.mxu1 %v7696_v40  ;;  %6193 = vmatpush3.bf16.msra.mxu1 %v6908_v31  ;;  %v894_v31 = vld [vmem:[#allocation2 + $0x7a] sm:$0xff] }
 0x160   : > { %v5737_v7 = vpop.f32.mrb[1].mxu0 }
 0x161   : > { %v5738_v25 = vadd.f32 %v5737_v7, %v5736_v5  ;;  %v5739_v26 = vpop.f32.mrb[2].mxu0  ;;  %v5848_v51 = vpop.f32.mrb[0].mxu1 }
 0x162   : > { %v5740_v34 = vpop.f32.mrb[3].mxu0  ;;  %v5849_v57 = vpop.f32.mrb[1].mxu1 }
 0x163   : > { %v5741_v35 = vadd.f32 %v5740_v34, %v5739_v26  ;;  %v5850_v19 = vadd.f32 %v5849_v57, %v5848_v51  ;;  %v5851_v43 = vpop.f32.mrb[2].mxu1  ;;  %v5317_v26 = vpack.c.bf16 %v889_v53, %v888_v24 }
 0x164   : > { %2115 = vmatmul.mubr.bf16.gmra.mrb[108].mxu0 %v7678_v28  ;;  %v5852_v47 = vpop.f32.mrb[3].mxu1 }
 0x165   : > { %5261 = vmatprep.mubr.msk.bf16.mxu0 %vm7427_vm4, %v7728_v56  ;;  %v5853_v1 = vadd.f32 %v5852_v47, %v5851_v43  ;;  %v7858_v2 = vadd.f32 %v5850_v19, %v5738_v25  ;;  %v890_v19 = vld [vmem:[#allocation2 + $0x4a] sm:$0xff]  ;;  %v891_v43 = vld [vmem:[#allocation2 + $0x52] sm:$0xff] }
 0x166   : > { %5306 = vmatmul.mubr.msk.bf16.gmra.mrb[108].mxu1 %vm7403_vm2, %v7698_v62  ;;  %v893_v47 = vld [vmem:[#allocation2 + $0x6a] sm:$0xff] }
 0x167   : > { %v5742_v37 = vpop.f32.mrb[4].mxu0  ;;  %2283 = vmatprep.mubr.bf16.mxu1 %v7714_v44  ;;  %v7867_v6 = vadd.f32 %v5853_v1, %v5741_v35 }
 0x168   : > { %v5743_v54 = vpop.f32.mrb[5].mxu0 }
 0x169   : > { %v5744_v11 = vadd.f32 %v5743_v54, %v5742_v37  ;;  %v5745_v12 = vpop.f32.mrb[6].mxu0  ;;  %v5854_v29 = vpop.f32.mrb[4].mxu1 }
 0x16a   : > { %v5746_v45 = vpop.f32.mrb[7].mxu0  ;;  %v5855_v22 = vpop.f32.mrb[5].mxu1 }
 0x16b   : > { %v5747_v63 = vadd.f32 %v5746_v45, %v5745_v12  ;;  %v5856_v27 = vadd.f32 %v5855_v22, %v5854_v29  ;;  %v5857_v28 = vpop.f32.mrb[6].mxu1  ;;  %v6910_v12 = vld [vmem:[#allocation8 + $0x8] sm:$0xff]   ;;  %v892_v45 = vld [vmem:[#allocation2 + $0x62] sm:$0xff] }
 0x16c   : > { %2123 = vmatmul.mubr.bf16.gmra.mrb[112].mxu0 %v7696_v40  ;;  %v5858_v39 = vpop.f32.mrb[7].mxu1 }
 0x16d   : > { %5264 = vmatprep.mubr.msk.bf16.mxu0 %vm7427_vm4, %v7742_v14  ;;  %v5859_v62 = vadd.f32 %v5858_v39, %v5857_v28  ;;  %v7870_v17 = vadd.f32 %v5856_v27, %v5744_v11  ;;  %v7881_v14 = vpack.c.bf16 %v726_v9, %v725_v8  ;;  %v6909_v11 = vld [vmem:[#allocation8 + $0x48] sm:$0xff]   ;;  %v895_v8 = vld [vmem:[#allocation2 + $0x82] sm:$0xff] }
 0x16e   : > { %5309 = vmatmul.mubr.msk.bf16.gmra.mrb[112].mxu1 %vm7403_vm2, %v7716_v18  ;;  %6194 = vmatprep.subr.bf16.mxu1 %v6909_v11  ;;  %v896_v9 = vld [vmem:[#allocation2 + $0x92] sm:$0xff] }
 0x16f   : > { %v5748_v21 = vpop.f32.mrb[8].mxu0  ;;  %2291 = vmatprep.mubr.bf16.mxu1 %v7579_v20  ;;  %v7879_v32 = vadd.f32 %v5859_v62, %v5747_v63  ;;  %6195 = vmatpush3.bf16.msra.mxu1 %v6910_v12 }
 0x170   : > { %v5749_v30 = vpop.f32.mrb[9].mxu0 }
 0x171   : > { %v5750_v23 = vadd.f32 %v5749_v30, %v5748_v21  ;;  %v5751_v33 = vpop.f32.mrb[10].mxu0  ;;  %v5860_v56 = vpop.f32.mrb[8].mxu1  ;;  %v5320_v30 = vpack.c.bf16 %v891_v43, %v890_v19 }
 0x172   : > { %v5752_v55 = vpop.f32.mrb[11].mxu0  ;;  %v5861_v42 = vpop.f32.mrb[9].mxu1 }
 0x173   : > { %v5753_v40 = vadd.f32 %v5752_v55, %v5751_v33  ;;  %v5862_v18 = vadd.f32 %v5861_v42, %v5860_v56  ;;  %v5863_v60 = vpop.f32.mrb[10].mxu1  ;;  %v5323_v33 = vpack.c.bf16 %v893_v47, %v892_v45 }
 0x174   : > { %2131 = vmatmul.mubr.bf16.gmra.mrb[116].mxu0 %v7714_v44  ;;  %v5864_v13 = vpop.f32.mrb[11].mxu1 }
 0x175   : > { %5267 = vmatprep.mubr.msk.bf16.mxu0 %vm7427_vm4, %v7758_v10  ;;  %v1085_v10 = vpack.c.bf16 %v7603_v48, %v7598_v46  ;;  %v5865_v15 = vadd.f32 %v5864_v13, %v5863_v60  ;;  %v7886_v38 = vadd.f32 %v5862_v18, %v5750_v23 }
 0x176   : > { %5312 = vmatmul.mubr.msk.bf16.gmra.mrb[116].mxu1 %vm7403_vm2, %v7730_v58 }
 0x177   : > { %v5754_v44 = vpop.f32.mrb[12].mxu0  ;;  %2299 = vmatprep.mubr.bf16.mxu1 %v1085_v10  ;;  %v7894_v59 = vadd.f32 %v5865_v15, %v5753_v40 }
 0x178   : > { %v5755_v36 = vpop.f32.mrb[13].mxu0 }
 0x179   : > { %v5756_v49 = vadd.f32 %v5755_v36, %v5754_v44  ;;  %v5757_v50 = vpop.f32.mrb[14].mxu0  ;;  %v5866_v48 = vpop.f32.mrb[12].mxu1  ;;  %v897_v44 = vld [vmem:[#allocation2 + $0x9a] sm:$0xff] }
 0x17a   : > { %v5758_v61 = vpop.f32.mrb[15].mxu0  ;;  %v5867_v7 = vpop.f32.mrb[13].mxu1 }
 0x17b   : > { %v5759_v4 = vadd.f32 %v5758_v61, %v5757_v50  ;;  %v5868_v34 = vadd.f32 %v5867_v7, %v5866_v48  ;;  %v5869_v35 = vpop.f32.mrb[14].mxu1  ;;  %v5326_v50 = vpack.c.bf16 %v895_v8, %v894_v31  ;;  %v6912_v7 = vld [vmem:[#allocation8 + $0x10] sm:$0xff]  }
 0x17c   : > { %2139 = vmatmul.mubr.bf16.gmra.mrb[120].mxu0 %v7579_v20  ;;  %v5870_v58 = vpop.f32.mrb[15].mxu1 }
 0x17d   : > { %5270 = vmatprep.mubr.msk.bf16.mxu0 %vm7427_vm4, %v7881_v14  ;;  %v5871_v54 = vadd.f32 %v5870_v58, %v5869_v35  ;;  %v7896_v57 = vadd.f32 %v5868_v34, %v5756_v49  ;;  %v901_v34 = vld [vmem:[#allocation2 + $0xca] sm:$0xff] }
 0x17e   : > { %5315 = vmatmul.mubr.msk.bf16.gmra.mrb[120].mxu1 %vm7403_vm2, %v7744_v16 }
 0x17f   : > { %v5760_v46 = vpop.f32.mrb[16].mxu0  ;;  %2307 = vmatprep.mubr.bf16.mxu1 %v7144_v0  ;;  %v7904_v63 = vadd.f32 %v5871_v54, %v5759_v4 }
 0x180   : > { %v5761_v5 = vpop.f32.mrb[17].mxu0 }
 0x181   : > { %v5762_v20 = vadd.f32 %v5761_v5, %v5760_v46  ;;  %v5763_v25 = vpop.f32.mrb[18].mxu0  ;;  %v5872_v21 = vpop.f32.mrb[16].mxu1  ;;  %v6911_v5 = vld [vmem:[#allocation8 + $0x50] sm:$0xff]  }
 0x182   : > { %v5764_v37 = vpop.f32.mrb[19].mxu0  ;;  %v5873_v22 = vpop.f32.mrb[17].mxu1  ;;  %6196 = vmatprep.subr.bf16.mxu1 %v6911_v5 }
 0x183   : > { %v5765_v51 = vadd.f32 %v5764_v37, %v5763_v25  ;;  %v5874_v27 = vadd.f32 %v5873_v22, %v5872_v21  ;;  %v5875_v28 = vpop.f32.mrb[18].mxu1  ;;  %v899_v25 = vld [vmem:[#allocation2 + $0xb2] sm:$0xff]  ;;  %6197 = vmatpush3.bf16.msra.mxu1 %v6912_v7 }
 0x184   : > { %2147 = vmatmul.mubr.bf16.gmra.mrb[124].mxu0 %v1085_v10  ;;  %v5876_v39 = vpop.f32.mrb[19].mxu1  ;;  %v5329_v10 = vpack.c.bf16 %v897_v44, %v896_v9 }
 0x185   : > { %6680 = vmatprep.mubr.msk.bf16.mxu0 %vm7427_vm4, %v5317_v26  ;;  %v5877_v62 = vadd.f32 %v5876_v39, %v5875_v28  ;;  %v7908_v41 = vadd.f32 %v5874_v27, %v5762_v20  ;;  %v898_v20 = vld [vmem:[#allocation2 + $0xaa] sm:$0xff]  ;;  %v900_v26 = vld [vmem:[#allocation2 + $0xc2] sm:$0xff]  ;;  %v905_v27 = vld [vmem:[#allocation2 + $0xfa] sm:$0xff] }
 0x186   : > { %2308 = vmatmul.mubr.bf16.gmra.mrb[124].mxu1 %v7144_v0  ;;  %v5332_v54 = vpack.c.bf16 %v899_v25, %v898_v20  ;;  %v5335_v43 = vpack.c.bf16 %v901_v34, %v900_v26 }
 0x187   : > { %v5766_v1 = vpop.f32.mrb[20].mxu0  ;;  %v7913_v56 = vadd.f32 %v5877_v62, %v5765_v51  ;;  %3915 = vmatprep.mubr.bf16.mxu1 %v7144_v0 }
 0x188   : > { %v5767_v29 = vpop.f32.mrb[21].mxu0 }
 0x189   : > { %v5768_v23 = vadd.f32 %v5767_v29, %v5766_v1  ;;  %v5769_v16 = vpop.f32.mrb[22].mxu0  ;;  %v5878_v42 = vpop.f32.mrb[20].mxu1 }
 0x18a   : > { %v5770_v55 = vpop.f32.mrb[23].mxu0  ;;  %v5879_v18 = vpop.f32.mrb[21].mxu1 }
 0x18b   : > { %v5771_v40 = vadd.f32 %v5770_v55, %v5769_v16  ;;  %v5880_v13 = vadd.f32 %v5879_v18, %v5878_v42  ;;  %v5881_v4 = vpop.f32.mrb[22].mxu1  ;;  %v903_v16 = vld [vmem:[#allocation2 + $0xe2] sm:$0xff] }
 0x18c   : > { %6681 = vmatmul.mubr.msk.bf16.vlgmr.msra.gmra.mrb[128].mxu0 %vm7427_vm4, %v5320_v30  ;;  %v5882_v24 = vpop.f32.mrb[23].mxu1 }
 0x18d   : > { %6684 = vmatprep.mubr.msk.bf16.mxu0 %vm7427_vm4, %v5323_v33  ;;  %v5883_v46 = vadd.f32 %v5882_v24, %v5881_v4  ;;  %v7918_v48 = vadd.f32 %v5880_v13, %v5768_v23  ;;  %v902_v23 = vld [vmem:[#allocation2 + $0xda] sm:$0xff]  ;;  %v904_v33 = vld [vmem:[#allocation2 + $0xf2] sm:$0xff]  ;;  %v6914_v13 = vld [vmem:[#allocation8 + $0x18] sm:$0xff]  }
 0x18e   : > { %v5338_v62 = vpack.c.bf16 %v903_v16, %v902_v23  ;;  %v5341_v44 = vpack.c.bf16 %v905_v27, %v904_v33  ;;  %v906_v4 = vld [vmem:[#allocation2 + $0x10a] sm:$0xff]  ;;  %v908_v24 = vld [vmem:[#allocation2 + $0x122] sm:$0xff] }
 0x18f   : > { %v5772_v36 = vpop.f32.mrb[24].mxu0  ;;  %v7922_v35 = vadd.f32 %v5883_v46, %v5771_v40 }
 0x190   : > { %v5773_v49 = vpop.f32.mrb[25].mxu0 }
 0x191   : > { %v5774_v60 = vadd.f32 %v5773_v49, %v5772_v36  ;;  %v5775_v61 = vpop.f32.mrb[26].mxu0  ;;  %v5884_v58 = vpop.f32.mrb[24].mxu1 }
 0x192   : > { %v5776_v15 = vpop.f32.mrb[27].mxu0  ;;  %v5885_v11 = vpop.f32.mrb[25].mxu1 }
 0x193   : > { %v5777_v53 = vadd.f32 %v5776_v15, %v5775_v61  ;;  %v5886_v45 = vadd.f32 %v5885_v11, %v5884_v58  ;;  %v5887_v47 = vpop.f32.mrb[26].mxu1  ;;  %v907_v15 = vld [vmem:[#allocation2 + $0x112] sm:$0xff] }
 0x194   : > { %6685 = vmatmul.mubr.msk.bf16.gmra.mrb[132].mxu0 %vm7427_vm4, %v5326_v50  ;;  %v5888_v21 = vpop.f32.mrb[27].mxu1  ;;  %v5344_v25 = vpack.c.bf16 %v907_v15, %v906_v4 }
 0x195   : > { %6688 = vmatprep.mubr.msk.bf16.mxu0 %vm7427_vm4, %v5329_v10  ;;  %v5889_v30 = vadd.f32 %v5888_v21, %v5887_v47  ;;  %v7926_v22 = vadd.f32 %v5886_v45, %v5774_v60  ;;  %v6913_v10 = vld [vmem:[#allocation8 + $0x58] sm:$0xff]   ;;  %v910_v47 = vld [vmem:[#allocation2 + $0x13a] sm:$0xff] }
 0x196   : > { %6198 = vmatprep.subr.bf16.mxu1 %v6913_v10  ;;  %v915_v10 = vld [vmem:[#allocation2 + $0x172] sm:$0xff] }
 0x197   : > { %v5778_v37 = vpop.f32.mrb[28].mxu0  ;;  %v7930_v28 = vadd.f32 %v5889_v30, %v5777_v53  ;;  %v909_v53 = vld [vmem:[#allocation2 + $0x12a] sm:$0xff]  ;;  %6199 = vmatpush3.bf16.msra.mxu1 %v6914_v13  ;;  %v913_v30 = vld [vmem:[#allocation2 + $0x15a] sm:$0xff] }
 0x198   : > { %v5779_v51 = vpop.f32.mrb[29].mxu0  ;;  %v5347_v58 = vpack.c.bf16 %v909_v53, %v908_v24 }
 0x199   : > { %v5780_v12 = vadd.f32 %v5779_v51, %v5778_v37  ;;  %v5781_v19 = vpop.f32.mrb[30].mxu0  ;;  %v5890_v39 = vpop.f32.mrb[28].mxu1 }
 0x19a   : > { %v5782_v1 = vpop.f32.mrb[31].mxu0  ;;  %v5891_v31 = vpop.f32.mrb[29].mxu1 }
 0x19b   : > { %v5783_v29 = vadd.f32 %v5782_v1, %v5781_v19  ;;  %v5892_v36 = vadd.f32 %v5891_v31, %v5890_v39  ;;  %v5893_v42 = vpop.f32.mrb[30].mxu1  ;;  %v911_v1 = vld [vmem:[#allocation2 + $0x142] sm:$0xff] }
 0x19c   : > { %6689 = vmatmul.mubr.msk.bf16.gmra.mrb[136].mxu0 %vm7427_vm4, %v5332_v54  ;;  %v5894_v50 = vpop.f32.mrb[31].mxu1  ;;  %v5350_v27 = vpack.c.bf16 %v911_v1, %v910_v47 }
 0x19d   : > { %6692 = vmatprep.mubr.msk.bf16.mxu0 %vm7427_vm4, %v5335_v43  ;;  %v5895_v60 = vadd.f32 %v5894_v50, %v5893_v42  ;;  %v7934_v61 = vadd.f32 %v5892_v36, %v5780_v12  ;;  %v6915_v50 = vld [vmem:[#allocation8 + $0x60] sm:$0xff]  }
 0x19e   : > { %6200 = vmatprep.subr.bf16.mxu1 %v6915_v50 }
 0x19f   : > { %v5784_v55 = vpop.f32.mrb[32].mxu0  ;;  %v7938_v46 = vadd.f32 %v5895_v60, %v5783_v29  ;;  %v912_v29 = vld [vmem:[#allocation2 + $0x152] sm:$0xff]  ;;  %v914_v60 = vld [vmem:[#allocation2 + $0x16a] sm:$0xff] }
 0x1a0   : > { %v5785_v40 = vpop.f32.mrb[33].mxu0  ;;  %v5356_v53 = vpack.c.bf16 %v915_v10, %v914_v60 }
 0x1a1   : > { %v5786_v8 = vadd.f32 %v5785_v40, %v5784_v55  ;;  %v5787_v9 = vpop.f32.mrb[34].mxu0  ;;  %v5896_v7 = vpop.f32.mrb[32].mxu1 }
 0x1a2   : > { %v5788_v49 = vpop.f32.mrb[35].mxu0  ;;  %v5897_v26 = vpop.f32.mrb[33].mxu1 }
 0x1a3   : > { %v5789_v18 = vadd.f32 %v5788_v49, %v5787_v9  ;;  %v5898_v51 = vadd.f32 %v5897_v26, %v5896_v7  ;;  %v5899_v54 = vpop.f32.mrb[34].mxu1 }
 0x1a4   : > { %6693 = vmatmul.mubr.msk.bf16.gmra.mrb[140].mxu0 %vm7427_vm4, %v5338_v62  ;;  %v5900_v12 = vpop.f32.mrb[35].mxu1  ;;  %v5353_v62 = vpack.c.bf16 %v913_v30, %v912_v29 }
 0x1a5   : > { %6696 = vmatprep.mubr.msk.bf16.mxu0 %vm7427_vm4, %v5341_v44  ;;  %v7940_v43 = vadd.f32 %v5898_v51, %v5786_v8  ;;  %v5901_v45 = vadd.f32 %v5900_v12, %v5899_v54 }
 0x1a7   : > { %v5790_v5 = vpop.f32.mrb[36].mxu0  ;;  %v7946_v21 = vadd.f32 %v5901_v45, %v5789_v18  ;;  %v6916_v18 = vld [vmem:[#allocation8 + $0x20] sm:$0xff]  }
 0x1a8   : > { %v5791_v20 = vpop.f32.mrb[37].mxu0  ;;  %6201 = vmatpush3.bf16.msra.mxu1 %v6916_v18 }
 0x1a9   : > { %v5792_v34 = vadd.f32 %v5791_v20, %v5790_v5  ;;  %v5793_v37 = vpop.f32.mrb[38].mxu0  ;;  %v5902_v16 = vpop.f32.mrb[36].mxu1 }
 0x1aa   : > { %v5794_v11 = vpop.f32.mrb[39].mxu0  ;;  %v5903_v55 = vpop.f32.mrb[37].mxu1 }
 0x1ab   : > { %v5795_v19 = vadd.f32 %v5794_v11, %v5793_v37  ;;  %v5904_v31 = vadd.f32 %v5903_v55, %v5902_v16  ;;  %v5905_v8 = vpop.f32.mrb[38].mxu1 }
 0x1ac   : > { %6697 = vmatmul.mubr.msk.bf16.gmra.mrb[144].mxu0 %vm7427_vm4, %v5344_v25  ;;  %v5906_v44 = vpop.f32.mrb[39].mxu1 }
 0x1ad   : > { %6700 = vmatprep.mubr.msk.bf16.mxu0 %vm7427_vm4, %v5347_v58  ;;  %v7948_v42 = vadd.f32 %v5904_v31, %v5792_v34  ;;  %v5907_v49 = vadd.f32 %v5906_v44, %v5905_v8 }
 0x1af   : > { %v5796_v23 = vpop.f32.mrb[40].mxu0  ;;  %v7954_v13 = vadd.f32 %v5907_v49, %v5795_v19 }
 0x1b0   : > { %v5797_v33 = vpop.f32.mrb[41].mxu0 }
 0x1b1   : > { %v5798_v39 = vadd.f32 %v5797_v33, %v5796_v23  ;;  %v5799_v40 = vpop.f32.mrb[42].mxu0  ;;  %v5908_v15 = vpop.f32.mrb[40].mxu1 }
 0x1b2   : > { %v5800_v9 = vpop.f32.mrb[43].mxu0  ;;  %v5909_v5 = vpop.f32.mrb[41].mxu1 }
 0x1b3   : > { %v5801_v36 = vadd.f32 %v5800_v9, %v5799_v40  ;;  %v5910_v25 = vadd.f32 %v5909_v5, %v5908_v15  ;;  %v5911_v26 = vpop.f32.mrb[42].mxu1  ;;  %v6917_v40 = vld [vmem:[#allocation8 + $0x68] sm:$0xff]  }
 0x1b4   : > { %6701 = vmatmul.mubr.msk.bf16.gmra.mrb[148].mxu0 %vm7427_vm4, %v5350_v27  ;;  %v5912_v37 = vpop.f32.mrb[43].mxu1  ;;  %6202 = vmatprep.subr.bf16.mxu1 %v6917_v40 }
 0x1b5   : > { %6704 = vmatprep.mubr.msk.bf16.mxu0 %vm7427_vm4, %v5353_v62  ;;  %v7956_v51 = vadd.f32 %v5910_v25, %v5798_v39  ;;  %v5913_v54 = vadd.f32 %v5912_v37, %v5911_v26 }
 0x1b7   : > { %v5802_v4 = vpop.f32.mrb[44].mxu0  ;;  %v7963_v11 = vadd.f32 %v5913_v54, %v5801_v36 }
 0x1b8   : > { %v5803_v24 = vpop.f32.mrb[45].mxu0 }
 0x1b9   : > { %v5804_v7 = vadd.f32 %v5803_v24, %v5802_v4  ;;  %v5805_v20 = vpop.f32.mrb[46].mxu0  ;;  %v5914_v19 = vpop.f32.mrb[44].mxu1 }
 0x1ba   : > { %v5806_v34 = vpop.f32.mrb[47].mxu0  ;;  %v5915_v47 = vpop.f32.mrb[45].mxu1 }
 0x1bb   : > { %v5807_v58 = vadd.f32 %v5806_v34, %v5805_v20  ;;  %v5916_v30 = vadd.f32 %v5915_v47, %v5914_v19  ;;  %v5917_v23 = vpop.f32.mrb[46].mxu1 }
 0x1bc   : > { %6705 = vmatmul.mubr.msk.bf16.gmra.mrb[152].mxu0 %vm7427_vm4, %v5356_v53  ;;  %v5918_v33 = vpop.f32.mrb[47].mxu1 }
 0x1bd   : > { %6708 = vmatprep.mubr.msk.bf16.mxu0 %vm7427_vm4, %v7881_v14  ;;  %v7965_v55 = vadd.f32 %v5916_v30, %v5804_v7  ;;  %v5919_v39 = vadd.f32 %v5918_v33, %v5917_v23  ;;  %v6918_v14 = vld [vmem:[#allocation8 + $0x28] sm:$0xff]  }
 0x1be   : > { %6203 = vmatpush3.bf16.msra.mxu1 %v6918_v14 }
 0x1bf   : > { %v5808_v12 = vpop.f32.mrb[48].mxu0  ;;  %v7968_v62 = vadd.f32 %v5919_v39, %v5807_v58 }
 0x1c0   : > { %v5809_v45 = vpop.f32.mrb[49].mxu0 }
 0x1c1   : > { %v5810_v1 = vadd.f32 %v5809_v45, %v5808_v12  ;;  %v5811_v29 = vpop.f32.mrb[50].mxu0  ;;  %v5920_v8 = vpop.f32.mrb[48].mxu1 }
 0x1c2   : > { %v5812_v16 = vpop.f32.mrb[51].mxu0  ;;  %v5921_v44 = vpop.f32.mrb[49].mxu1 }
 0x1c3   : > { %v5813_v27 = vadd.f32 %v5812_v16, %v5811_v29  ;;  %v5922_v50 = vadd.f32 %v5921_v44, %v5920_v8  ;;  %v5923_v18 = vpop.f32.mrb[50].mxu1  ;;  %v6919_v29 = vld [vmem:[#allocation8 + $0x70] sm:$0xff]  }
 0x1c4   : > { %6709 = vmatmul.mubr.bf16.gmra.mrb[156].mxu0 %v7144_v0  ;;  %v5924_v10 = vpop.f32.mrb[51].mxu1  ;;  %6204 = vmatprep.subr.bf16.mxu1 %v6919_v29 }
 0x1c5   : > { %v7970_v15 = vadd.f32 %v5922_v50, %v5810_v1  ;;  %v5925_v24 = vadd.f32 %v5924_v10, %v5923_v18  ;;  %v6920_v1 = vld [vmem:[#allocation8 + $0x30] sm:$0xff]   ;;  %v6921_v50 = vld [vmem:[#allocation8 + $0xc0] sm:$0xff]  }
 0x1c6   : > { %6205 = vmatpush3.bf16.msra.mxu1 %v6920_v1  ;;  %v6922_v18 = vld [vmem:[#allocation8 + $0x80] sm:$0xff]   ;;  %6304 = vmatprep.subr.bf16.mxu0 %v6921_v50  ;;  %v6925_v1 = vld [vmem:[#allocation8 + $0x78] sm:$0xff]  }
 0x1c7   : > { %v5814_v31 = vpop.f32.mrb[52].mxu0  ;;  %v7972_v53 = vadd.f32 %v5925_v24, %v5813_v27  ;;  %6305 = vmatpush3.bf16.msra.mxu0 %v6922_v18  ;;  %6206 = vmatprep.subr.bf16.mxu1 %v6925_v1  ;;  %v6933_v1 = vld [vmem:[#allocation8 + $0xe8] sm:$0xff]  }
 0x1c8   : > { %v5815_v9 = vpop.f32.mrb[53].mxu0 }
 0x1c9   : > { %v5816_v36 = vadd.f32 %v5815_v9, %v5814_v31  ;;  %v5817_v49 = vpop.f32.mrb[54].mxu0  ;;  %v5926_v7 = vpop.f32.mrb[52].mxu1 }
 0x1ca   : > { %v5818_v60 = vpop.f32.mrb[55].mxu0  ;;  %v5927_v25 = vpop.f32.mrb[53].mxu1 }
 0x1cb   : > { %v5819_v4 = vadd.f32 %v5818_v60, %v5817_v49  ;;  %v5928_v37 = vadd.f32 %v5927_v25, %v5926_v7  ;;  %v5929_v58 = vpop.f32.mrb[54].mxu1  ;;  %v6923_v25 = vld [vmem:[#allocation8 + $0xc8] sm:$0xff]  }
 0x1cc   : > { %v5930_v12 = vpop.f32.mrb[55].mxu1  ;;  %6306 = vmatprep.subr.bf16.mxu0 %v6923_v25 }
 0x1cd   : > { %v7974_v45 = vadd.f32 %v5928_v37, %v5816_v36  ;;  %v5931_v47 = vadd.f32 %v5930_v12, %v5929_v58 }
 0x1cf   : > { %v5820_v5 = vpop.f32.mrb[56].mxu0  ;;  %v7976_v30 = vadd.f32 %v5931_v47, %v5819_v4 }
 0x1d0   : > { %v5821_v20 = vpop.f32.mrb[57].mxu0 }
 0x1d1   : > { %v5822_v26 = vadd.f32 %v5821_v20, %v5820_v5  ;;  %v5823_v34 = vpop.f32.mrb[58].mxu0  ;;  %v5932_v16 = vpop.f32.mrb[56].mxu1 }
 0x1d2   : > { %v5824_v54 = vpop.f32.mrb[59].mxu0  ;;  %v5933_v27 = vpop.f32.mrb[57].mxu1 }
 0x1d3   : > { %v5825_v19 = vadd.f32 %v5824_v54, %v5823_v34  ;;  %v5934_v14 = vadd.f32 %v5933_v27, %v5932_v16  ;;  %v5935_v31 = vpop.f32.mrb[58].mxu1  ;;  %v6924_v54 = vld [vmem:[#allocation8 + $0x88] sm:$0xff]   ;;  %v6928_v27 = vld [vmem:[#allocation8 + $0x90] sm:$0xff]  }
 0x1d4   : > { %v5936_v9 = vpop.f32.mrb[59].mxu1  ;;  %6307 = vmatpush3.bf16.msra.mxu0 %v6924_v54 }
 0x1d5   : > { %v7978_v36 = vadd.f32 %v5934_v14, %v5822_v26  ;;  %v5937_v49 = vadd.f32 %v5936_v9, %v5935_v31 }
 0x1d7   : > { %v5826_v23 = vpop.f32.mrb[60].mxu0  ;;  %v7980_v60 = vadd.f32 %v5937_v49, %v5825_v19  ;;  %v6929_v49 = vld [vmem:[#allocation8 + $0xd8] sm:$0xff]  }
 0x1d8   : > { %v5827_v33 = vpop.f32.mrb[61].mxu0 }
 0x1d9   : > { %v5828_v39 = vadd.f32 %v5827_v33, %v5826_v23  ;;  %v5829_v40 = vpop.f32.mrb[62].mxu0  ;;  %v5938_v4 = vpop.f32.mrb[60].mxu1  ;;  %v6926_v23 = vld [vmem:[#allocation8 + $0xd0] sm:$0xff]  }
 0x1da   : > { %v5830_v8 = vpop.f32.mrb[63].mxu0  ;;  %v5939_v5 = vpop.f32.mrb[61].mxu1  ;;  %6308 = vmatprep.subr.bf16.mxu0 %v6926_v23 }
 0x1db   : > { %v5831_v44 = vadd.f32 %v5830_v8, %v5829_v40  ;;  %v5940_v34 = vadd.f32 %v5939_v5, %v5938_v4  ;;  %v5941_v37 = vpop.f32.mrb[62].mxu1  ;;  %v6927_v8 = vld [vmem:[#allocation8 + $0x38] sm:$0xff]   ;;  %6309 = vmatpush3.bf16.msra.mxu0 %v6928_v27  ;;  %v6931_v5 = vld [vmem:[#allocation8 + $0xe0] sm:$0xff]  }
 0x1dc   : > { %v5942_v26 = vpop.f32.mrb[63].mxu1  ;;  %6207 = vmatpush3.bf16.msra.mxu1 %v6927_v8  ;;  %v6930_v4 = vld [vmem:[#allocation8 + $0x98] sm:$0xff]   ;;  %6310 = vmatprep.subr.bf16.mxu0 %v6929_v49  ;;  %v6936_v8 = vld [vmem:[#allocation8 + $0x140] sm:$0xff]  }
 0x1dd   : > { %v7983_v19 = vadd.f32 %v5940_v34, %v5828_v39  ;;  %v5943_v29 = vadd.f32 %v5942_v26, %v5941_v37  ;;  %v6932_v37 = vld [vmem:[#allocation8 + $0xa0] sm:$0xff]   ;;  %6416 = vmatprep.subr.bf16.mxu1 %v6936_v8 }
 0x1df   : > { %v5960_v10 = vpop.f32.mrb[64].mxu0  ;;  %v7986_v33 = vadd.f32 %v5943_v29, %v5831_v44  ;;  %6311 = vmatpush3.bf16.msra.mxu0 %v6930_v4  ;;  %3916 = vmatmul.mubr.bf16.vlgmr.msra.gmra.mrb[128].mxu1 %v7144_v0 }
 0x1e0   : > { %v5961_v24 = vpop.f32.mrb[65].mxu0  ;;  %6312 = vmatprep.subr.bf16.mxu0 %v6931_v5 }
 0x1e1   : > { %v5962_v7 = vadd.f32 %v5961_v24, %v5960_v10  ;;  %v5963_v20 = vpop.f32.mrb[66].mxu0  ;;  %v6072_v14 = vpop.f32.mrb[64].mxu1 }
 0x1e2   : > { %v5964_v58 = vpop.f32.mrb[67].mxu0 }
 0x1e3   : > { %v2029_v12 = vadd.f32 %v5962_v7, %v7858_v2  ;;  %v5965_v47 = vadd.f32 %v5964_v58, %v5963_v20  ;;  %v6073_v2 = vpop.f32.mrb[65].mxu1  ;;  %6313 = vmatpush3.bf16.msra.mxu0 %v6932_v37 }
 0x1e4   : > { %v6074_v50 = vadd.f32 %v6073_v2, %v6072_v14  ;;  %v6075_v18 = vpop.f32.mrb[66].mxu1  ;;  %6314 = vmatprep.subr.bf16.mxu0 %v6933_v1 }
 0x1e5   : > { %v2032_v16 = vadd.f32 %v5965_v47, %v7867_v6  ;;  %v6076_v6 = vpop.f32.mrb[67].mxu1 }
 0x1e6   : > { %v6077_v7 = vadd.f32 %v6076_v6, %v6075_v18  ;;  %v7989_v20 = vadd.f32 %v6074_v50, %v2029_v12  ;;  %v6937_v50 = vld [vmem:[#allocation8 + $0xb0] sm:$0xff]  }
 0x1e7   : > { %v5966_v40 = vpop.f32.mrb[68].mxu0 }
 0x1e8   : > { %v5967_v31 = vpop.f32.mrb[69].mxu0  ;;  %v7993_v34 = vadd.f32 %v6077_v7, %v2032_v16  ;;  %v6935_v16 = vld [vmem:[#allocation8 + $0xf0] sm:$0xff]   ;;  %v6939_v7 = vld [vmem:[#allocation8 + $0xf8] sm:$0xff]  }
 0x1e9   : > { %v5968_v9 = vadd.f32 %v5967_v31, %v5966_v40  ;;  %v5969_v39 = vpop.f32.mrb[70].mxu0  ;;  %v6078_v54 = vpop.f32.mrb[68].mxu1  ;;  %v6934_v40 = vld [vmem:[#allocation8 + $0xa8] sm:$0xff]  }
 0x1ea   : > { %v5970_v10 = vpop.f32.mrb[71].mxu0  ;;  %6315 = vmatpush3.bf16.msra.mxu0 %v6934_v40 }
 0x1eb   : > { %v2037_v44 = vadd.f32 %v5968_v9, %v7870_v17  ;;  %v5971_v24 = vadd.f32 %v5970_v10, %v5969_v39  ;;  %v6079_v17 = vpop.f32.mrb[69].mxu1  ;;  %6316 = vmatprep.subr.bf16.mxu0 %v6935_v16 }
 0x1ec   : > { %v6080_v23 = vadd.f32 %v6079_v17, %v6078_v54  ;;  %v6081_v12 = vpop.f32.mrb[70].mxu1  ;;  %v6940_v54 = vld [vmem:[#allocation8 + $0xb8] sm:$0xff]  }
 0x1ed   : > { %v2040_v25 = vadd.f32 %v5971_v24, %v7879_v32  ;;  %v6082_v14 = vpop.f32.mrb[71].mxu1 }
 0x1ee   : > { %v6083_v2 = vadd.f32 %v6082_v14, %v6081_v12  ;;  %v7996_v9 = vadd.f32 %v6080_v23, %v2037_v44  ;;  %6317 = vmatpush3.bf16.msra.mxu0 %v6937_v50 }
 0x1ef   : > { %v5972_v58 = vpop.f32.mrb[72].mxu0  ;;  %6318 = vmatprep.subr.bf16.mxu0 %v6939_v7 }
 0x1f0   : > { %v5973_v26 = vpop.f32.mrb[73].mxu0  ;;  %v7999_v49 = vadd.f32 %v6083_v2, %v2040_v25 }
 0x1f1   : > { %v5974_v47 = vadd.f32 %v5973_v26, %v5972_v58  ;;  %v5975_v29 = vpop.f32.mrb[74].mxu0  ;;  %v6084_v10 = vpop.f32.mrb[72].mxu1 }
 0x1f2   : > { %v5976_v27 = vpop.f32.mrb[75].mxu0  ;;  %v6085_v6 = vpop.f32.mrb[73].mxu1  ;;  %6319 = vmatpush3.bf16.msra.mxu0 %v6940_v54 }
 0x1f3   : > { %v2045_v32 = vadd.f32 %v5974_v47, %v7886_v38  ;;  %v5977_v31 = vadd.f32 %v5976_v27, %v5975_v29  ;;  %v6938_v38 = vld [vmem:[#allocation8 + $0x100] sm:$0xff]   ;;  %v6086_v37 = vadd.f32 %v6085_v6, %v6084_v10  ;;  %v6087_v44 = vpop.f32.mrb[74].mxu1 }
 0x1f4   : > { %6417 = vmatpush3.bf16.msra.mxu1 %v6938_v38 }
 0x1f5   : > { %v2048_v39 = vadd.f32 %v5977_v31, %v7894_v59  ;;  %v6088_v59 = vpop.f32.mrb[75].mxu1  ;;  %v8002_v47 = vadd.f32 %v6086_v37, %v2045_v32  ;;  %v6941_v32 = vld [vmem:[#allocation8 + $0x148] sm:$0xff]  }
 0x1f6   : > { %v6089_v17 = vadd.f32 %v6088_v59, %v6087_v44  ;;  %6418 = vmatprep.subr.bf16.mxu1 %v6941_v32 }
 0x1f7   : > { %v5978_v18 = vpop.f32.mrb[76].mxu0 }
 0x1f8   : > { %v5979_v4 = vpop.f32.mrb[77].mxu0  ;;  %v8005_v1 = vadd.f32 %v6089_v17, %v2048_v39 }
 0x1f9   : > { %v5980_v24 = vadd.f32 %v5979_v4, %v5978_v18  ;;  %v5981_v5 = vpop.f32.mrb[78].mxu0  ;;  %v6090_v12 = vpop.f32.mrb[76].mxu1 }
 0x1fa   : > { %v5982_v58 = vpop.f32.mrb[79].mxu0  ;;  %v6091_v40 = vpop.f32.mrb[77].mxu1 }
 0x1fb   : > { %v2053_v26 = vadd.f32 %v5980_v24, %v7896_v57  ;;  %v5983_v25 = vadd.f32 %v5982_v58, %v5981_v5  ;;  %v6092_v16 = vadd.f32 %v6091_v40, %v6090_v12  ;;  %v6093_v8 = vpop.f32.mrb[78].mxu1  ;;  %v6942_v5 = vld [vmem:[#allocation8 + $0x108] sm:$0xff]  }
 0x1fc   : > { %v6094_v57 = vpop.f32.mrb[79].mxu1  ;;  %6419 = vmatpush3.bf16.msra.mxu1 %v6942_v5 }
 0x1fd   : > { %v2056_v29 = vadd.f32 %v5983_v25, %v7904_v63  ;;  %v6095_v10 = vadd.f32 %v6094_v57, %v6093_v8  ;;  %v8008_v4 = vadd.f32 %v6092_v16, %v2053_v26 }
 0x1ff   : > { %v5984_v23 = vpop.f32.mrb[80].mxu0  ;;  %v8011_v39 = vadd.f32 %v6095_v10, %v2056_v29  ;;  %v6943_v10 = vld [vmem:[#allocation8 + $0x150] sm:$0xff]  }
 0x200   : > { %v5985_v27 = vpop.f32.mrb[81].mxu0  ;;  %6420 = vmatprep.subr.bf16.mxu1 %v6943_v10 }
 0x201   : > { %v5986_v14 = vadd.f32 %v5985_v27, %v5984_v23  ;;  %v5987_v31 = vpop.f32.mrb[82].mxu0  ;;  %v6096_v6 = vpop.f32.mrb[80].mxu1 }
 0x202   : > { %v5988_v2 = vpop.f32.mrb[83].mxu0  ;;  %v6097_v7 = vpop.f32.mrb[81].mxu1 }
 0x203   : > { %v2061_v50 = vadd.f32 %v5986_v14, %v7908_v41  ;;  %v5989_v18 = vadd.f32 %v5988_v2, %v5987_v31  ;;  %v6098_v58 = vadd.f32 %v6097_v7, %v6096_v6  ;;  %v6099_v54 = vpop.f32.mrb[82].mxu1  ;;  %v6944_v7 = vld [vmem:[#allocation8 + $0x110] sm:$0xff]  }
 0x204   : > { %v6100_v59 = vpop.f32.mrb[83].mxu1  ;;  %6421 = vmatpush3.bf16.msra.mxu1 %v6944_v7  ;;  %v6947_v7 = vld [vmem:[#allocation8 + $0x1c0] sm:$0xff]  }
 0x205   : > { %v2064_v63 = vadd.f32 %v5989_v18, %v7913_v56  ;;  %v6101_v17 = vadd.f32 %v6100_v59, %v6099_v54  ;;  %v8014_v56 = vadd.f32 %v6098_v58, %v2061_v50  ;;  %6528 = vmatprep.subr.bf16.mxu0 %v6947_v7 }
 0x207   : > { %v5990_v38 = vpop.f32.mrb[84].mxu0  ;;  %v8017_v23 = vadd.f32 %v6101_v17, %v2064_v63 }
 0x208   : > { %v5991_v24 = vpop.f32.mrb[85].mxu0 }
 0x209   : > { %v5992_v37 = vadd.f32 %v5991_v24, %v5990_v38  ;;  %v5993_v44 = vpop.f32.mrb[86].mxu0  ;;  %v6102_v27 = vpop.f32.mrb[84].mxu1 }
 0x20a   : > { %v5994_v41 = vpop.f32.mrb[87].mxu0  ;;  %v6103_v14 = vpop.f32.mrb[85].mxu1 }
 0x20b   : > { %v2069_v26 = vadd.f32 %v5992_v37, %v7918_v48  ;;  %v5995_v25 = vadd.f32 %v5994_v41, %v5993_v44  ;;  %v6104_v8 = vadd.f32 %v6103_v14, %v6102_v27  ;;  %v6105_v2 = vpop.f32.mrb[86].mxu1 }
 0x20c   : > { %v6106_v18 = vpop.f32.mrb[87].mxu1 }
 0x20d   : > { %v2072_v29 = vadd.f32 %v5995_v25, %v7922_v35  ;;  %v6107_v50 = vadd.f32 %v6106_v18, %v6105_v2  ;;  %v8020_v38 = vadd.f32 %v6104_v8, %v2069_v26 }
 0x20f   : > { %v5996_v12 = vpop.f32.mrb[88].mxu0  ;;  %v8023_v63 = vadd.f32 %v6107_v50, %v2072_v29  ;;  %v6945_v50 = vld [vmem:[#allocation8 + $0x158] sm:$0xff]  }
 0x210   : > { %v5997_v40 = vpop.f32.mrb[89].mxu0  ;;  %6422 = vmatprep.subr.bf16.mxu1 %v6945_v50 }
 0x211   : > { %v5998_v31 = vadd.f32 %v5997_v40, %v5996_v12  ;;  %v5999_v16 = vpop.f32.mrb[90].mxu0  ;;  %v6108_v24 = vpop.f32.mrb[88].mxu1 }
 0x212   : > { %v6000_v57 = vpop.f32.mrb[91].mxu0  ;;  %v6109_v37 = vpop.f32.mrb[89].mxu1 }
 0x213   : > { %v2077_v48 = vadd.f32 %v5998_v31, %v7926_v22  ;;  %v6001_v32 = vadd.f32 %v6000_v57, %v5999_v16  ;;  %v6110_v54 = vadd.f32 %v6109_v37, %v6108_v24  ;;  %v6111_v41 = vpop.f32.mrb[90].mxu1 }
 0x214   : > { %v6112_v59 = vpop.f32.mrb[91].mxu1 }
 0x215   : > { %v2080_v35 = vadd.f32 %v6001_v32, %v7930_v28  ;;  %v6113_v17 = vadd.f32 %v6112_v59, %v6111_v41  ;;  %v8026_v28 = vadd.f32 %v6110_v54, %v2077_v48  ;;  %v6946_v48 = vld [vmem:[#allocation8 + $0x118] sm:$0xff]  }
 0x216   : > { %6423 = vmatpush3.bf16.msra.mxu1 %v6946_v48 }
 0x217   : > { %v6002_v6 = vpop.f32.mrb[92].mxu0  ;;  %v8029_v12 = vadd.f32 %v6113_v17, %v2080_v35 }
 0x218   : > { %v6003_v5 = vpop.f32.mrb[93].mxu0 }
 0x219   : > { %v6004_v44 = vadd.f32 %v6003_v5, %v6002_v6  ;;  %v6005_v58 = vpop.f32.mrb[94].mxu0  ;;  %v6114_v40 = vpop.f32.mrb[92].mxu1 }
 0x21a   : > { %v6006_v22 = vpop.f32.mrb[95].mxu0  ;;  %v6115_v31 = vpop.f32.mrb[93].mxu1 }
 0x21b   : > { %v2085_v26 = vadd.f32 %v6004_v44, %v7934_v61  ;;  %v6007_v25 = vadd.f32 %v6006_v22, %v6005_v58  ;;  %v6116_v2 = vadd.f32 %v6115_v31, %v6114_v40  ;;  %v6117_v57 = vpop.f32.mrb[94].mxu1 }
 0x21c   : > { %v6118_v32 = vpop.f32.mrb[95].mxu1 }
 0x21d   : > { %v2088_v29 = vadd.f32 %v6007_v25, %v7938_v46  ;;  %v6119_v6 = vadd.f32 %v6118_v32, %v6117_v57  ;;  %v8032_v24 = vadd.f32 %v6116_v2, %v2085_v26 }
 0x21f   : > { %v6008_v27 = vpop.f32.mrb[96].mxu0  ;;  %v8035_v35 = vadd.f32 %v6119_v6, %v2088_v29 }
 0x220   : > { %v6009_v14 = vpop.f32.mrb[97].mxu0 }
 0x221   : > { %v6010_v16 = vadd.f32 %v6009_v14, %v6008_v27  ;;  %v6011_v8 = vpop.f32.mrb[98].mxu0  ;;  %v6120_v37 = vpop.f32.mrb[96].mxu1  ;;  %v6949_v14 = vld [vmem:[#allocation8 + $0x160] sm:$0xff]  }
 0x222   : > { %v6012_v18 = vpop.f32.mrb[99].mxu0  ;;  %v6121_v58 = vpop.f32.mrb[97].mxu1  ;;  %6424 = vmatprep.subr.bf16.mxu1 %v6949_v14 }
 0x223   : > { %v2093_v61 = vadd.f32 %v6010_v16, %v7940_v43  ;;  %v6013_v10 = vadd.f32 %v6012_v18, %v6011_v8  ;;  %v6122_v43 = vadd.f32 %v6121_v58, %v6120_v37  ;;  %v6123_v22 = vpop.f32.mrb[98].mxu1  ;;  %v6950_v16 = vld [vmem:[#allocation8 + $0x120] sm:$0xff]  }
 0x224   : > { %v6124_v25 = vpop.f32.mrb[99].mxu1  ;;  %6425 = vmatpush3.bf16.msra.mxu1 %v6950_v16 }
 0x225   : > { %v2096_v46 = vadd.f32 %v6013_v10, %v7946_v21  ;;  %v6125_v21 = vadd.f32 %v6124_v25, %v6123_v22  ;;  %v8038_v27 = vadd.f32 %v6122_v43, %v2093_v61 }
 0x227   : > { %v6014_v5 = vpop.f32.mrb[100].mxu0  ;;  %v8041_v40 = vadd.f32 %v6125_v21, %v2096_v46 }
 0x228   : > { %v6015_v44 = vpop.f32.mrb[101].mxu0 }
 0x229   : > { %v6016_v54 = vadd.f32 %v6015_v44, %v6014_v5  ;;  %v6017_v41 = vpop.f32.mrb[102].mxu0  ;;  %v6126_v8 = vpop.f32.mrb[100].mxu1 }
 0x22a   : > { %v6018_v59 = vpop.f32.mrb[103].mxu0  ;;  %v6127_v57 = vpop.f32.mrb[101].mxu1 }
 0x22b   : > { %v2101_v26 = vadd.f32 %v6016_v54, %v7948_v42  ;;  %v6019_v17 = vadd.f32 %v6018_v59, %v6017_v41  ;;  %v6128_v10 = vadd.f32 %v6127_v57, %v6126_v8  ;;  %v6129_v42 = vpop.f32.mrb[102].mxu1  ;;  %v6954_v8 = vld [vmem:[#allocation8 + $0x128] sm:$0xff]  }
 0x22c   : > { %v6130_v48 = vpop.f32.mrb[103].mxu1 }
 0x22d   : > { %v2104_v29 = vadd.f32 %v6019_v17, %v7954_v13  ;;  %v6131_v13 = vadd.f32 %v6130_v48, %v6129_v42  ;;  %v8044_v46 = vadd.f32 %v6128_v10, %v2101_v26 }
 0x22f   : > { %v6020_v31 = vpop.f32.mrb[104].mxu0  ;;  %v8047_v7 = vadd.f32 %v6131_v13, %v2104_v29 }
 0x230   : > { %v6021_v2 = vpop.f32.mrb[105].mxu0 }
 0x231   : > { %v6022_v18 = vadd.f32 %v6021_v2, %v6020_v31  ;;  %v6023_v32 = vpop.f32.mrb[106].mxu0  ;;  %v6132_v44 = vpop.f32.mrb[104].mxu1  ;;  %v6953_v31 = vld [vmem:[#allocation8 + $0x168] sm:$0xff]  }
 0x232   : > { %v6024_v50 = vpop.f32.mrb[107].mxu0  ;;  %v6133_v54 = vpop.f32.mrb[105].mxu1  ;;  %6426 = vmatprep.subr.bf16.mxu1 %v6953_v31 }
 0x233   : > { %v2109_v61 = vadd.f32 %v6022_v18, %v7956_v51  ;;  %v6025_v6 = vadd.f32 %v6024_v50, %v6023_v32  ;;  %v6134_v22 = vadd.f32 %v6133_v54, %v6132_v44  ;;  %v6135_v59 = vpop.f32.mrb[106].mxu1  ;;  %6427 = vmatpush3.bf16.msra.mxu1 %v6954_v8 }
 0x234   : > { %v6136_v17 = vpop.f32.mrb[107].mxu1 }
 0x235   : > { %v2112_v5 = vadd.f32 %v6025_v6, %v7963_v11  ;;  %v6137_v14 = vadd.f32 %v6136_v17, %v6135_v59  ;;  %v8050_v26 = vadd.f32 %v6134_v22, %v2109_v61 }
 0x237   : > { %v6026_v37 = vpop.f32.mrb[108].mxu0  ;;  %v8053_v29 = vadd.f32 %v6137_v14, %v2112_v5 }
 0x238   : > { %v6027_v58 = vpop.f32.mrb[109].mxu0 }
 0x239   : > { %v6028_v41 = vadd.f32 %v6027_v58, %v6026_v37  ;;  %v6029_v43 = vpop.f32.mrb[110].mxu0  ;;  %v6138_v2 = vpop.f32.mrb[108].mxu1 }
 0x23a   : > { %v6030_v25 = vpop.f32.mrb[111].mxu0  ;;  %v6139_v18 = vpop.f32.mrb[109].mxu1 }
 0x23b   : > { %v2117_v51 = vadd.f32 %v6028_v41, %v7965_v55  ;;  %v6031_v21 = vadd.f32 %v6030_v25, %v6029_v43  ;;  %v6140_v42 = vadd.f32 %v6139_v18, %v6138_v2  ;;  %v6141_v55 = vpop.f32.mrb[110].mxu1  ;;  %v6958_v2 = vld [vmem:[#allocation8 + $0x130] sm:$0xff]  }
 0x23c   : > { %v6142_v48 = vpop.f32.mrb[111].mxu1 }
 0x23d   : > { %v2120_v11 = vadd.f32 %v6031_v21, %v7968_v62  ;;  %v6143_v62 = vadd.f32 %v6142_v48, %v6141_v55  ;;  %v8056_v13 = vadd.f32 %v6140_v42, %v2117_v51 }
 0x23f   : > { %v6032_v16 = vpop.f32.mrb[112].mxu0  ;;  %v8059_v37 = vadd.f32 %v6143_v62, %v2120_v11 }
 0x240   : > { %v6033_v57 = vpop.f32.mrb[113].mxu0 }
 0x241   : > { %v6034_v32 = vadd.f32 %v6033_v57, %v6032_v16  ;;  %v6035_v10 = vpop.f32.mrb[114].mxu0  ;;  %v6144_v58 = vpop.f32.mrb[112].mxu1  ;;  %v6957_v16 = vld [vmem:[#allocation8 + $0x170] sm:$0xff]  }
 0x242   : > { %v6036_v50 = vpop.f32.mrb[115].mxu0  ;;  %v6145_v41 = vpop.f32.mrb[113].mxu1  ;;  %6428 = vmatprep.subr.bf16.mxu1 %v6957_v16 }
 0x243   : > { %v2125_v61 = vadd.f32 %v6034_v32, %v7970_v15  ;;  %v6037_v6 = vadd.f32 %v6036_v50, %v6035_v10  ;;  %v6146_v59 = vadd.f32 %v6145_v41, %v6144_v58  ;;  %v6147_v25 = vpop.f32.mrb[114].mxu1  ;;  %6429 = vmatpush3.bf16.msra.mxu1 %v6958_v2 }
 0x244   : > { %v6148_v21 = vpop.f32.mrb[115].mxu1 }
 0x245   : > { %v2128_v5 = vadd.f32 %v6037_v6, %v7972_v53  ;;  %v6149_v31 = vadd.f32 %v6148_v21, %v6147_v25  ;;  %v8062_v51 = vadd.f32 %v6146_v59, %v2125_v61 }
 0x247   : > { %v6038_v44 = vpop.f32.mrb[116].mxu0  ;;  %v8065_v11 = vadd.f32 %v6149_v31, %v2128_v5 }
 0x248   : > { %v6039_v54 = vpop.f32.mrb[117].mxu0 }
 0x249   : > { %v6040_v43 = vadd.f32 %v6039_v54, %v6038_v44  ;;  %v6041_v22 = vpop.f32.mrb[118].mxu0  ;;  %v6150_v57 = vpop.f32.mrb[116].mxu1 }
 0x24a   : > { %v6042_v17 = vpop.f32.mrb[119].mxu0  ;;  %v6151_v32 = vpop.f32.mrb[117].mxu1 }
 0x24b   : > { %v2133_v15 = vadd.f32 %v6040_v43, %v7974_v45  ;;  %v6043_v14 = vadd.f32 %v6042_v17, %v6041_v22  ;;  %v6152_v55 = vadd.f32 %v6151_v32, %v6150_v57  ;;  %v6153_v45 = vpop.f32.mrb[118].mxu1  ;;  %v8082_v57 = vld [vmem:[%s8948_s2] ss:$0 sm:$0xff] }
 0x24c   : > { %v6154_v48 = vpop.f32.mrb[119].mxu1 }
 0x24d   : > { %v2136_v53 = vadd.f32 %v6043_v14, %v7976_v30  ;;  %v6155_v30 = vadd.f32 %v6154_v48, %v6153_v45  ;;  %v8068_v62 = vadd.f32 %v6152_v55, %v2133_v15 }
 0x24f   : > { %v6044_v8 = vpop.f32.mrb[120].mxu0  ;;  %v8071_v44 = vadd.f32 %v6155_v30, %v2136_v53 }
 0x250   : > { %v6045_v18 = vpop.f32.mrb[121].mxu0 }
 0x251   : > { %v6046_v10 = vadd.f32 %v6045_v18, %v6044_v8  ;;  %v6047_v42 = vpop.f32.mrb[122].mxu0  ;;  %v6156_v54 = vpop.f32.mrb[120].mxu1  ;;  %v6961_v8 = vld [vmem:[#allocation8 + $0x178] sm:$0xff]  }
 0x252   : > { %v6048_v50 = vpop.f32.mrb[123].mxu0  ;;  %v6157_v43 = vpop.f32.mrb[121].mxu1  ;;  %v6962_v18 = vld [vmem:[#allocation8 + $0x138] sm:$0xff]   ;;  %6430 = vmatprep.subr.bf16.mxu1 %v6961_v8 }
 0x253   : > { %v2141_v61 = vadd.f32 %v6046_v10, %v7978_v36  ;;  %v6049_v6 = vadd.f32 %v6048_v50, %v6047_v42  ;;  %v6158_v25 = vadd.f32 %v6157_v43, %v6156_v54  ;;  %v6159_v17 = vpop.f32.mrb[122].mxu1  ;;  %6431 = vmatpush3.bf16.msra.mxu1 %v6962_v18 }
 0x254   : > { %v6160_v14 = vpop.f32.mrb[123].mxu1 }
 0x255   : > { %v2144_v5 = vadd.f32 %v6049_v6, %v7980_v60  ;;  %v6161_v16 = vadd.f32 %v6160_v14, %v6159_v17  ;;  %v8074_v15 = vadd.f32 %v6158_v25, %v2141_v61 }
 0x257   : > { %v6050_v58 = vpop.f32.mrb[124].mxu0  ;;  %v8077_v53 = vadd.f32 %v6161_v16, %v2144_v5 }
 0x258   : > { %v6051_v41 = vpop.f32.mrb[125].mxu0 }
 0x259   : > { %v6052_v22 = vadd.f32 %v6051_v41, %v6050_v58  ;;  %v6053_v59 = vpop.f32.mrb[126].mxu0  ;;  %v6162_v32 = vpop.f32.mrb[124].mxu1 }
 0x25a   : > { %v6054_v21 = vpop.f32.mrb[127].mxu0  ;;  %v6163_v42 = vpop.f32.mrb[125].mxu1 }
 0x25b   : > { %v2149_v36 = vadd.f32 %v6052_v22, %v7983_v19  ;;  %v6055_v31 = vadd.f32 %v6054_v21, %v6053_v59  ;;  %v6164_v50 = vadd.f32 %v6163_v42, %v6162_v32  ;;  %v6165_v48 = vpop.f32.mrb[126].mxu1 }
 0x25d   : > { %v2152_v60 = vadd.f32 %v6055_v31, %v7986_v33  ;;  %v8088_v33 = vld [vmem:[%s8949_s3] ss:$0 sm:$0xff] }
 0x25f   : > { %v6682_v2 = vpop.f32.mrb[128].mxu0 }
 0x260   : > { %v2359_v10 = vadd.f32 %v6682_v2, %v7996_v9  ;;  %v2350_v19 = vpop.f32.mrb[129].mxu0  ;;  %v6166_v9 = vpop.f32.mrb[127].mxu1 }
 0x261   : > { %v2351_v55 = vadd.f32 %v2350_v19, %v7989_v20  ;;  %v6683_v45 = vpop.f32.mrb[130].mxu0  ;;  %v6167_v54 = vadd.f32 %v6166_v9, %v6165_v48  ;;  %v8097_v20 = vadd.f32 %v6164_v50, %v2149_v36 }
 0x262   : > { %v2486_v61 = vmul.f32 %v8082_v57, %v2359_v10  ;;  %v2362_v6 = vadd.f32 %v6683_v45, %v7999_v49  ;;  %v2353_v30 = vpop.f32.mrb[131].mxu0 }
 0x263   : > { %v2484_v5 = vmul.f32 %v8082_v57, %v2351_v55  ;;  %v2354_v58 = vadd.f32 %v2353_v30, %v7993_v34  ;;  %v8102_v17 = vadd.f32 %v6167_v54, %v2152_v60 }
 0x264   : > { %v2525_v41 = vadd.f32 %v8088_v33, %v2486_v61  ;;  %v2487_v43 = vmul.f32 %v8082_v57, %v2362_v6  ;;  %v8116_v6 = vld [vmem:[#allocation8 + $0x200] sm:$0xff]  }
 0x265   : > { %v2523_v22 = vadd.f32 %v8088_v33, %v2484_v5  ;;  %v2485_v59 = vmul.f32 %v8082_v57, %v2354_v58  ;;  %6712 = vmatprep.subr.bf16.mxu1 %v8116_v6 }
 0x266   : > { %v2557_v25 = vmax.f32 %v2525_v41, 0.0  ;;  %v2526_v49 = vadd.f32 %v8088_v33, %v2487_v43 }
 0x267   : > { %v2555_v21 = vmax.f32 %v2523_v22, 0.0  ;;  %v2524_v14 = vadd.f32 %v8088_v33, %v2485_v59  ;;  %v6686_v34 = vpop.f32.mrb[132].mxu0 }
 0x268   : > { %2589 = vst [vmem:[#allocation2 + $0x31] sm:$0xff] %v2557_v25  ;;  %v2558_v31 = vmax.f32 %v2526_v49, 0.0  ;;  %v2375_v16 = vadd.f32 %v6686_v34, %v8008_v4  ;;  %v2366_v8 = vpop.f32.mrb[133].mxu0 }
 0x269   : > { %2587 = vst [vmem:[#allocation2 + $0x19] sm:$0xff] %v2555_v21  ;;  %v2556_v36 = vmax.f32 %v2524_v14, 0.0  ;;  %v2367_v2 = vadd.f32 %v2366_v8, %v8002_v47  ;;  %v6687_v18 = vpop.f32.mrb[134].mxu0  ;;  %v6948_v8 = vld [vmem:[#allocation8 + $0x180] sm:$0xff]  }
 0x26a   : > { %2590 = vst [vmem:[#allocation2 + $0x39] sm:$0xff] %v2558_v31  ;;  %v2490_v32 = vmul.f32 %v8082_v57, %v2375_v16  ;;  %v2378_v60 = vadd.f32 %v6687_v18, %v8011_v39  ;;  %v2369_v10 = vpop.f32.mrb[135].mxu0  ;;  %v3182_v19 = vpack.c.bf16 %v2558_v31, %v2557_v25 }
 0x26b   : > { %2588 = vst [vmem:[#allocation2 + $0x21] sm:$0xff] %v2556_v36  ;;  %v2488_v42 = vmul.f32 %v8082_v57, %v2367_v2  ;;  %v2370_v55 = vadd.f32 %v2369_v10, %v8005_v1  ;;  %v3173_v45 = vpack.c.bf16 %v2556_v36, %v2555_v21 }
 0x26c   : > { %v2529_v4 = vadd.f32 %v8088_v33, %v2490_v32  ;;  %v2491_v50 = vmul.f32 %v8082_v57, %v2378_v60 }
 0x26d   : > { %v2527_v47 = vadd.f32 %v8088_v33, %v2488_v42  ;;  %v2489_v48 = vmul.f32 %v8082_v57, %v2370_v55  ;;  %3923 = vmatprep.mubr.bf16.mxu1 %v3173_v45 }
 0x26e   : > { %v2561_v61 = vmax.f32 %v2529_v4, 0.0  ;;  %v2530_v39 = vadd.f32 %v8088_v33, %v2491_v50 }
 0x26f   : > { %v2559_v30 = vmax.f32 %v2527_v47, 0.0  ;;  %v2528_v9 = vadd.f32 %v8088_v33, %v2489_v48  ;;  %v6690_v5 = vpop.f32.mrb[136].mxu0  ;;  %v2813_v2 = vld [vmem:[#allocation2 + $0x30] sm:$0xff]  ;;  %v6952_v47 = vld [vmem:[#allocation8 + $0x188] sm:$0xff]  }
 0x270   : > { %2593 = vst [vmem:[#allocation2 + $0x61] sm:$0xff] %v2561_v61  ;;  %v2562_v1 = vmax.f32 %v2530_v39, 0.0  ;;  %v2391_v58 = vadd.f32 %v6690_v5, %v8020_v38  ;;  %v2382_v54 = vpop.f32.mrb[137].mxu0  ;;  %v2811_v21 = vld [vmem:[#allocation2 + $0x18] sm:$0xff]  ;;  %v6955_v5 = vld [vmem:[#allocation8 + $0x1d0] sm:$0xff]  }
 0x271   : > { %2591 = vst [vmem:[#allocation2 + $0x49] sm:$0xff] %v2559_v30  ;;  %v2560_v41 = vmax.f32 %v2528_v9, 0.0  ;;  %v2383_v43 = vadd.f32 %v2382_v54, %v8014_v56  ;;  %v6691_v22 = vpop.f32.mrb[138].mxu0  ;;  %v2814_v34 = vld [vmem:[#allocation2 + $0x38] sm:$0xff] }
 0x272   : > { %2594 = vst [vmem:[#allocation2 + $0x69] sm:$0xff] %v2562_v1  ;;  %v2494_v59 = vmul.f32 %v8082_v57, %v2391_v58  ;;  %v2394_v25 = vadd.f32 %v6691_v22, %v8023_v63  ;;  %v2385_v49 = vpop.f32.mrb[139].mxu0  ;;  %v2812_v14 = vld [vmem:[#allocation2 + $0x20] sm:$0xff]  ;;  %v8128_v32 = vpack.c.bf16 %v2562_v1, %v2561_v61  ;;  %v6951_v63 = vld [vmem:[#allocation8 + $0x1c8] sm:$0xff]  }
 0x273   : > { %2592 = vst [vmem:[#allocation2 + $0x51] sm:$0xff] %v2560_v41  ;;  %v2492_v38 = vmul.f32 %v8082_v57, %v2383_v43  ;;  %v2386_v31 = vadd.f32 %v2385_v49, %v8017_v23  ;;  %v5481_v16 = vpack.c.bf16 %v2812_v14, %v2811_v21  ;;  %v3191_v18 = vpack.c.bf16 %v2560_v41, %v2559_v30  ;;  %v2749_v30 = vld [vmem:[#allocation2 + $0x1a] sm:$0xff]  ;;  %v2750_v9 = vld [vmem:[#allocation2 + $0x22] sm:$0xff] }
 0x274   : > { %v2533_v36 = vadd.f32 %v8088_v33, %v2494_v59  ;;  %v2495_v56 = vmul.f32 %v8082_v57, %v2394_v25  ;;  %v8136_v23 = vpack.c.bf16 %v2814_v34, %v2813_v2  ;;  %v8150_v25 = vpack.c.bf16 %v2750_v9, %v2749_v30  ;;  %v6956_v49 = vld [vmem:[#allocation8 + $0x190] sm:$0xff]  }
 0x275   : > { %v2531_v60 = vadd.f32 %v8088_v33, %v2492_v38  ;;  %v2493_v10 = vmul.f32 %v8082_v57, %v2386_v31  ;;  %5482 = vmatprep.mubr.msk.bf16.mxu0 %vm7403_vm2, %v5481_v16  ;;  %5437 = vmatmul.mubr.msk.bf16.gmra.mrb[132].mxu1 %vm7403_vm2, %v5481_v16 }
 0x276   : > { %v2565_v42 = vmax.f32 %v2533_v36, 0.0  ;;  %v2534_v55 = vadd.f32 %v8088_v33, %v2495_v56  ;;  %4077 = vmatmul.mubr.bf16.vlgmr.msra.gmra.mrb[160].mxu0 %v7144_v0  ;;  %3931 = vmatprep.mubr.bf16.mxu1 %v3182_v19 }
 0x277   : > { %v2563_v45 = vmax.f32 %v2531_v60, 0.0  ;;  %v2532_v4 = vadd.f32 %v8088_v33, %v2493_v10  ;;  %v6694_v50 = vpop.f32.mrb[140].mxu0  ;;  %5485 = vmatprep.mubr.msk.bf16.mxu0 %vm7403_vm2, %v8136_v23  ;;  %6529 = vmatpush3.bf16.msra.mxu0 %v6948_v8  ;;  %v6960_v60 = vld [vmem:[#allocation8 + $0x198] sm:$0xff]  }
 0x278   : > { %2597 = vst [vmem:[#allocation2 + $0x91] sm:$0xff] %v2565_v42  ;;  %v2566_v48 = vmax.f32 %v2534_v55, 0.0  ;;  %v2407_v61 = vadd.f32 %v6694_v50, %v8032_v24  ;;  %v2398_v39 = vpop.f32.mrb[141].mxu0  ;;  %6530 = vmatprep.subr.bf16.mxu0 %v6951_v63  ;;  %v2815_v14 = vld [vmem:[#allocation2 + $0x48] sm:$0xff]  ;;  %v6963_v50 = vld [vmem:[#allocation8 + $0x1e0] sm:$0xff]  }
 0x279   : > { %2595 = vst [vmem:[#allocation2 + $0x79] sm:$0xff] %v2563_v45  ;;  %v2564_v19 = vmax.f32 %v2532_v4, 0.0  ;;  %v2399_v1 = vadd.f32 %v2398_v39, %v8026_v28  ;;  %v6695_v58 = vpop.f32.mrb[142].mxu0  ;;  %v2752_v4 = vld [vmem:[#allocation2 + $0x3a] sm:$0xff]  ;;  %v2818_v9 = vld [vmem:[#allocation2 + $0x68] sm:$0xff] }
 0x27a   : > { %2598 = vst [vmem:[#allocation2 + $0x99] sm:$0xff] %v2566_v48  ;;  %v2498_v54 = vmul.f32 %v8082_v57, %v2407_v61  ;;  %v2410_v41 = vadd.f32 %v6695_v58, %v8035_v35  ;;  %v2401_v43 = vpop.f32.mrb[143].mxu0  ;;  %v2816_v22 = vld [vmem:[#allocation2 + $0x50] sm:$0xff]  ;;  %v8156_v38 = vpack.c.bf16 %v2566_v48, %v2565_v42  ;;  %v6959_v35 = vld [vmem:[#allocation8 + $0x1d8] sm:$0xff]  }
 0x27b   : > { %2596 = vst [vmem:[#allocation2 + $0x81] sm:$0xff] %v2564_v19  ;;  %v2496_v24 = vmul.f32 %v8082_v57, %v2399_v1  ;;  %v2402_v59 = vadd.f32 %v2401_v43, %v8029_v12  ;;  %6531 = vmatpush3.bf16.msra.mxu0 %v6952_v47  ;;  %v8154_v34 = vpack.c.bf16 %v2564_v19, %v2563_v45  ;;  %v2751_v45 = vld [vmem:[#allocation2 + $0x32] sm:$0xff] }
 0x27c   : > { %v2537_v21 = vadd.f32 %v8088_v33, %v2498_v54  ;;  %v2499_v28 = vmul.f32 %v8082_v57, %v2410_v41  ;;  %6532 = vmatprep.subr.bf16.mxu0 %v6955_v5  ;;  %v8163_v12 = vpack.c.bf16 %v2816_v22, %v2815_v14  ;;  %v8179_v19 = vpack.c.bf16 %v2752_v4, %v2751_v45  ;;  %v6964_v1 = vld [vmem:[#allocation8 + $0x1a0] sm:$0xff]   ;;  %v2817_v54 = vld [vmem:[#allocation2 + $0x60] sm:$0xff] }
 0x27d   : > { %v2535_v31 = vadd.f32 %v8088_v33, %v2496_v24  ;;  %v2497_v16 = vmul.f32 %v8082_v57, %v2402_v59  ;;  %5440 = vmatmul.mubr.msk.bf16.gmra.mrb[136].mxu1 %vm7403_vm2, %v8136_v23 }
 0x27e   : > { %v2569_v8 = vmax.f32 %v2537_v21, 0.0  ;;  %v2538_v36 = vadd.f32 %v8088_v33, %v2499_v28  ;;  %5488 = vmatmul.mubr.msk.bf16.gmra.mrb[164].mxu0 %vm7427_vm4, %v8150_v25  ;;  %3939 = vmatprep.mubr.bf16.mxu1 %v3191_v18 }
 0x27f   : > { %v2567_v56 = vmax.f32 %v2535_v31, 0.0  ;;  %v2536_v2 = vadd.f32 %v8088_v33, %v2497_v16  ;;  %v6698_v63 = vpop.f32.mrb[144].mxu0  ;;  %5491 = vmatprep.mubr.msk.bf16.mxu0 %vm7403_vm2, %v8163_v12  ;;  %6533 = vmatpush3.bf16.msra.mxu0 %v6956_v49 }
 0x280   : > { %2601 = vst [vmem:[#allocation2 + $0xc1] sm:$0xff] %v2569_v8  ;;  %v2570_v10 = vmax.f32 %v2538_v36, 0.0  ;;  %v2423_v42 = vadd.f32 %v6698_v63, %v8044_v46  ;;  %v2414_v55 = vpop.f32.mrb[145].mxu0  ;;  %6534 = vmatprep.subr.bf16.mxu0 %v6959_v35  ;;  %v6966_v35 = vld [vmem:[#allocation8 + $0x1a8] sm:$0xff]   ;;  %v2753_v36 = vld [vmem:[#allocation2 + $0x4a] sm:$0xff] }
 0x281   : > { %2599 = vst [vmem:[#allocation2 + $0xa9] sm:$0xff] %v2567_v56  ;;  %v2568_v18 = vmax.f32 %v2536_v2, 0.0  ;;  %v2415_v47 = vadd.f32 %v2414_v55, %v8038_v27  ;;  %v6699_v48 = vpop.f32.mrb[146].mxu0  ;;  %v6967_v2 = vld [vmem:[#allocation8 + $0x1f0] sm:$0xff]  }
 0x282   : > { %2602 = vst [vmem:[#allocation2 + $0xc9] sm:$0xff] %v2570_v10  ;;  %v2502_v61 = vmul.f32 %v8082_v57, %v2423_v42  ;;  %v2426_v39 = vadd.f32 %v6699_v48, %v8047_v7  ;;  %v2417_v30 = vpop.f32.mrb[147].mxu0  ;;  %v8185_v43 = vpack.c.bf16 %v2570_v10, %v2569_v8  ;;  %v6965_v7 = vld [vmem:[#allocation8 + $0x1e8] sm:$0xff]   ;;  %v2820_v45 = vld [vmem:[#allocation2 + $0x80] sm:$0xff] }
 0x283   : > { %2600 = vst [vmem:[#allocation2 + $0xb1] sm:$0xff] %v2568_v18  ;;  %v2500_v46 = vmul.f32 %v8082_v57, %v2415_v47  ;;  %v2418_v5 = vadd.f32 %v2417_v30, %v8041_v40  ;;  %6535 = vmatpush3.bf16.msra.mxu0 %v6960_v60  ;;  %v8183_v41 = vpack.c.bf16 %v2568_v18, %v2567_v56  ;;  %v2754_v56 = vld [vmem:[#allocation2 + $0x52] sm:$0xff]  ;;  %v6969_v18 = vld [vmem:[#allocation8 + $0x1b0] sm:$0xff]  }
 0x284   : > { %v2541_v58 = vadd.f32 %v8088_v33, %v2502_v61  ;;  %v2503_v27 = vmul.f32 %v8082_v57, %v2426_v39  ;;  %6536 = vmatprep.subr.bf16.mxu0 %v6963_v50  ;;  %v8192_v40 = vpack.c.bf16 %v2818_v9, %v2817_v54  ;;  %v8209_v50 = vpack.c.bf16 %v2754_v56, %v2753_v36  ;;  %v2819_v48 = vld [vmem:[#allocation2 + $0x78] sm:$0xff]  ;;  %v6971_v54 = vld [vmem:[#allocation8 + $0x1b8] sm:$0xff]  }
 0x285   : > { %v2539_v22 = vadd.f32 %v8088_v33, %v2500_v46  ;;  %v2501_v24 = vmul.f32 %v8082_v57, %v2418_v5  ;;  %5443 = vmatmul.mubr.msk.bf16.gmra.mrb[140].mxu1 %vm7403_vm2, %v8163_v12 }
 0x286   : > { %v2573_v59 = vmax.f32 %v2541_v58, 0.0  ;;  %v2542_v49 = vadd.f32 %v8088_v33, %v2503_v27  ;;  %5494 = vmatmul.mubr.msk.bf16.gmra.mrb[168].mxu0 %vm7427_vm4, %v8179_v19  ;;  %3947 = vmatprep.mubr.bf16.mxu1 %v8128_v32 }
 0x287   : > { %v2571_v21 = vmax.f32 %v2539_v22, 0.0  ;;  %v2540_v28 = vadd.f32 %v8088_v33, %v2501_v24  ;;  %v6702_v14 = vpop.f32.mrb[148].mxu0  ;;  %5497 = vmatprep.mubr.msk.bf16.mxu0 %vm7403_vm2, %v8192_v40  ;;  %6537 = vmatpush3.bf16.msra.mxu0 %v6964_v1 }
 0x288   : > { %2605 = vst [vmem:[#allocation2 + $0xf1] sm:$0xff] %v2573_v59  ;;  %v2574_v31 = vmax.f32 %v2542_v49, 0.0  ;;  %v2439_v16 = vadd.f32 %v6702_v14, %v8056_v13  ;;  %v2430_v8 = vpop.f32.mrb[149].mxu0  ;;  %6538 = vmatprep.subr.bf16.mxu0 %v6965_v7  ;;  %v2756_v49 = vld [vmem:[#allocation2 + $0x6a] sm:$0xff] }
 0x289   : > { %2603 = vst [vmem:[#allocation2 + $0xd9] sm:$0xff] %v2571_v21  ;;  %v2572_v32 = vmax.f32 %v2540_v28, 0.0  ;;  %v2431_v63 = vadd.f32 %v2430_v8, %v8050_v26  ;;  %v6703_v60 = vpop.f32.mrb[150].mxu0 }
 0x28a   : > { %2606 = vst [vmem:[#allocation2 + $0xf9] sm:$0xff] %v2574_v31  ;;  %v2506_v10 = vmul.f32 %v8082_v57, %v2439_v16  ;;  %v2442_v42 = vadd.f32 %v6703_v60, %v8059_v37  ;;  %v2433_v55 = vpop.f32.mrb[151].mxu0  ;;  %v8215_v39 = vpack.c.bf16 %v2574_v31, %v2573_v59  ;;  %v6970_v37 = vld [vmem:[#allocation8 + $0x1f8] sm:$0xff]   ;;  %v2822_v16 = vld [vmem:[#allocation2 + $0x98] sm:$0xff] }
 0x28b   : > { %2604 = vst [vmem:[#allocation2 + $0xe1] sm:$0xff] %v2572_v32  ;;  %v2504_v13 = vmul.f32 %v8082_v57, %v2431_v63  ;;  %v2434_v4 = vadd.f32 %v2433_v55, %v8053_v29  ;;  %6539 = vmatpush3.bf16.msra.mxu0 %v6966_v35  ;;  %v8213_v61 = vpack.c.bf16 %v2572_v32, %v2571_v21  ;;  %v2755_v59 = vld [vmem:[#allocation2 + $0x62] sm:$0xff] }
 0x28c   : > { %v2545_v47 = vadd.f32 %v8088_v33, %v2506_v10  ;;  %v2507_v26 = vmul.f32 %v8082_v57, %v2442_v42  ;;  %6540 = vmatprep.subr.bf16.mxu0 %v6967_v2  ;;  %v8222_v29 = vpack.c.bf16 %v2820_v45, %v2819_v48  ;;  %v8239_v36 = vpack.c.bf16 %v2756_v49, %v2755_v59  ;;  %v2821_v2 = vld [vmem:[#allocation2 + $0x90] sm:$0xff]  ;;  %v2758_v48 = vld [vmem:[#allocation2 + $0x82] sm:$0xff] }
 0x28d   : > { %v2543_v30 = vadd.f32 %v8088_v33, %v2504_v13  ;;  %v2505_v9 = vmul.f32 %v8082_v57, %v2434_v4  ;;  %5446 = vmatmul.mubr.msk.bf16.gmra.mrb[144].mxu1 %vm7403_vm2, %v8192_v40 }
 0x28e   : > { %v2577_v46 = vmax.f32 %v2545_v47, 0.0  ;;  %v2546_v5 = vadd.f32 %v8088_v33, %v2507_v26  ;;  %5500 = vmatmul.mubr.msk.bf16.gmra.mrb[172].mxu0 %vm7427_vm4, %v8209_v50  ;;  %3955 = vmatprep.mubr.bf16.mxu1 %v8154_v34  ;;  %v2757_v26 = vld [vmem:[#allocation2 + $0x7a] sm:$0xff] }
 0x28f   : > { %v2575_v1 = vmax.f32 %v2543_v30, 0.0  ;;  %v2544_v58 = vadd.f32 %v8088_v33, %v2505_v9  ;;  %v6706_v27 = vpop.f32.mrb[152].mxu0  ;;  %5503 = vmatprep.mubr.msk.bf16.mxu0 %vm7403_vm2, %v8222_v29  ;;  %6541 = vmatpush3.bf16.msra.mxu0 %v6969_v18 }
 0x290   : > { %2609 = vst [vmem:[#allocation2 + $0x121] sm:$0xff] %v2577_v46  ;;  %v2578_v7 = vmax.f32 %v2546_v5, 0.0  ;;  %v2455_v22 = vadd.f32 %v6706_v27, %v8068_v62  ;;  %v2446_v24 = vpop.f32.mrb[153].mxu0  ;;  %6542 = vmatprep.subr.bf16.mxu0 %v6970_v37  ;;  %v8269_v27 = vpack.c.bf16 %v2758_v48, %v2757_v26 }
 0x291   : > { %2607 = vst [vmem:[#allocation2 + $0x109] sm:$0xff] %v2575_v1  ;;  %v2576_v34 = vmax.f32 %v2544_v58, 0.0  ;;  %v2447_v21 = vadd.f32 %v2446_v24, %v8062_v51  ;;  %v6707_v28 = vpop.f32.mrb[154].mxu0 }
 0x292   : > { %2610 = vst [vmem:[#allocation2 + $0x129] sm:$0xff] %v2578_v7  ;;  %v2510_v14 = vmul.f32 %v8082_v57, %v2455_v22  ;;  %v2458_v35 = vadd.f32 %v6707_v28, %v8071_v44  ;;  %v2449_v31 = vpop.f32.mrb[155].mxu0  ;;  %v8245_v63 = vpack.c.bf16 %v2578_v7, %v2577_v46 }
 0x293   : > { %2608 = vst [vmem:[#allocation2 + $0x111] sm:$0xff] %v2576_v34  ;;  %v2508_v8 = vmul.f32 %v8082_v57, %v2447_v21  ;;  %v2450_v62 = vadd.f32 %v2449_v31, %v8065_v11  ;;  %6543 = vmatpush3.bf16.msra.mxu0 %v6971_v54  ;;  %v8243_v32 = vpack.c.bf16 %v2576_v34, %v2575_v1  ;;  %v2824_v1 = vld [vmem:[#allocation2 + $0xb0] sm:$0xff]  ;;  %v2760_v31 = vld [vmem:[#allocation2 + $0x9a] sm:$0xff] }
 0x294   : > { %v2549_v56 = vadd.f32 %v8088_v33, %v2510_v14  ;;  %v2511_v51 = vmul.f32 %v8082_v57, %v2458_v35  ;;  %v8252_v11 = vpack.c.bf16 %v2822_v16, %v2821_v2  ;;  %v2759_v35 = vld [vmem:[#allocation2 + $0x92] sm:$0xff]  ;;  %v2826_v16 = vld [vmem:[#allocation2 + $0xc8] sm:$0xff]  ;;  %v2828_v2 = vld [vmem:[#allocation2 + $0xe0] sm:$0xff] }
 0x295   : > { %v2547_v44 = vadd.f32 %v8088_v33, %v2508_v8  ;;  %v2509_v60 = vmul.f32 %v8082_v57, %v2450_v62  ;;  %5449 = vmatmul.mubr.msk.bf16.gmra.mrb[148].mxu1 %vm7403_vm2, %v8222_v29  ;;  %v8295_v62 = vpack.c.bf16 %v2760_v31, %v2759_v35 }
 0x296   : > { %v2581_v10 = vmax.f32 %v2549_v56, 0.0  ;;  %v2550_v42 = vadd.f32 %v8088_v33, %v2511_v51  ;;  %5506 = vmatmul.mubr.msk.bf16.gmra.mrb[176].mxu0 %vm7427_vm4, %v8239_v36  ;;  %3963 = vmatprep.mubr.bf16.mxu1 %v8156_v38  ;;  %v2761_v56 = vld [vmem:[#allocation2 + $0xaa] sm:$0xff]  ;;  %v2762_v51 = vld [vmem:[#allocation2 + $0xb2] sm:$0xff] }
 0x297   : > { %v2579_v55 = vmax.f32 %v2547_v44, 0.0  ;;  %v2548_v45 = vadd.f32 %v8088_v33, %v2509_v60  ;;  %v6710_v13 = vpop.f32.mrb[156].mxu0  ;;  %5509 = vmatprep.mubr.msk.bf16.mxu0 %vm7403_vm2, %v8252_v11  ;;  %v8309_v44 = vpack.c.bf16 %v2762_v51, %v2761_v56  ;;  %v2827_v60 = vld [vmem:[#allocation2 + $0xd8] sm:$0xff] }
 0x298   : > { %2613 = vst [vmem:[#allocation2 + $0x151] sm:$0xff] %v2581_v10  ;;  %v2582_v4 = vmax.f32 %v2550_v42, 0.0  ;;  %v2471_v18 = vadd.f32 %v6710_v13, %v8097_v20  ;;  %v2462_v47 = vpop.f32.mrb[157].mxu0  ;;  %v2764_v42 = vld [vmem:[#allocation2 + $0xca] sm:$0xff] }
 0x299   : > { %2611 = vst [vmem:[#allocation2 + $0x139] sm:$0xff] %v2579_v55  ;;  %v2580_v37 = vmax.f32 %v2548_v45, 0.0  ;;  %v2463_v30 = vadd.f32 %v2462_v47, %v8074_v15  ;;  %v6711_v38 = vpop.f32.mrb[158].mxu0  ;;  %v2823_v15 = vld [vmem:[#allocation2 + $0xa8] sm:$0xff]  ;;  %v2829_v13 = vld [vmem:[#allocation2 + $0xf0] sm:$0xff] }
 0x29a   : > { %2614 = vst [vmem:[#allocation2 + $0x159] sm:$0xff] %v2582_v4  ;;  %v2514_v9 = vmul.f32 %v8082_v57, %v2471_v18  ;;  %v2474_v46 = vadd.f32 %v6711_v38, %v8102_v17  ;;  %v2465_v5 = vpop.f32.mrb[159].mxu0  ;;  %v8275_v24 = vpack.c.bf16 %v2582_v4, %v2581_v10  ;;  %v8314_v10 = vpack.c.bf16 %v2828_v2, %v2827_v60  ;;  %v2766_v18 = vld [vmem:[#allocation2 + $0xe2] sm:$0xff]  ;;  %v2832_v47 = vld [vmem:[#allocation2 + $0x110] sm:$0xff]  ;;  %v2768_v38 = vld [vmem:[#allocation2 + $0xfa] sm:$0xff] }
 0x29b   : > { %2612 = vst [vmem:[#allocation2 + $0x141] sm:$0xff] %v2580_v37  ;;  %v2512_v58 = vmul.f32 %v8082_v57, %v2463_v30  ;;  %v2466_v20 = vadd.f32 %v2465_v5, %v8077_v53  ;;  %v8273_v22 = vpack.c.bf16 %v2580_v37, %v2579_v55  ;;  %v8282_v53 = vpack.c.bf16 %v2824_v1, %v2823_v15  ;;  %v2830_v55 = vld [vmem:[#allocation2 + $0xf8] sm:$0xff]  ;;  %v2831_v48 = vld [vmem:[#allocation2 + $0x108] sm:$0xff] }
 0x29c   : > { %v2553_v54 = vadd.f32 %v8088_v33, %v2514_v9  ;;  %v2515_v7 = vmul.f32 %v8082_v57, %v2474_v46  ;;  %v8328_v4 = vpack.c.bf16 %v2830_v55, %v2829_v13  ;;  %v8342_v37 = vpack.c.bf16 %v2832_v47, %v2831_v48  ;;  %v2767_v30 = vld [vmem:[#allocation2 + $0xf2] sm:$0xff]  ;;  %v2834_v46 = vld [vmem:[#allocation2 + $0x128] sm:$0xff] }
 0x29d   : > { %v2551_v17 = vadd.f32 %v8088_v33, %v2512_v58  ;;  %v2513_v59 = vmul.f32 %v8082_v57, %v2466_v20  ;;  %5452 = vmatmul.mubr.msk.bf16.gmra.mrb[152].mxu1 %vm7403_vm2, %v8252_v11  ;;  %v8353_v20 = vpack.c.bf16 %v2768_v38, %v2767_v30  ;;  %v2769_v15 = vld [vmem:[#allocation2 + $0x10a] sm:$0xff]  ;;  %v2875_v47 = vld [vmem:[#allocation2 + $0x19] sm:$0xff] }
 0x29e   : > { %v2585_v49 = vmax.f32 %v2553_v54, 0.0  ;;  %v2554_v34 = vadd.f32 %v8088_v33, %v2515_v7  ;;  %5512 = vmatmul.mubr.msk.bf16.gmra.mrb[180].mxu0 %vm7427_vm4, %v8269_v27  ;;  %3971 = vmatprep.mubr.bf16.mxu1 %v8183_v41  ;;  %v2825_v41 = vld [vmem:[#allocation2 + $0xc0] sm:$0xff]  ;;  %v3035_v38 = vld [vmem:[#allocation2 + $0x31] sm:$0xff] }
 0x29f   : > { %v2583_v21 = vmax.f32 %v2551_v17, 0.0  ;;  %v2552_v28 = vadd.f32 %v8088_v33, %v2513_v59  ;;  %5515 = vmatprep.mubr.msk.bf16.mxu0 %vm7403_vm2, %v8282_v53  ;;  %v8300_v33 = vpack.c.bf16 %v2826_v16, %v2825_v41  ;;  %v2833_v54 = vld [vmem:[#allocation2 + $0x120] sm:$0xff]  ;;  %v2770_v17 = vld [vmem:[#allocation2 + $0x112] sm:$0xff] }
 0x2a0   : > { %2617 = vst [vmem:[#allocation2 + $0x181] sm:$0xff] %v2585_v49  ;;  %v2586_v57 = vmax.f32 %v2554_v34, 0.0  ;;  %v8369_v49 = vpack.c.bf16 %v2770_v17, %v2769_v15  ;;  %v2835_v34 = vld [vmem:[#allocation2 + $0x138] sm:$0xff]  ;;  %v2837_v35 = vld [vmem:[#allocation2 + $0x150] sm:$0xff]  ;;  %v3039_v17 = vld [vmem:[#allocation2 + $0x61] sm:$0xff] }
 0x2a1   : > { %2615 = vst [vmem:[#allocation2 + $0x169] sm:$0xff] %v2583_v21  ;;  %v2584_v14 = vmax.f32 %v2552_v28, 0.0  ;;  %v2772_v28 = vld [vmem:[#allocation2 + $0x12a] sm:$0xff]  ;;  %v2776_v60 = vld [vmem:[#allocation2 + $0x15a] sm:$0xff] }
 0x2a2   : > { %2618 = vst [vmem:[#allocation2 + $0x189] sm:$0xff] %v2586_v57  ;;  %v2836_v59 = vld [vmem:[#allocation2 + $0x140] sm:$0xff]  ;;  %v2838_v57 = vld [vmem:[#allocation2 + $0x158] sm:$0xff] }
 0x2a3   : > { %2616 = vst [vmem:[#allocation2 + $0x171] sm:$0xff] %v2584_v14  ;;  %v8293_v8 = vpack.c.bf16 %v2584_v14, %v2583_v21  ;;  %v8374_v21 = vpack.c.bf16 %v2836_v59, %v2835_v34  ;;  %v8388_v31 = vpack.c.bf16 %v2838_v57, %v2837_v35  ;;  %v2774_v16 = vld [vmem:[#allocation2 + $0x142] sm:$0xff]  ;;  %v3036_v48 = vld [vmem:[#allocation2 + $0x39] sm:$0xff] }
 0x2a4   : > { %v6976_v59 = vld [vmem:[#allocation8 + $0x228] sm:$0xff]  }
 0x2a5   : > { %5455 = vmatmul.mubr.msk.bf16.gmra.mrb[156].mxu1 %vm7403_vm2, %v8282_v53 }
 0x2a6   : > { %5518 = vmatmul.mubr.msk.bf16.gmra.mrb[184].mxu0 %vm7427_vm4, %v8295_v62  ;;  %3979 = vmatprep.mubr.bf16.mxu1 %v8185_v43  ;;  %v2763_v43 = vld [vmem:[#allocation2 + $0xc2] sm:$0xff] }
 0x2a7   : > { %5521 = vmatprep.mubr.msk.bf16.mxu0 %vm7403_vm2, %v8300_v33  ;;  %v8323_v45 = vpack.c.bf16 %v2764_v42, %v2763_v43  ;;  %v2841_v55 = vld [vmem:[#allocation2 + $0x180] sm:$0xff] }
 0x2a8   : > { %v2839_v51 = vld [vmem:[#allocation2 + $0x168] sm:$0xff] }
 0x2a9   : > { %v2842_v43 = vld [vmem:[#allocation2 + $0x188] sm:$0xff] }
 0x2aa   : > { %v2840_v41 = vld [vmem:[#allocation2 + $0x170] sm:$0xff]  ;;  %v8416_v13 = vpack.c.bf16 %v2842_v43, %v2841_v55 }
 0x2ab   : > { %v8402_v2 = vpack.c.bf16 %v2840_v41, %v2839_v51 }
 0x2ad   : > { %5458 = vmatmul.mubr.msk.bf16.gmra.mrb[160].mxu1 %vm7403_vm2, %v8300_v33 }
 0x2ae   : > { %5524 = vmatmul.mubr.msk.bf16.gmra.mrb[188].mxu0 %vm7427_vm4, %v8309_v44  ;;  %3987 = vmatprep.mubr.bf16.mxu1 %v8213_v61  ;;  %v2765_v61 = vld [vmem:[#allocation2 + $0xda] sm:$0xff] }
 0x2af   : > { %5527 = vmatprep.mubr.msk.bf16.mxu0 %vm7403_vm2, %v8314_v10  ;;  %v8337_v26 = vpack.c.bf16 %v2766_v18, %v2765_v61  ;;  %v2777_v61 = vld [vmem:[#allocation2 + $0x16a] sm:$0xff]  ;;  %v2778_v18 = vld [vmem:[#allocation2 + $0x172] sm:$0xff] }
 0x2b0   : > { %v8427_v30 = vpack.c.bf16 %v2778_v18, %v2777_v61 }
 0x2b5   : > { %5461 = vmatmul.mubr.msk.bf16.gmra.mrb[164].mxu1 %vm7403_vm2, %v8314_v10 }
 0x2b6   : > { %5530 = vmatmul.mubr.msk.bf16.gmra.mrb[192].mxu0 %vm7427_vm4, %v8323_v45  ;;  %3995 = vmatprep.mubr.bf16.mxu1 %v8215_v39  ;;  %v6208_v39 = vpop.f32.mrb[128].mxu1 }
 0x2b7   : > { %5533 = vmatprep.mubr.msk.bf16.mxu0 %vm7403_vm2, %v8328_v4  ;;  %v6209_v9 = vpop.f32.mrb[129].mxu1 }
 0x2b8   : > { %v8351_v5 = vadd.f32 %v6209_v9, %v6208_v39  ;;  %v6211_v1 = vpop.f32.mrb[130].mxu1  ;;  %v6972_v9 = vld [vmem:[#allocation8 + $0x208] sm:$0xff]  }
 0x2b9   : > { %v6212_v58 = vpop.f32.mrb[131].mxu1 }
 0x2ba   : > { %v8355_v7 = vadd.f32 %v6212_v58, %v6211_v1  ;;  %v3038_v1 = vld [vmem:[#allocation2 + $0x51] sm:$0xff]  ;;  %v3037_v58 = vld [vmem:[#allocation2 + $0x49] sm:$0xff] }
 0x2bb   : > { %v3179_v15 = vpack.c.bf16 %v3038_v1, %v3037_v58 }
 0x2bd   : > { %5464 = vmatmul.mubr.msk.bf16.gmra.mrb[168].mxu1 %vm7403_vm2, %v8328_v4 }
 0x2be   : > { %5536 = vmatmul.mubr.msk.bf16.gmra.mrb[196].mxu0 %vm7427_vm4, %v8337_v26  ;;  %4003 = vmatprep.mubr.bf16.mxu1 %v8243_v32  ;;  %v8360_v32 = vpack.c.bf16 %v2834_v46, %v2833_v54  ;;  %v3170_v46 = vpack.c.bf16 %v3036_v48, %v3035_v38  ;;  %v6974_v54 = vld [vmem:[#allocation8 + $0x218] sm:$0xff]  }
 0x2bf   : > { %5539 = vmatprep.mubr.msk.bf16.mxu0 %vm7403_vm2, %v8342_v37 }
 0x2c5   : > { %5467 = vmatmul.mubr.msk.bf16.gmra.mrb[172].mxu1 %vm7403_vm2, %v8342_v37 }
 0x2c6   : > { %5542 = vmatmul.mubr.msk.bf16.gmra.mrb[200].mxu0 %vm7427_vm4, %v8353_v20  ;;  %4011 = vmatprep.mubr.bf16.mxu1 %v8245_v63  ;;  %v2771_v63 = vld [vmem:[#allocation2 + $0x122] sm:$0xff] }
 0x2c7   : > { %5545 = vmatprep.mubr.msk.bf16.mxu0 %vm7403_vm2, %v8360_v32  ;;  %v8383_v14 = vpack.c.bf16 %v2772_v28, %v2771_v63  ;;  %v3041_v63 = vld [vmem:[#allocation2 + $0x79] sm:$0xff]  ;;  %v6978_v28 = vld [vmem:[#allocation8 + $0x238] sm:$0xff]  }
 0x2cd   : > { %5470 = vmatmul.mubr.msk.bf16.gmra.mrb[176].mxu1 %vm7403_vm2, %v8360_v32 }
 0x2ce   : > { %5548 = vmatmul.mubr.msk.bf16.gmra.mrb[204].mxu0 %vm7427_vm4, %v8369_v49  ;;  %4019 = vmatprep.mubr.bf16.mxu1 %v8273_v22  ;;  %v2773_v22 = vld [vmem:[#allocation2 + $0x13a] sm:$0xff] }
 0x2cf   : > { %5551 = vmatprep.mubr.msk.bf16.mxu0 %vm7403_vm2, %v8374_v21  ;;  %v8397_v56 = vpack.c.bf16 %v2774_v16, %v2773_v22  ;;  %v3045_v22 = vld [vmem:[#allocation2 + $0xa9] sm:$0xff] }
 0x2d0   : > { %v3048_v16 = vld [vmem:[#allocation2 + $0xc9] sm:$0xff] }
 0x2d5   : > { %5473 = vmatmul.mubr.msk.bf16.gmra.mrb[180].mxu1 %vm7403_vm2, %v8374_v21 }
 0x2d6   : > { %5554 = vmatmul.mubr.msk.bf16.gmra.mrb[208].mxu0 %vm7427_vm4, %v8383_v14  ;;  %4027 = vmatprep.mubr.bf16.mxu1 %v8275_v24  ;;  %v2775_v24 = vld [vmem:[#allocation2 + $0x152] sm:$0xff] }
 0x2d7   : > { %5557 = vmatprep.mubr.msk.bf16.mxu0 %vm7403_vm2, %v8388_v31  ;;  %v8411_v42 = vpack.c.bf16 %v2776_v60, %v2775_v24 }
 0x2dd   : > { %5476 = vmatmul.mubr.msk.bf16.gmra.mrb[184].mxu1 %vm7403_vm2, %v8388_v31 }
 0x2de   : > { %5560 = vmatmul.mubr.msk.bf16.gmra.mrb[212].mxu0 %vm7427_vm4, %v8397_v56  ;;  %4035 = vmatprep.mubr.bf16.mxu1 %v8293_v8  ;;  %v2876_v8 = vld [vmem:[#allocation2 + $0x21] sm:$0xff] }
 0x2df   : > { %5563 = vmatprep.mubr.msk.bf16.mxu0 %vm7403_vm2, %v8402_v2  ;;  %v3167_v39 = vpack.c.bf16 %v2876_v8, %v2875_v47  ;;  %v3060_v47 = vld [vmem:[#allocation2 + $0x159] sm:$0xff] }
 0x2e5   : > { %5479 = vmatmul.mubr.msk.bf16.gmra.mrb[188].mxu1 %vm7403_vm2, %v8402_v2 }
 0x2e6   : > { %5566 = vmatmul.mubr.msk.bf16.gmra.mrb[216].mxu0 %vm7427_vm4, %v8411_v42  ;;  %5575 = vmatprep.mubr.msk.bf16.mxu1 %vm7427_vm4, %v8150_v25  ;;  %v6973_v25 = vld [vmem:[#allocation8 + $0x210] sm:$0xff]  }
 0x2e7   : > { %5569 = vmatprep.mubr.msk.bf16.mxu0 %vm7403_vm2, %v8416_v13 }
 0x2ed   : > { %4238 = vmatmul.mubr.bf16.vlgmr.msra.gmra.mrb[192].mxu1 %v3167_v39 }
 0x2ee   : > { %5572 = vmatmul.mubr.msk.bf16.gmra.mrb[220].mxu0 %vm7427_vm4, %v8427_v30  ;;  %5578 = vmatprep.mubr.msk.bf16.mxu1 %vm7427_vm4, %v8179_v19  ;;  %v3040_v19 = vld [vmem:[#allocation2 + $0x69] sm:$0xff] }
 0x2ef   : > { %4398 = vmatprep.mubr.bf16.mxu0 %v3170_v46  ;;  %6713 = vmatpush3.bf16.msra.mxu1 %v8116_v6  ;;  %v6975_v6 = vld [vmem:[#allocation8 + $0x220] sm:$0xff]   ;;  %v3188_v34 = vpack.c.bf16 %v3040_v19, %v3039_v17 }
 0x2f0   : > { %6714 = vmatprep.subr.bf16.mxu1 %v6972_v9 }
 0x2f3   : > { %6715 = vmatpush3.bf16.msra.mxu1 %v6972_v9 }
 0x2f4   : > { %6716 = vmatprep.subr.bf16.mxu1 %v6973_v25 }
 0x2f5   : > { %4246 = vmatmul.mubr.bf16.gmra.mrb[196].mxu1 %v3170_v46 }
 0x2f6   : > { %5623 = vmatmul.mubr.msk.bf16.vlgmr.msra.gmra.mrb[224].mxu0 %vm7403_vm2, %v8136_v23  ;;  %5581 = vmatprep.mubr.msk.bf16.mxu1 %vm7427_vm4, %v8209_v50  ;;  %v6977_v23 = vld [vmem:[#allocation8 + $0x230] sm:$0xff]  }
 0x2f7   : > { %4406 = vmatprep.mubr.bf16.mxu0 %v3179_v15  ;;  %6717 = vmatpush3.bf16.msra.mxu1 %v6973_v25  ;;  %v3042_v50 = vld [vmem:[#allocation2 + $0x81] sm:$0xff]  ;;  %v3059_v25 = vld [vmem:[#allocation2 + $0x151] sm:$0xff] }
 0x2f8   : > { %6718 = vmatprep.subr.bf16.mxu1 %v6974_v54  ;;  %v3197_v57 = vpack.c.bf16 %v3042_v50, %v3041_v63 }
 0x2fb   : > { %6719 = vmatpush3.bf16.msra.mxu1 %v6974_v54 }
 0x2fc   : > { %6720 = vmatprep.subr.bf16.mxu1 %v6975_v6 }
 0x2fd   : > { %4254 = vmatmul.mubr.bf16.gmra.mrb[200].mxu1 %v3179_v15 }
 0x2fe   : > { %5626 = vmatmul.mubr.msk.bf16.gmra.mrb[228].mxu0 %vm7403_vm2, %v8163_v12  ;;  %5584 = vmatprep.mubr.msk.bf16.mxu1 %vm7427_vm4, %v8239_v36  ;;  %v3044_v12 = vld [vmem:[#allocation2 + $0x99] sm:$0xff]  ;;  %v3043_v36 = vld [vmem:[#allocation2 + $0x91] sm:$0xff] }
 0x2ff   : > { %4414 = vmatprep.mubr.bf16.mxu0 %v3188_v34  ;;  %6721 = vmatpush3.bf16.msra.mxu1 %v6975_v6  ;;  %v3206_v35 = vpack.c.bf16 %v3044_v12, %v3043_v36 }
 0x300   : > { %6722 = vmatprep.subr.bf16.mxu1 %v6976_v59 }
 0x303   : > { %6723 = vmatpush3.bf16.msra.mxu1 %v6976_v59  ;;  %v3062_v59 = vld [vmem:[#allocation2 + $0x171] sm:$0xff] }
 0x304   : > { %6724 = vmatprep.subr.bf16.mxu1 %v6977_v23 }
 0x305   : > { %4262 = vmatmul.mubr.bf16.gmra.mrb[204].mxu1 %v3188_v34 }
 0x306   : > { %5629 = vmatmul.mubr.msk.bf16.gmra.mrb[232].mxu0 %vm7403_vm2, %v8192_v40  ;;  %5587 = vmatprep.mubr.msk.bf16.mxu1 %vm7427_vm4, %v8269_v27  ;;  %v3046_v40 = vld [vmem:[#allocation2 + $0xb1] sm:$0xff] }
 0x307   : > { %4422 = vmatprep.mubr.bf16.mxu0 %v3197_v57  ;;  %6725 = vmatpush3.bf16.msra.mxu1 %v6977_v23  ;;  %v3215_v27 = vpack.c.bf16 %v3046_v40, %v3045_v22  ;;  %v2937_v22 = vld [vmem:[#allocation2 + $0x182] sm:$0xff] }
 0x308   : > { %6726 = vmatprep.subr.bf16.mxu1 %v6978_v28 }
 0x30b   : > { %6727 = vmatpush3.bf16.msra.mxu1 %v6978_v28  ;;  %v3061_v28 = vld [vmem:[#allocation2 + $0x169] sm:$0xff] }
 0x30d   : > { %4270 = vmatmul.mubr.bf16.gmra.mrb[208].mxu1 %v3197_v57 }
 0x30e   : > { %5632 = vmatmul.mubr.msk.bf16.gmra.mrb[236].mxu0 %vm7403_vm2, %v8222_v29  ;;  %5590 = vmatprep.mubr.msk.bf16.mxu1 %vm7427_vm4, %v8295_v62  ;;  %v3047_v29 = vld [vmem:[#allocation2 + $0xc1] sm:$0xff] }
 0x30f   : > { %4430 = vmatprep.mubr.bf16.mxu0 %v3206_v35  ;;  %v3224_v41 = vpack.c.bf16 %v3048_v16, %v3047_v29  ;;  %v3050_v62 = vld [vmem:[#allocation2 + $0xe1] sm:$0xff] }
 0x315   : > { %4278 = vmatmul.mubr.bf16.gmra.mrb[212].mxu1 %v3206_v35 }
 0x316   : > { %5635 = vmatmul.mubr.msk.bf16.gmra.mrb[240].mxu0 %vm7403_vm2, %v8252_v11  ;;  %5593 = vmatprep.mubr.msk.bf16.mxu1 %vm7427_vm4, %v8309_v44  ;;  %v3049_v11 = vld [vmem:[#allocation2 + $0xd9] sm:$0xff] }
 0x317   : > { %4438 = vmatprep.mubr.bf16.mxu0 %v3215_v27  ;;  %v3233_v51 = vpack.c.bf16 %v3050_v62, %v3049_v11  ;;  %v3052_v44 = vld [vmem:[#allocation2 + $0xf9] sm:$0xff]  ;;  %v3064_v62 = vld [vmem:[#allocation2 + $0x189] sm:$0xff] }
 0x31d   : > { %4286 = vmatmul.mubr.bf16.gmra.mrb[216].mxu1 %v3215_v27  ;;  %v2938_v27 = vld [vmem:[#allocation2 + $0x18a] sm:$0xff] }
 0x31e   : > { %5638 = vmatmul.mubr.msk.bf16.gmra.mrb[244].mxu0 %vm7403_vm2, %v8282_v53  ;;  %5596 = vmatprep.mubr.msk.bf16.mxu1 %vm7427_vm4, %v8323_v45  ;;  %v3051_v53 = vld [vmem:[#allocation2 + $0xf1] sm:$0xff] }
 0x31f   : > { %4446 = vmatprep.mubr.bf16.mxu0 %v3224_v41  ;;  %v3242_v24 = vpack.c.bf16 %v3052_v44, %v3051_v53  ;;  %v3054_v45 = vld [vmem:[#allocation2 + $0x111] sm:$0xff] }
 0x325   : > { %4294 = vmatmul.mubr.bf16.gmra.mrb[220].mxu1 %v3224_v41 }
 0x326   : > { %5641 = vmatmul.mubr.msk.bf16.gmra.mrb[248].mxu0 %vm7403_vm2, %v8300_v33  ;;  %5599 = vmatprep.mubr.msk.bf16.mxu1 %vm7427_vm4, %v8337_v26  ;;  %v3053_v33 = vld [vmem:[#allocation2 + $0x109] sm:$0xff] }
 0x327   : > { %4454 = vmatprep.mubr.bf16.mxu0 %v3233_v51  ;;  %v3251_v60 = vpack.c.bf16 %v3054_v45, %v3053_v33  ;;  %v3056_v26 = vld [vmem:[#allocation2 + $0x129] sm:$0xff] }
 0x32d   : > { %4302 = vmatmul.mubr.bf16.gmra.mrb[224].mxu1 %v3233_v51 }
 0x32e   : > { %5644 = vmatmul.mubr.msk.bf16.gmra.mrb[252].mxu0 %vm7403_vm2, %v8314_v10  ;;  %5602 = vmatprep.mubr.msk.bf16.mxu1 %vm7427_vm4, %v8353_v20  ;;  %v3055_v10 = vld [vmem:[#allocation2 + $0x121] sm:$0xff] }
 0x32f   : > { %4462 = vmatprep.mubr.bf16.mxu0 %v3242_v24  ;;  %v3260_v43 = vpack.c.bf16 %v3056_v26, %v3055_v10  ;;  %v3058_v20 = vld [vmem:[#allocation2 + $0x141] sm:$0xff] }
 0x335   : > { %4310 = vmatmul.mubr.bf16.gmra.mrb[228].mxu1 %v3242_v24  ;;  %v8524_v24 = vpack.c.bf16 %v2938_v27, %v2937_v22  ;;  %v3107_v27 = vld [vmem:[#allocation2 + $0x92] sm:$0xff] }
 0x336   : > { %5647 = vmatmul.mubr.msk.bf16.gmra.mrb[0].mxu0 %vm7403_vm2, %v8328_v4  ;;  %5605 = vmatprep.mubr.msk.bf16.mxu1 %vm7427_vm4, %v8369_v49  ;;  %v3057_v4 = vld [vmem:[#allocation2 + $0x139] sm:$0xff] }
 0x337   : > { %4470 = vmatprep.mubr.bf16.mxu0 %v3251_v60  ;;  %v3269_v55 = vpack.c.bf16 %v3058_v20, %v3057_v4  ;;  %v3099_v4 = vld [vmem:[#allocation2 + $0x32] sm:$0xff] }
 0x33d   : > { %4318 = vmatmul.mubr.bf16.gmra.mrb[232].mxu1 %v3251_v60 }
 0x33e   : > { %5650 = vmatmul.mubr.msk.bf16.gmra.mrb[4].mxu0 %vm7403_vm2, %v8342_v37  ;;  %5608 = vmatprep.mubr.msk.bf16.mxu1 %vm7427_vm4, %v8383_v14 }
 0x33f   : > { %4478 = vmatprep.mubr.bf16.mxu0 %v3260_v43 }
 0x345   : > { %4326 = vmatmul.mubr.bf16.gmra.mrb[236].mxu1 %v3260_v43 }
 0x346   : > { %5653 = vmatmul.mubr.msk.bf16.gmra.mrb[8].mxu0 %vm7403_vm2, %v8360_v32  ;;  %5611 = vmatprep.mubr.msk.bf16.mxu1 %vm7427_vm4, %v8397_v56  ;;  %v3278_v56 = vpack.c.bf16 %v3060_v47, %v3059_v25  ;;  %v3101_v25 = vld [vmem:[#allocation2 + $0x4a] sm:$0xff] }
 0x347   : > { %4486 = vmatprep.mubr.bf16.mxu0 %v3269_v55 }
 0x348   : > { %v6214_v49 = vpop.f32.mrb[132].mxu1 }
 0x349   : > { %v6320_v37 = vpop.f32.mrb[160].mxu0  ;;  %v6215_v8 = vpop.f32.mrb[133].mxu1 }
 0x34a   : > { %v6216_v61 = vadd.f32 %v6215_v8, %v6214_v49  ;;  %v6321_v18 = vpop.f32.mrb[161].mxu0  ;;  %v6217_v14 = vpop.f32.mrb[134].mxu1 }
 0x34b   : > { %v6322_v48 = vadd.f32 %v6321_v18, %v6320_v37  ;;  %v6323_v39 = vpop.f32.mrb[162].mxu0  ;;  %v6218_v38 = vpop.f32.mrb[135].mxu1 }
 0x34c   : > { %v6219_v9 = vadd.f32 %v6218_v38, %v6217_v14  ;;  %v6324_v46 = vpop.f32.mrb[163].mxu0 }
 0x34d   : > { %v8503_v32 = vadd.f32 %v6322_v48, %v8351_v5  ;;  %v6325_v1 = vadd.f32 %v6324_v46, %v6323_v39  ;;  %4334 = vmatmul.mubr.bf16.gmra.mrb[240].mxu1 %v3269_v55  ;;  %v3100_v55 = vld [vmem:[#allocation2 + $0x3a] sm:$0xff] }
 0x34e   : > { %5656 = vmatmul.mubr.msk.bf16.gmra.mrb[12].mxu0 %vm7403_vm2, %v8374_v21  ;;  %5614 = vmatprep.mubr.msk.bf16.mxu1 %vm7427_vm4, %v8411_v42  ;;  %v5667_v48 = vpack.c.bf16 %v3100_v55, %v3099_v4  ;;  %v3109_v4 = vld [vmem:[#allocation2 + $0xaa] sm:$0xff]  ;;  %v3110_v55 = vld [vmem:[#allocation2 + $0xb2] sm:$0xff] }
 0x34f   : > { %v8512_v58 = vadd.f32 %v6325_v1, %v8355_v7  ;;  %4494 = vmatprep.mubr.bf16.mxu0 %v3278_v56  ;;  %v3287_v7 = vpack.c.bf16 %v3062_v59, %v3061_v28  ;;  %v3102_v1 = vld [vmem:[#allocation2 + $0x52] sm:$0xff] }
 0x350   : > { %v6220_v54 = vpop.f32.mrb[136].mxu1 }
 0x351   : > { %v6326_v15 = vpop.f32.mrb[164].mxu0  ;;  %v6221_v6 = vpop.f32.mrb[137].mxu1 }
 0x352   : > { %v6222_v5 = vadd.f32 %v6221_v6, %v6220_v54  ;;  %v6327_v19 = vpop.f32.mrb[165].mxu0  ;;  %v6223_v17 = vpop.f32.mrb[138].mxu1  ;;  %v3104_v6 = vld [vmem:[#allocation2 + $0x6a] sm:$0xff] }
 0x353   : > { %v6328_v34 = vadd.f32 %v6327_v19, %v6326_v15  ;;  %v6329_v23 = vpop.f32.mrb[166].mxu0  ;;  %v6224_v50 = vpop.f32.mrb[139].mxu1  ;;  %v3103_v15 = vld [vmem:[#allocation2 + $0x62] sm:$0xff] }
 0x354   : > { %v6225_v63 = vadd.f32 %v6224_v50, %v6223_v17  ;;  %v6330_v21 = vpop.f32.mrb[167].mxu0 }
 0x355   : > { %v8514_v57 = vadd.f32 %v6328_v34, %v6216_v61  ;;  %v6331_v42 = vadd.f32 %v6330_v21, %v6329_v23  ;;  %4342 = vmatmul.mubr.bf16.gmra.mrb[244].mxu1 %v3278_v56  ;;  %v5670_v34 = vpack.c.bf16 %v3102_v1, %v3101_v25 }
 0x356   : > { %5659 = vmatmul.mubr.msk.bf16.gmra.mrb[16].mxu0 %vm7403_vm2, %v8388_v31  ;;  %5617 = vmatprep.mubr.msk.bf16.mxu1 %vm7427_vm4, %v8427_v30  ;;  %v3063_v30 = vld [vmem:[#allocation2 + $0x181] sm:$0xff] }
 0x357   : > { %v8522_v12 = vadd.f32 %v6331_v42, %v6219_v9  ;;  %4502 = vmatprep.mubr.bf16.mxu0 %v3287_v7  ;;  %v3296_v60 = vpack.c.bf16 %v3064_v62, %v3063_v30 }
 0x358   : > { %v6226_v36 = vpop.f32.mrb[140].mxu1 }
 0x359   : > { %v6332_v35 = vpop.f32.mrb[168].mxu0  ;;  %v6227_v40 = vpop.f32.mrb[141].mxu1 }
 0x35a   : > { %v6228_v16 = vadd.f32 %v6227_v40, %v6226_v36  ;;  %v6333_v29 = vpop.f32.mrb[169].mxu0  ;;  %v6229_v41 = vpop.f32.mrb[142].mxu1  ;;  %v3105_v36 = vld [vmem:[#allocation2 + $0x7a] sm:$0xff] }
 0x35b   : > { %v6334_v11 = vadd.f32 %v6333_v29, %v6332_v35  ;;  %v6335_v51 = vpop.f32.mrb[170].mxu0  ;;  %v6230_v44 = vpop.f32.mrb[143].mxu1  ;;  %v3106_v35 = vld [vmem:[#allocation2 + $0x82] sm:$0xff] }
 0x35c   : > { %v6231_v31 = vadd.f32 %v6230_v44, %v6229_v41  ;;  %v6336_v53 = vpop.f32.mrb[171].mxu0 }
 0x35d   : > { %v8526_v45 = vadd.f32 %v6334_v11, %v6222_v5  ;;  %v6337_v33 = vadd.f32 %v6336_v53, %v6335_v51  ;;  %4350 = vmatmul.mubr.bf16.gmra.mrb[248].mxu1 %v3287_v7 }
 0x35e   : > { %5662 = vmatmul.mubr.msk.bf16.gmra.mrb[20].mxu0 %vm7403_vm2, %v8402_v2  ;;  %5620 = vmatprep.mubr.msk.bf16.mxu1 %vm7427_vm4, %v8524_v24 }
 0x35f   : > { %v8534_v26 = vadd.f32 %v6337_v33, %v6225_v63  ;;  %4510 = vmatprep.mubr.bf16.mxu0 %v3296_v60  ;;  %v5673_v63 = vpack.c.bf16 %v3104_v6, %v3103_v15 }
 0x360   : > { %v6232_v10 = vpop.f32.mrb[144].mxu1 }
 0x361   : > { %v6338_v43 = vpop.f32.mrb[172].mxu0  ;;  %v6233_v20 = vpop.f32.mrb[145].mxu1 }
 0x362   : > { %v6234_v49 = vadd.f32 %v6233_v20, %v6232_v10  ;;  %v6339_v37 = vpop.f32.mrb[173].mxu0  ;;  %v6235_v8 = vpop.f32.mrb[146].mxu1 }
 0x363   : > { %v6340_v61 = vadd.f32 %v6339_v37, %v6338_v43  ;;  %v6341_v18 = vpop.f32.mrb[174].mxu0  ;;  %v6236_v14 = vpop.f32.mrb[147].mxu1 }
 0x364   : > { %v6237_v47 = vadd.f32 %v6236_v14, %v6235_v8  ;;  %v6342_v2 = vpop.f32.mrb[175].mxu0  ;;  %v3111_v8 = vld [vmem:[#allocation2 + $0xc2] sm:$0xff] }
 0x365   : > { %v8536_v39 = vadd.f32 %v6340_v61, %v6228_v16  ;;  %v6343_v38 = vadd.f32 %v6342_v2, %v6341_v18  ;;  %4358 = vmatmul.mubr.bf16.gmra.mrb[252].mxu1 %v3296_v60  ;;  %v3108_v16 = vld [vmem:[#allocation2 + $0x9a] sm:$0xff]  ;;  %v3112_v61 = vld [vmem:[#allocation2 + $0xca] sm:$0xff] }
 0x366   : > { %5665 = vmatmul.mubr.msk.bf16.gmra.mrb[24].mxu0 %vm7403_vm2, %v8416_v13  ;;  %6728 = vmatprep.mubr.msk.bf16.mxu1 %vm7427_vm4, %v5667_v48  ;;  %v5679_v33 = vpack.c.bf16 %v3108_v16, %v3107_v27 }
 0x367   : > { %v8543_v9 = vadd.f32 %v6343_v38, %v6231_v31  ;;  %4518 = vmatprep.mubr.bf16.mxu0 %v7144_v0  ;;  %v5676_v31 = vpack.c.bf16 %v3106_v35, %v3105_v36 }
 0x368   : > { %v6238_v46 = vpop.f32.mrb[148].mxu1 }
 0x369   : > { %v6344_v56 = vpop.f32.mrb[176].mxu0  ;;  %v6239_v54 = vpop.f32.mrb[149].mxu1 }
 0x36a   : > { %v6240_v5 = vadd.f32 %v6239_v54, %v6238_v46  ;;  %v6345_v19 = vpop.f32.mrb[177].mxu0  ;;  %v6241_v17 = vpop.f32.mrb[150].mxu1  ;;  %v5682_v46 = vpack.c.bf16 %v3110_v55, %v3109_v4 }
 0x36b   : > { %v6346_v59 = vadd.f32 %v6345_v19, %v6344_v56  ;;  %v6347_v52 = vpop.f32.mrb[178].mxu0  ;;  %v6242_v13 = vpop.f32.mrb[151].mxu1  ;;  %v5685_v56 = vpack.c.bf16 %v3112_v61, %v3111_v8  ;;  %v3113_v19 = vld [vmem:[#allocation2 + $0xda] sm:$0xff] }
 0x36c   : > { %v6243_v23 = vadd.f32 %v6242_v13, %v6241_v17  ;;  %v6348_v50 = vpop.f32.mrb[179].mxu0  ;;  %v3114_v17 = vld [vmem:[#allocation2 + $0xe2] sm:$0xff]  ;;  %v3115_v13 = vld [vmem:[#allocation2 + $0xf2] sm:$0xff] }
 0x36d   : > { %v8546_v21 = vadd.f32 %v6346_v59, %v6234_v49  ;;  %v6349_v28 = vadd.f32 %v6348_v50, %v6347_v52  ;;  %6729 = vmatmul.mubr.msk.bf16.vlgmr.msra.gmra.mrb[0].mxu1 %vm7427_vm4, %v5670_v34  ;;  %v3116_v34 = vld [vmem:[#allocation2 + $0xfa] sm:$0xff]  ;;  %v5688_v35 = vpack.c.bf16 %v3114_v17, %v3113_v19 }
 0x36e   : > { %4519 = vmatmul.mubr.bf16.gmra.mrb[28].mxu0 %v7144_v0  ;;  %6732 = vmatprep.mubr.msk.bf16.mxu1 %vm7427_vm4, %v5673_v63  ;;  %v5691_v27 = vpack.c.bf16 %v3116_v34, %v3115_v13 }
 0x36f   : > { %v8553_v42 = vadd.f32 %v6349_v28, %v6237_v47 }
 0x370   : > { %v6244_v7 = vpop.f32.mrb[152].mxu1 }
 0x371   : > { %v6350_v40 = vpop.f32.mrb[180].mxu0  ;;  %v6245_v22 = vpop.f32.mrb[153].mxu1 }
 0x372   : > { %v6246_v29 = vadd.f32 %v6245_v22, %v6244_v7  ;;  %v6351_v41 = vpop.f32.mrb[181].mxu0  ;;  %v6247_v62 = vpop.f32.mrb[154].mxu1 }
 0x373   : > { %v6352_v11 = vadd.f32 %v6351_v41, %v6350_v40  ;;  %v6353_v51 = vpop.f32.mrb[182].mxu0  ;;  %v6248_v44 = vpop.f32.mrb[155].mxu1 }
 0x374   : > { %v6249_v53 = vadd.f32 %v6248_v44, %v6247_v62  ;;  %v6354_v30 = vpop.f32.mrb[183].mxu0 }
 0x375   : > { %v8555_v60 = vadd.f32 %v6352_v11, %v6240_v5  ;;  %v6355_v10 = vadd.f32 %v6354_v30, %v6353_v51  ;;  %6733 = vmatmul.mubr.msk.bf16.gmra.mrb[4].mxu1 %vm7427_vm4, %v5676_v31  ;;  %v3117_v11 = vld [vmem:[#allocation2 + $0x10a] sm:$0xff]  ;;  %v3118_v51 = vld [vmem:[#allocation2 + $0x112] sm:$0xff] }
 0x376   : > { %6736 = vmatprep.mubr.msk.bf16.mxu1 %vm7427_vm4, %v5679_v33  ;;  %v3120_v30 = vld [vmem:[#allocation2 + $0x12a] sm:$0xff] }
 0x377   : > { %v8561_v43 = vadd.f32 %v6355_v10, %v6243_v23 }
 0x378   : > { %v6250_v20 = vpop.f32.mrb[156].mxu1 }
 0x379   : > { %v6356_v49 = vpop.f32.mrb[184].mxu0  ;;  %v6251_v37 = vpop.f32.mrb[157].mxu1 }
 0x37a   : > { %v6252_v18 = vadd.f32 %v6251_v37, %v6250_v20  ;;  %v6357_v14 = vpop.f32.mrb[185].mxu0  ;;  %v6253_v47 = vpop.f32.mrb[158].mxu1  ;;  %v5694_v37 = vpack.c.bf16 %v3118_v51, %v3117_v11 }
 0x37b   : > { %v6358_v2 = vadd.f32 %v6357_v14, %v6356_v49  ;;  %v6359_v48 = vpop.f32.mrb[186].mxu0  ;;  %v6254_v38 = vpop.f32.mrb[159].mxu1 }
 0x37c   : > { %v6255_v25 = vadd.f32 %v6254_v38, %v6253_v47  ;;  %v6360_v1 = vpop.f32.mrb[187].mxu0  ;;  %v3121_v38 = vld [vmem:[#allocation2 + $0x13a] sm:$0xff] }
 0x37d   : > { %v8563_v54 = vadd.f32 %v6358_v2, %v6246_v29  ;;  %v6361_v15 = vadd.f32 %v6360_v1, %v6359_v48  ;;  %6737 = vmatmul.mubr.msk.bf16.gmra.mrb[8].mxu1 %vm7427_vm4, %v5682_v46  ;;  %v3122_v46 = vld [vmem:[#allocation2 + $0x142] sm:$0xff] }
 0x37e   : > { %6740 = vmatprep.mubr.msk.bf16.mxu1 %vm7427_vm4, %v5685_v56  ;;  %v3123_v56 = vld [vmem:[#allocation2 + $0x152] sm:$0xff]  ;;  %v5700_v34 = vpack.c.bf16 %v3122_v46, %v3121_v38 }
 0x37f   : > { %v8569_v6 = vadd.f32 %v6361_v15, %v6249_v53  ;;  %v3119_v53 = vld [vmem:[#allocation2 + $0x122] sm:$0xff]  ;;  %v3124_v15 = vld [vmem:[#allocation2 + $0x15a] sm:$0xff] }
 0x380   : > { %v6256_v5 = vpop.f32.mrb[160].mxu1 }
 0x381   : > { %v6362_v59 = vpop.f32.mrb[188].mxu0  ;;  %v6257_v52 = vpop.f32.mrb[161].mxu1 }
 0x382   : > { %v6258_v23 = vadd.f32 %v6257_v52, %v6256_v5  ;;  %v6363_v50 = vpop.f32.mrb[189].mxu0  ;;  %v6259_v63 = vpop.f32.mrb[162].mxu1 }
 0x383   : > { %v6364_v28 = vadd.f32 %v6363_v50, %v6362_v59  ;;  %v6365_v7 = vpop.f32.mrb[190].mxu0  ;;  %v6260_v36 = vpop.f32.mrb[163].mxu1 }
 0x384   : > { %v6261_v40 = vadd.f32 %v6260_v36, %v6259_v63  ;;  %v6366_v22 = vpop.f32.mrb[191].mxu0  ;;  %v5703_v63 = vpack.c.bf16 %v3124_v15, %v3123_v56 }
 0x385   : > { %v8571_v16 = vadd.f32 %v6364_v28, %v6252_v18  ;;  %v6367_v29 = vadd.f32 %v6366_v22, %v6365_v7  ;;  %6741 = vmatmul.mubr.msk.bf16.gmra.mrb[12].mxu1 %vm7427_vm4, %v5688_v35  ;;  %v5697_v18 = vpack.c.bf16 %v3120_v30, %v3119_v53  ;;  %v3126_v22 = vld [vmem:[#allocation2 + $0x172] sm:$0xff] }
 0x386   : > { %6744 = vmatprep.mubr.msk.bf16.mxu1 %vm7427_vm4, %v5691_v27 }
 0x387   : > { %v8577_v41 = vadd.f32 %v6367_v29, %v6255_v25 }
 0x388   : > { %v6262_v62 = vpop.f32.mrb[164].mxu1 }
 0x389   : > { %v6368_v44 = vpop.f32.mrb[192].mxu0  ;;  %v6263_v31 = vpop.f32.mrb[165].mxu1 }
 0x38a   : > { %v6264_v33 = vadd.f32 %v6263_v31, %v6262_v62  ;;  %v6369_v10 = vpop.f32.mrb[193].mxu0  ;;  %v6265_v20 = vpop.f32.mrb[166].mxu1 }
 0x38b   : > { %v6370_v4 = vadd.f32 %v6369_v10, %v6368_v44  ;;  %v6371_v55 = vpop.f32.mrb[194].mxu0  ;;  %v6266_v49 = vpop.f32.mrb[167].mxu1 }
 0x38c   : > { %v6267_v8 = vadd.f32 %v6266_v49, %v6265_v20  ;;  %v6372_v61 = vpop.f32.mrb[195].mxu0 }
 0x38d   : > { %v8579_v14 = vadd.f32 %v6370_v4, %v6258_v23  ;;  %v6373_v47 = vadd.f32 %v6372_v61, %v6371_v55  ;;  %6745 = vmatmul.mubr.msk.bf16.gmra.mrb[16].mxu1 %vm7427_vm4, %v5694_v37 }
 0x38e   : > { %6748 = vmatprep.mubr.msk.bf16.mxu1 %vm7427_vm4, %v5697_v18 }
 0x38f   : > { %v8585_v2 = vadd.f32 %v6373_v47, %v6261_v40  ;;  %v3125_v40 = vld [vmem:[#allocation2 + $0x16a] sm:$0xff] }
 0x390   : > { %v6268_v48 = vpop.f32.mrb[168].mxu1  ;;  %v5706_v30 = vpack.c.bf16 %v3126_v22, %v3125_v40 }
 0x391   : > { %v6374_v25 = vpop.f32.mrb[196].mxu0  ;;  %v6269_v1 = vpop.f32.mrb[169].mxu1 }
 0x392   : > { %v6270_v5 = vadd.f32 %v6269_v1, %v6268_v48  ;;  %v6375_v19 = vpop.f32.mrb[197].mxu0  ;;  %v6271_v17 = vpop.f32.mrb[170].mxu1 }
 0x393   : > { %v6376_v59 = vadd.f32 %v6375_v19, %v6374_v25  ;;  %v6377_v52 = vpop.f32.mrb[198].mxu0  ;;  %v6272_v13 = vpop.f32.mrb[171].mxu1 }
 0x394   : > { %v6273_v23 = vadd.f32 %v6272_v13, %v6271_v17  ;;  %v6378_v50 = vpop.f32.mrb[199].mxu0 }
 0x395   : > { %v8587_v28 = vadd.f32 %v6376_v59, %v6264_v33  ;;  %v6379_v7 = vadd.f32 %v6378_v50, %v6377_v52  ;;  %6749 = vmatmul.mubr.msk.bf16.gmra.mrb[20].mxu1 %vm7427_vm4, %v5700_v34 }
 0x396   : > { %6752 = vmatprep.mubr.msk.bf16.mxu1 %vm7427_vm4, %v5703_v63 }
 0x397   : > { %v8593_v36 = vadd.f32 %v6379_v7, %v6267_v8 }
 0x398   : > { %v6274_v35 = vpop.f32.mrb[172].mxu1 }
 0x399   : > { %v6380_v27 = vpop.f32.mrb[200].mxu0  ;;  %v6275_v29 = vpop.f32.mrb[173].mxu1 }
 0x39a   : > { %v6276_v62 = vadd.f32 %v6275_v29, %v6274_v35  ;;  %v6381_v11 = vpop.f32.mrb[201].mxu0  ;;  %v6277_v51 = vpop.f32.mrb[174].mxu1 }
 0x39b   : > { %v6382_v44 = vadd.f32 %v6381_v11, %v6380_v27  ;;  %v6383_v31 = vpop.f32.mrb[202].mxu0  ;;  %v6278_v53 = vpop.f32.mrb[175].mxu1 }
 0x39c   : > { %v6279_v33 = vadd.f32 %v6278_v53, %v6277_v51  ;;  %v6384_v10 = vpop.f32.mrb[203].mxu0 }
 0x39d   : > { %v8595_v20 = vadd.f32 %v6382_v44, %v6270_v5  ;;  %v6385_v4 = vadd.f32 %v6384_v10, %v6383_v31  ;;  %6753 = vmatmul.mubr.msk.bf16.gmra.mrb[24].mxu1 %vm7427_vm4, %v5706_v30 }
 0x39e   : > { %6756 = vmatprep.mubr.msk.bf16.mxu1 %vm7427_vm4, %v8524_v24 }
 0x39f   : > { %v8602_v55 = vadd.f32 %v6385_v4, %v6273_v23 }
 0x3a0   : > { %v6280_v49 = vpop.f32.mrb[176].mxu1 }
 0x3a1   : > { %v6386_v37 = vpop.f32.mrb[204].mxu0  ;;  %v6281_v8 = vpop.f32.mrb[177].mxu1 }
 0x3a2   : > { %v6282_v61 = vadd.f32 %v6281_v8, %v6280_v49  ;;  %v6387_v18 = vpop.f32.mrb[205].mxu0  ;;  %v6283_v47 = vpop.f32.mrb[178].mxu1 }
 0x3a3   : > { %v6388_v48 = vadd.f32 %v6387_v18, %v6386_v37  ;;  %v6389_v38 = vpop.f32.mrb[206].mxu0  ;;  %v6284_v46 = vpop.f32.mrb[179].mxu1 }
 0x3a4   : > { %v6285_v25 = vadd.f32 %v6284_v46, %v6283_v47  ;;  %v6390_v1 = vpop.f32.mrb[207].mxu0 }
 0x3a5   : > { %v8604_v56 = vadd.f32 %v6388_v48, %v6276_v62  ;;  %v6391_v15 = vadd.f32 %v6390_v1, %v6389_v38  ;;  %6757 = vmatmul.mubr.bf16.gmra.mrb[28].mxu1 %v7144_v0 }
 0x3a7   : > { %v8607_v3 = vadd.f32 %v6391_v15, %v6279_v33 }
 0x3a8   : > { %v6286_v24 = vpop.f32.mrb[180].mxu1 }
 0x3a9   : > { %v6392_v5 = vpop.f32.mrb[208].mxu0  ;;  %v6287_v19 = vpop.f32.mrb[181].mxu1 }
 0x3aa   : > { %v6288_v17 = vadd.f32 %v6287_v19, %v6286_v24  ;;  %v6393_v59 = vpop.f32.mrb[209].mxu0  ;;  %v6289_v52 = vpop.f32.mrb[182].mxu1 }
 0x3ab   : > { %v6394_v13 = vadd.f32 %v6393_v59, %v6392_v5  ;;  %v6395_v34 = vpop.f32.mrb[210].mxu0  ;;  %v6290_v23 = vpop.f32.mrb[183].mxu1 }
 0x3ac   : > { %v6291_v50 = vadd.f32 %v6290_v23, %v6289_v52  ;;  %v6396_v63 = vpop.f32.mrb[211].mxu0 }
 0x3ad   : > { %v8609_v7 = vadd.f32 %v6394_v13, %v6282_v61  ;;  %v6397_v35 = vadd.f32 %v6396_v63, %v6395_v34 }
 0x3af   : > { %v8611_v40 = vadd.f32 %v6397_v35, %v6285_v25 }
 0x3b0   : > { %v6292_v22 = vpop.f32.mrb[184].mxu1 }
 0x3b1   : > { %v6398_v0 = vpop.f32.mrb[212].mxu0  ;;  %v6293_v27 = vpop.f32.mrb[185].mxu1 }
 0x3b2   : > { %v6294_v29 = vadd.f32 %v6293_v27, %v6292_v22  ;;  %v6399_v62 = vpop.f32.mrb[213].mxu0  ;;  %v6295_v11 = vpop.f32.mrb[186].mxu1 }
 0x3b3   : > { %v6400_v51 = vadd.f32 %v6399_v62, %v6398_v0  ;;  %v6401_v44 = vpop.f32.mrb[214].mxu0  ;;  %v6296_v31 = vpop.f32.mrb[187].mxu1 }
 0x3b4   : > { %v6297_v53 = vadd.f32 %v6296_v31, %v6295_v11  ;;  %v6402_v30 = vpop.f32.mrb[215].mxu0 }
 0x3b5   : > { %v8613_v33 = vadd.f32 %v6400_v51, %v6288_v17  ;;  %v6403_v10 = vadd.f32 %v6402_v30, %v6401_v44 }
 0x3b7   : > { %v8615_v4 = vadd.f32 %v6403_v10, %v6291_v50 }
 0x3b8   : > { %v6298_v49 = vpop.f32.mrb[188].mxu1 }
 0x3b9   : > { %v6404_v37 = vpop.f32.mrb[216].mxu0  ;;  %v6299_v8 = vpop.f32.mrb[189].mxu1 }
 0x3ba   : > { %v6300_v61 = vadd.f32 %v6299_v8, %v6298_v49  ;;  %v6405_v18 = vpop.f32.mrb[217].mxu0  ;;  %v6301_v47 = vpop.f32.mrb[190].mxu1 }
 0x3bb   : > { %v6406_v48 = vadd.f32 %v6405_v18, %v6404_v37  ;;  %v6407_v38 = vpop.f32.mrb[218].mxu0  ;;  %v6302_v46 = vpop.f32.mrb[191].mxu1 }
 0x3bc   : > { %v6303_v25 = vadd.f32 %v6302_v46, %v6301_v47  ;;  %v6408_v1 = vpop.f32.mrb[219].mxu0 }
 0x3bd   : > { %v8617_v15 = vadd.f32 %v6406_v48, %v6294_v29  ;;  %v6409_v24 = vadd.f32 %v6408_v1, %v6407_v38 }
 0x3bf   : > { %v8619_v5 = vadd.f32 %v6409_v24, %v6297_v53 }
 0x3c0   : > { %v6432_v19 = vpop.f32.mrb[192].mxu1 }
 0x3c1   : > { %v6410_v17 = vpop.f32.mrb[220].mxu0  ;;  %v6433_v59 = vpop.f32.mrb[193].mxu1 }
 0x3c2   : > { %v6411_v52 = vpop.f32.mrb[221].mxu0  ;;  %v6434_v13 = vadd.f32 %v6433_v59, %v6432_v19  ;;  %v6435_v34 = vpop.f32.mrb[194].mxu1 }
 0x3c3   : > { %v6412_v23 = vadd.f32 %v6411_v52, %v6410_v17  ;;  %v6413_v50 = vpop.f32.mrb[222].mxu0  ;;  %v6436_v63 = vpop.f32.mrb[195].mxu1 }
 0x3c4   : > { %v4240_v35 = vadd.f32 %v6434_v13, %v8503_v32  ;;  %v6414_v22 = vpop.f32.mrb[223].mxu0  ;;  %v6437_v0 = vadd.f32 %v6436_v63, %v6435_v34 }
 0x3c5   : > { %v8622_v27 = vadd.f32 %v6412_v23, %v6300_v61  ;;  %v6415_v29 = vadd.f32 %v6414_v22, %v6413_v50 }
 0x3c6   : > { %v4243_v62 = vadd.f32 %v6437_v0, %v8512_v58 }
 0x3c7   : > { %v8625_v11 = vadd.f32 %v6415_v29, %v6303_v25 }
 0x3c8   : > { %v6438_v51 = vpop.f32.mrb[196].mxu1 }
 0x3c9   : > { %v6544_v44 = vpop.f32.mrb[224].mxu0  ;;  %v6439_v31 = vpop.f32.mrb[197].mxu1 }
 0x3ca   : > { %v6440_v53 = vadd.f32 %v6439_v31, %v6438_v51  ;;  %v6545_v30 = vpop.f32.mrb[225].mxu0  ;;  %v6441_v10 = vpop.f32.mrb[198].mxu1 }
 0x3cb   : > { %v6546_v49 = vadd.f32 %v6545_v30, %v6544_v44  ;;  %v6547_v37 = vpop.f32.mrb[226].mxu0  ;;  %v6442_v8 = vpop.f32.mrb[199].mxu1 }
 0x3cc   : > { %v4248_v32 = vadd.f32 %v6440_v53, %v8514_v57  ;;  %v6443_v18 = vadd.f32 %v6442_v8, %v6441_v10  ;;  %v6548_v47 = vpop.f32.mrb[227].mxu0 }
 0x3cd   : > { %v6549_v61 = vadd.f32 %v6548_v47, %v6547_v37  ;;  %v8628_v48 = vadd.f32 %v6546_v49, %v4240_v35 }
 0x3ce   : > { %v4251_v58 = vadd.f32 %v6443_v18, %v8522_v12 }
 0x3cf   : > { %v8631_v38 = vadd.f32 %v6549_v61, %v4243_v62 }
 0x3d0   : > { %v6444_v46 = vpop.f32.mrb[200].mxu1 }
 0x3d1   : > { %v6550_v25 = vpop.f32.mrb[228].mxu0  ;;  %v6445_v1 = vpop.f32.mrb[201].mxu1 }
 0x3d2   : > { %v6446_v24 = vadd.f32 %v6445_v1, %v6444_v46  ;;  %v6551_v19 = vpop.f32.mrb[229].mxu0  ;;  %v6447_v17 = vpop.f32.mrb[202].mxu1 }
 0x3d3   : > { %v6552_v59 = vadd.f32 %v6551_v19, %v6550_v25  ;;  %v6553_v52 = vpop.f32.mrb[230].mxu0  ;;  %v6448_v13 = vpop.f32.mrb[203].mxu1 }
 0x3d4   : > { %v4256_v57 = vadd.f32 %v6446_v24, %v8526_v45  ;;  %v6449_v34 = vadd.f32 %v6448_v13, %v6447_v17  ;;  %v6554_v23 = vpop.f32.mrb[231].mxu0 }
 0x3d5   : > { %v6555_v50 = vadd.f32 %v6554_v23, %v6553_v52  ;;  %v8634_v63 = vadd.f32 %v6552_v59, %v4248_v32 }
 0x3d6   : > { %v4259_v12 = vadd.f32 %v6449_v34, %v8534_v26 }
 0x3d7   : > { %v8637_v35 = vadd.f32 %v6555_v50, %v4251_v58 }
 0x3d8   : > { %v6450_v22 = vpop.f32.mrb[204].mxu1 }
 0x3d9   : > { %v6556_v0 = vpop.f32.mrb[232].mxu0  ;;  %v6451_v29 = vpop.f32.mrb[205].mxu1 }
 0x3da   : > { %v6452_v62 = vadd.f32 %v6451_v29, %v6450_v22  ;;  %v6557_v51 = vpop.f32.mrb[233].mxu0  ;;  %v6453_v44 = vpop.f32.mrb[206].mxu1 }
 0x3db   : > { %v6558_v31 = vadd.f32 %v6557_v51, %v6556_v0  ;;  %v6559_v53 = vpop.f32.mrb[234].mxu0  ;;  %v6454_v30 = vpop.f32.mrb[207].mxu1 }
 0x3dc   : > { %v4264_v45 = vadd.f32 %v6452_v62, %v8536_v39  ;;  %v6455_v10 = vadd.f32 %v6454_v30, %v6453_v44  ;;  %v6560_v49 = vpop.f32.mrb[235].mxu0 }
 0x3dd   : > { %v6561_v37 = vadd.f32 %v6560_v49, %v6559_v53  ;;  %v8640_v8 = vadd.f32 %v6558_v31, %v4256_v57 }
 0x3de   : > { %v4267_v26 = vadd.f32 %v6455_v10, %v8543_v9 }
 0x3df   : > { %v8643_v32 = vadd.f32 %v6561_v37, %v4259_v12 }
 0x3e0   : > { %v6456_v18 = vpop.f32.mrb[208].mxu1 }
 0x3e1   : > { %v6562_v47 = vpop.f32.mrb[236].mxu0  ;;  %v6457_v61 = vpop.f32.mrb[209].mxu1 }
 0x3e2   : > { %v6458_v58 = vadd.f32 %v6457_v61, %v6456_v18  ;;  %v6563_v46 = vpop.f32.mrb[237].mxu0  ;;  %v6459_v25 = vpop.f32.mrb[210].mxu1 }
 0x3e3   : > { %v6564_v1 = vadd.f32 %v6563_v46, %v6562_v47  ;;  %v6565_v24 = vpop.f32.mrb[238].mxu0  ;;  %v6460_v19 = vpop.f32.mrb[211].mxu1 }
 0x3e4   : > { %v4272_v39 = vadd.f32 %v6458_v58, %v8546_v21  ;;  %v6461_v17 = vadd.f32 %v6460_v19, %v6459_v25  ;;  %v6566_v59 = vpop.f32.mrb[239].mxu0 }
 0x3e5   : > { %v6567_v52 = vadd.f32 %v6566_v59, %v6565_v24  ;;  %v8646_v13 = vadd.f32 %v6564_v1, %v4264_v45 }
 0x3e6   : > { %v4275_v9 = vadd.f32 %v6461_v17, %v8553_v42 }
 0x3e7   : > { %v8649_v57 = vadd.f32 %v6567_v52, %v4267_v26 }
 0x3e8   : > { %v6462_v34 = vpop.f32.mrb[212].mxu1 }
 0x3e9   : > { %v6568_v23 = vpop.f32.mrb[240].mxu0  ;;  %v6463_v50 = vpop.f32.mrb[213].mxu1 }
 0x3ea   : > { %v6464_v12 = vadd.f32 %v6463_v50, %v6462_v34  ;;  %v6569_v22 = vpop.f32.mrb[241].mxu0  ;;  %v6465_v0 = vpop.f32.mrb[214].mxu1 }
 0x3eb   : > { %v6570_v29 = vadd.f32 %v6569_v22, %v6568_v23  ;;  %v6571_v62 = vpop.f32.mrb[242].mxu0  ;;  %v6466_v51 = vpop.f32.mrb[215].mxu1 }
 0x3ec   : > { %v4280_v21 = vadd.f32 %v6464_v12, %v8555_v60  ;;  %v6467_v44 = vadd.f32 %v6466_v51, %v6465_v0  ;;  %v6572_v31 = vpop.f32.mrb[243].mxu0 }
 0x3ed   : > { %v6573_v53 = vadd.f32 %v6572_v31, %v6571_v62  ;;  %v8652_v30 = vadd.f32 %v6570_v29, %v4272_v39 }
 0x3ee   : > { %v4283_v42 = vadd.f32 %v6467_v44, %v8561_v43 }
 0x3ef   : > { %v8655_v45 = vadd.f32 %v6573_v53, %v4275_v9 }
 0x3f0   : > { %v6468_v10 = vpop.f32.mrb[216].mxu1 }
 0x3f1   : > { %v6574_v49 = vpop.f32.mrb[244].mxu0  ;;  %v6469_v37 = vpop.f32.mrb[217].mxu1 }
 0x3f2   : > { %v6470_v26 = vadd.f32 %v6469_v37, %v6468_v10  ;;  %v6575_v18 = vpop.f32.mrb[245].mxu0  ;;  %v6471_v47 = vpop.f32.mrb[218].mxu1 }
 0x3f3   : > { %v6576_v61 = vadd.f32 %v6575_v18, %v6574_v49  ;;  %v6577_v58 = vpop.f32.mrb[246].mxu0  ;;  %v6472_v46 = vpop.f32.mrb[219].mxu1 }
 0x3f4   : > { %v4288_v60 = vadd.f32 %v6470_v26, %v8563_v54  ;;  %v6473_v25 = vadd.f32 %v6472_v46, %v6471_v47  ;;  %v6578_v1 = vpop.f32.mrb[247].mxu0 }
 0x3f5   : > { %v6579_v24 = vadd.f32 %v6578_v1, %v6577_v58  ;;  %v8658_v19 = vadd.f32 %v6576_v61, %v4280_v21 }
 0x3f6   : > { %v4291_v43 = vadd.f32 %v6473_v25, %v8569_v6 }
 0x3f7   : > { %v8661_v39 = vadd.f32 %v6579_v24, %v4283_v42 }
 0x3f8   : > { %v6474_v17 = vpop.f32.mrb[220].mxu1 }
 0x3f9   : > { %v6580_v59 = vpop.f32.mrb[248].mxu0  ;;  %v6475_v52 = vpop.f32.mrb[221].mxu1 }
 0x3fa   : > { %v6476_v9 = vadd.f32 %v6475_v52, %v6474_v17  ;;  %v6581_v34 = vpop.f32.mrb[249].mxu0  ;;  %v6477_v23 = vpop.f32.mrb[222].mxu1 }
 0x3fb   : > { %v6582_v50 = vadd.f32 %v6581_v34, %v6580_v59  ;;  %v6583_v12 = vpop.f32.mrb[250].mxu0  ;;  %v6478_v22 = vpop.f32.mrb[223].mxu1 }
 0x3fc   : > { %v4296_v54 = vadd.f32 %v6476_v9, %v8571_v16  ;;  %v6479_v0 = vadd.f32 %v6478_v22, %v6477_v23  ;;  %v6584_v29 = vpop.f32.mrb[251].mxu0 }
 0x3fd   : > { %v6585_v62 = vadd.f32 %v6584_v29, %v6583_v12  ;;  %v8664_v51 = vadd.f32 %v6582_v50, %v4288_v60 }
 0x3fe   : > { %v4299_v6 = vadd.f32 %v6479_v0, %v8577_v41 }
 0x3ff   : > { %v8667_v21 = vadd.f32 %v6585_v62, %v4291_v43 }
 0x400   : > { %v6480_v44 = vpop.f32.mrb[224].mxu1 }
 0x401   : > { %v6586_v31 = vpop.f32.mrb[252].mxu0  ;;  %v6481_v53 = vpop.f32.mrb[225].mxu1 }
 0x402   : > { %v6482_v42 = vadd.f32 %v6481_v53, %v6480_v44  ;;  %v6587_v10 = vpop.f32.mrb[253].mxu0  ;;  %v6483_v49 = vpop.f32.mrb[226].mxu1 }
 0x403   : > { %v6588_v37 = vadd.f32 %v6587_v10, %v6586_v31  ;;  %v6589_v26 = vpop.f32.mrb[254].mxu0  ;;  %v6484_v18 = vpop.f32.mrb[227].mxu1 }
 0x404   : > { %v4304_v16 = vadd.f32 %v6482_v42, %v8579_v14  ;;  %v6485_v47 = vadd.f32 %v6484_v18, %v6483_v49  ;;  %v6590_v61 = vpop.f32.mrb[255].mxu0 }
 0x405   : > { %v6591_v58 = vadd.f32 %v6590_v61, %v6589_v26  ;;  %v8670_v46 = vadd.f32 %v6588_v37, %v4296_v54 }
 0x406   : > { %v4307_v41 = vadd.f32 %v6485_v47, %v8585_v2 }
 0x407   : > { %v8673_v60 = vadd.f32 %v6591_v58, %v4299_v6 }
 0x408   : > { %v6486_v25 = vpop.f32.mrb[228].mxu1 }
 0x409   : > { %v6592_v1 = vpop.f32.mrb[0].mxu0  ;;  %v6487_v24 = vpop.f32.mrb[229].mxu1 }
 0x40a   : > { %v6488_v43 = vadd.f32 %v6487_v24, %v6486_v25  ;;  %v6593_v17 = vpop.f32.mrb[1].mxu0  ;;  %v6489_v59 = vpop.f32.mrb[230].mxu1 }
 0x40b   : > { %v6594_v52 = vadd.f32 %v6593_v17, %v6592_v1  ;;  %v6595_v9 = vpop.f32.mrb[2].mxu0  ;;  %v6490_v34 = vpop.f32.mrb[231].mxu1 }
 0x40c   : > { %v4312_v14 = vadd.f32 %v6488_v43, %v8587_v28  ;;  %v6491_v23 = vadd.f32 %v6490_v34, %v6489_v59  ;;  %v6596_v50 = vpop.f32.mrb[3].mxu0 }
 0x40d   : > { %v6597_v12 = vadd.f32 %v6596_v50, %v6595_v9  ;;  %v8676_v22 = vadd.f32 %v6594_v52, %v4304_v16 }
 0x40e   : > { %v4315_v2 = vadd.f32 %v6491_v23, %v8593_v36 }
 0x40f   : > { %v8679_v54 = vadd.f32 %v6597_v12, %v4307_v41 }
 0x410   : > { %v6492_v0 = vpop.f32.mrb[232].mxu1 }
 0x411   : > { %v6598_v29 = vpop.f32.mrb[4].mxu0  ;;  %v6493_v62 = vpop.f32.mrb[233].mxu1 }
 0x412   : > { %v6494_v6 = vadd.f32 %v6493_v62, %v6492_v0  ;;  %v6599_v44 = vpop.f32.mrb[5].mxu0  ;;  %v6495_v31 = vpop.f32.mrb[234].mxu1 }
 0x413   : > { %v6600_v53 = vadd.f32 %v6599_v44, %v6598_v29  ;;  %v6601_v42 = vpop.f32.mrb[6].mxu0  ;;  %v6496_v10 = vpop.f32.mrb[235].mxu1 }
 0x414   : > { %v4320_v28 = vadd.f32 %v6494_v6, %v8595_v20  ;;  %v6497_v49 = vadd.f32 %v6496_v10, %v6495_v31  ;;  %v6602_v37 = vpop.f32.mrb[7].mxu0 }
 0x415   : > { %v6603_v26 = vadd.f32 %v6602_v37, %v6601_v42  ;;  %v8682_v18 = vadd.f32 %v6600_v53, %v4312_v14 }
 0x416   : > { %v4323_v36 = vadd.f32 %v6497_v49, %v8602_v55 }
 0x417   : > { %v8685_v16 = vadd.f32 %v6603_v26, %v4315_v2 }
 0x418   : > { %v6498_v47 = vpop.f32.mrb[236].mxu1 }
 0x419   : > { %v6604_v61 = vpop.f32.mrb[8].mxu0  ;;  %v6499_v58 = vpop.f32.mrb[237].mxu1 }
 0x41a   : > { %v6500_v41 = vadd.f32 %v6499_v58, %v6498_v47  ;;  %v6605_v25 = vpop.f32.mrb[9].mxu0  ;;  %v6501_v1 = vpop.f32.mrb[238].mxu1 }
 0x41b   : > { %v6606_v24 = vadd.f32 %v6605_v25, %v6604_v61  ;;  %v6607_v43 = vpop.f32.mrb[10].mxu0  ;;  %v6502_v17 = vpop.f32.mrb[239].mxu1 }
 0x41c   : > { %v4328_v20 = vadd.f32 %v6500_v41, %v8604_v56  ;;  %v6503_v59 = vadd.f32 %v6502_v17, %v6501_v1  ;;  %v6608_v52 = vpop.f32.mrb[11].mxu0 }
 0x41d   : > { %v6609_v9 = vadd.f32 %v6608_v52, %v6607_v43  ;;  %v8688_v34 = vadd.f32 %v6606_v24, %v4320_v28 }
 0x41e   : > { %v4331_v55 = vadd.f32 %v6503_v59, %v8607_v3 }
 0x41f   : > { %v8691_v14 = vadd.f32 %v6609_v9, %v4323_v36 }
 0x420   : > { %v6504_v23 = vpop.f32.mrb[240].mxu1 }
 0x421   : > { %v6610_v50 = vpop.f32.mrb[12].mxu0  ;;  %v6505_v12 = vpop.f32.mrb[241].mxu1 }
 0x422   : > { %v6506_v2 = vadd.f32 %v6505_v12, %v6504_v23  ;;  %v6611_v0 = vpop.f32.mrb[13].mxu0  ;;  %v6507_v29 = vpop.f32.mrb[242].mxu1 }
 0x423   : > { %v6612_v62 = vadd.f32 %v6611_v0, %v6610_v50  ;;  %v6613_v6 = vpop.f32.mrb[14].mxu0  ;;  %v6508_v44 = vpop.f32.mrb[243].mxu1 }
 0x424   : > { %v4336_v56 = vadd.f32 %v6506_v2, %v8609_v7  ;;  %v6509_v31 = vadd.f32 %v6508_v44, %v6507_v29  ;;  %v6614_v53 = vpop.f32.mrb[15].mxu0 }
 0x425   : > { %v6615_v42 = vadd.f32 %v6614_v53, %v6613_v6  ;;  %v8694_v10 = vadd.f32 %v6612_v62, %v4328_v20 }
 0x426   : > { %v4339_v3 = vadd.f32 %v6509_v31, %v8611_v40 }
 0x427   : > { %v8697_v28 = vadd.f32 %v6615_v42, %v4331_v55 }
 0x428   : > { %v6510_v49 = vpop.f32.mrb[244].mxu1 }
 0x429   : > { %v6616_v37 = vpop.f32.mrb[16].mxu0  ;;  %v6511_v26 = vpop.f32.mrb[245].mxu1 }
 0x42a   : > { %v6512_v36 = vadd.f32 %v6511_v26, %v6510_v49  ;;  %v6617_v47 = vpop.f32.mrb[17].mxu0  ;;  %v6513_v61 = vpop.f32.mrb[246].mxu1 }
 0x42b   : > { %v6618_v58 = vadd.f32 %v6617_v47, %v6616_v37  ;;  %v6619_v41 = vpop.f32.mrb[18].mxu0  ;;  %v6514_v25 = vpop.f32.mrb[247].mxu1 }
 0x42c   : > { %v4344_v7 = vadd.f32 %v6512_v36, %v8613_v33  ;;  %v6515_v1 = vadd.f32 %v6514_v25, %v6513_v61  ;;  %v6620_v24 = vpop.f32.mrb[19].mxu0 }
 0x42d   : > { %v6621_v43 = vadd.f32 %v6620_v24, %v6619_v41  ;;  %v8700_v17 = vadd.f32 %v6618_v58, %v4336_v56  ;;  %v8720_v24 = vld [vmem:[%s8951_s5] ss:$0 sm:$0xff] }
 0x42e   : > { %v4347_v40 = vadd.f32 %v6515_v1, %v8615_v4 }
 0x42f   : > { %v8703_v20 = vadd.f32 %v6621_v43, %v4339_v3 }
 0x430   : > { %v6516_v59 = vpop.f32.mrb[248].mxu1 }
 0x431   : > { %v6622_v52 = vpop.f32.mrb[20].mxu0  ;;  %v6517_v9 = vpop.f32.mrb[249].mxu1 }
 0x432   : > { %v6518_v55 = vadd.f32 %v6517_v9, %v6516_v59  ;;  %v6623_v23 = vpop.f32.mrb[21].mxu0  ;;  %v6519_v50 = vpop.f32.mrb[250].mxu1  ;;  %v8726_v59 = vld [vmem:[%s8952_s6] ss:$0 sm:$0xff] }
 0x433   : > { %v6624_v12 = vadd.f32 %v6623_v23, %v6622_v52  ;;  %v6625_v2 = vpop.f32.mrb[22].mxu0  ;;  %v6520_v0 = vpop.f32.mrb[251].mxu1 }
 0x434   : > { %v4352_v33 = vadd.f32 %v6518_v55, %v8617_v15  ;;  %v6521_v29 = vadd.f32 %v6520_v0, %v6519_v50  ;;  %v6626_v62 = vpop.f32.mrb[23].mxu0 }
 0x435   : > { %v6627_v6 = vadd.f32 %v6626_v62, %v6625_v2  ;;  %v8706_v44 = vadd.f32 %v6624_v12, %v4344_v7  ;;  %v4768_v2 = vld [vmem:[%s7367_s21 + $0x10] sm:$0xff] }
 0x436   : > { %v4355_v4 = vadd.f32 %v6521_v29, %v8619_v5 }
 0x437   : > { %v8709_v56 = vadd.f32 %v6627_v6, %v4347_v40  ;;  %v4766_v6 = vld [vmem:[%s7367_s21] sm:$0xff] }
 0x438   : > { %v6522_v31 = vpop.f32.mrb[252].mxu1 }
 0x439   : > { %v6628_v53 = vpop.f32.mrb[24].mxu0  ;;  %v6523_v42 = vpop.f32.mrb[253].mxu1 }
 0x43a   : > { %v6524_v3 = vadd.f32 %v6523_v42, %v6522_v31  ;;  %v6629_v49 = vpop.f32.mrb[25].mxu0  ;;  %v6525_v37 = vpop.f32.mrb[254].mxu1  ;;  %v4769_v42 = vld [vmem:[%s7367_s21 + $0x18] sm:$0xff] }
 0x43b   : > { %v6630_v26 = vadd.f32 %v6629_v49, %v6628_v53  ;;  %v6631_v36 = vpop.f32.mrb[26].mxu0  ;;  %v6526_v47 = vpop.f32.mrb[255].mxu1 }
 0x43c   : > { %v4360_v15 = vadd.f32 %v6524_v3, %v8622_v27  ;;  %v6527_v61 = vadd.f32 %v6526_v47, %v6525_v37  ;;  %v6632_v58 = vpop.f32.mrb[27].mxu0  ;;  %v4767_v37 = vld [vmem:[%s7367_s21 + $0x8] sm:$0xff] }
 0x43d   : > { %v6633_v41 = vadd.f32 %v6632_v58, %v6631_v36  ;;  %v8712_v25 = vadd.f32 %v6630_v26, %v4352_v33 }
 0x43e   : > { %v4363_v5 = vadd.f32 %v6527_v61, %v8625_v11 }
 0x43f   : > { %v8715_v7 = vadd.f32 %v6633_v41, %v4355_v4 }
 0x440   : > { %v6730_v1 = vpop.f32.mrb[0].mxu1 }
 0x441   : > { %v6634_v43 = vpop.f32.mrb[28].mxu0  ;;  %v4570_v40 = vadd.f32 %v6730_v1, %v8634_v63  ;;  %v4561_v27 = vpop.f32.mrb[1].mxu1 }
 0x442   : > { %v6635_v11 = vpop.f32.mrb[29].mxu0  ;;  %v4562_v52 = vadd.f32 %v4561_v27, %v8628_v48  ;;  %v6731_v9 = vpop.f32.mrb[2].mxu1 }
 0x443   : > { %v4697_v55 = vmul.f32 %v8720_v24, %v4570_v40  ;;  %v6636_v23 = vadd.f32 %v6635_v11, %v6634_v43  ;;  %v6637_v50 = vpop.f32.mrb[30].mxu0  ;;  %v4573_v12 = vadd.f32 %v6731_v9, %v8637_v35  ;;  %v4564_v63 = vpop.f32.mrb[3].mxu1 }
 0x444   : > { %v4695_v0 = vmul.f32 %v8720_v24, %v4562_v52  ;;  %v6638_v33 = vpop.f32.mrb[31].mxu0  ;;  %v4565_v29 = vadd.f32 %v4564_v63, %v8631_v38 }
 0x445   : > { %v4736_v62 = vadd.f32 %v8726_v59, %v4697_v55  ;;  %v4698_v48 = vmul.f32 %v8720_v24, %v4573_v12  ;;  %v6639_v4 = vadd.f32 %v6638_v33, %v6637_v50  ;;  %v8737_v31 = vadd.f32 %v6636_v23, %v4360_v15  ;;  %v4770_v12 = vld [vmem:[%s7367_s21 + $0x20] sm:$0xff] }
 0x446   : > { %v4734_v53 = vadd.f32 %v8726_v59, %v4695_v0  ;;  %v4696_v35 = vmul.f32 %v8720_v24, %v4565_v29  ;;  %v4773_v0 = vld [vmem:[%s7367_s21 + $0x38] sm:$0xff] }
 0x447   : > { %v4800_v3 = vadd.f32 %v4768_v2, %v4736_v62  ;;  %v4737_v49 = vadd.f32 %v8726_v59, %v4698_v48  ;;  %v8744_v26 = vadd.f32 %v6639_v4, %v4363_v5  ;;  %v4771_v62 = vld [vmem:[%s7367_s21 + $0x28] sm:$0xff] }
 0x448   : > { %v4798_v38 = vadd.f32 %v4766_v6, %v4734_v53  ;;  %v4735_v36 = vadd.f32 %v8726_v59, %v4696_v35  ;;  %v6734_v47 = vpop.f32.mrb[4].mxu1 }
 0x449   : > { %v4832_v61 = vmax.f32 %v4800_v3, 0.0  ;;  %v4801_v15 = vadd.f32 %v4769_v42, %v4737_v49  ;;  %v4586_v58 = vadd.f32 %v6734_v47, %v8646_v13  ;;  %v4577_v41 = vpop.f32.mrb[5].mxu1 }
 0x44a   : > { %v4830_v1 = vmax.f32 %v4798_v38, 0.0  ;;  %v4799_v43 = vadd.f32 %v4767_v37, %v4735_v36  ;;  %v4578_v40 = vadd.f32 %v4577_v41, %v8640_v8  ;;  %v6735_v27 = vpop.f32.mrb[6].mxu1  ;;  %v4772_v8 = vld [vmem:[%s7367_s21 + $0x30] sm:$0xff] }
 0x44b   : > { %4864 = vst [vmem:[%s8751_s12 + $0x10] sm:$0xff] %v4832_v61  ;;  %v4833_v5 = vmax.f32 %v4801_v15, 0.0  ;;  %v4701_v11 = vmul.f32 %v8720_v24, %v4586_v58  ;;  %v4589_v13 = vadd.f32 %v6735_v27, %v8649_v57  ;;  %v4580_v52 = vpop.f32.mrb[7].mxu1  ;;  %v4776_v58 = vld [vmem:[%s7367_s21 + $0x50] sm:$0xff] }
 0x44c   : > { %4862 = vst [vmem:[%s8751_s12] sm:$0xff] %v4830_v1  ;;  %v4831_v9 = vmax.f32 %v4799_v43, 0.0  ;;  %v4699_v55 = vmul.f32 %v8720_v24, %v4578_v40  ;;  %v4581_v23 = vadd.f32 %v4580_v52, %v8643_v32  ;;  %v4774_v43 = vld [vmem:[%s7367_s21 + $0x40] sm:$0xff]  ;;  %v4775_v52 = vld [vmem:[%s7367_s21 + $0x48] sm:$0xff] }
 0x44d   : > { %4865 = vst [vmem:[%s8751_s12 + $0x18] sm:$0xff] %v4833_v5  ;;  %v4740_v50 = vadd.f32 %v8726_v59, %v4701_v11  ;;  %v4702_v63 = vmul.f32 %v8720_v24, %v4589_v13  ;;  %v4777_v5 = vld [vmem:[%s7367_s21 + $0x58] sm:$0xff] }
 0x44e   : > { %4863 = vst [vmem:[%s8751_s12 + $0x8] sm:$0xff] %v4831_v9  ;;  %v4738_v2 = vadd.f32 %v8726_v59, %v4699_v55  ;;  %v4700_v57 = vmul.f32 %v8720_v24, %v4581_v23 }
 0x44f   : > { %v4804_v33 = vadd.f32 %v4772_v8, %v4740_v50  ;;  %v4741_v29 = vadd.f32 %v8726_v59, %v4702_v63 }
 0x450   : > { %v4802_v6 = vadd.f32 %v4770_v12, %v4738_v2  ;;  %v4739_v32 = vadd.f32 %v8726_v59, %v4700_v57  ;;  %v6738_v48 = vpop.f32.mrb[8].mxu1 }
 0x451   : > { %v4836_v4 = vmax.f32 %v4804_v33, 0.0  ;;  %v4805_v53 = vadd.f32 %v4773_v0, %v4741_v29  ;;  %v4602_v42 = vadd.f32 %v6738_v48, %v8658_v19  ;;  %v4593_v35 = vpop.f32.mrb[9].mxu1 }
 0x452   : > { %v4834_v3 = vmax.f32 %v4802_v6, 0.0  ;;  %v4803_v49 = vadd.f32 %v4771_v62, %v4739_v32  ;;  %v4594_v37 = vadd.f32 %v4593_v35, %v8652_v30  ;;  %v6739_v38 = vpop.f32.mrb[10].mxu1  ;;  %v4780_v32 = vld [vmem:[%s7367_s21 + $0x70] sm:$0xff] }
 0x453   : > { %4868 = vst [vmem:[%s8751_s12 + $0x30] sm:$0xff] %v4836_v4  ;;  %v4837_v36 = vmax.f32 %v4805_v53, 0.0  ;;  %v4705_v47 = vmul.f32 %v8720_v24, %v4602_v42  ;;  %v4605_v61 = vadd.f32 %v6739_v38, %v8661_v39  ;;  %v4596_v15 = vpop.f32.mrb[11].mxu1  ;;  %v4778_v53 = vld [vmem:[%s7367_s21 + $0x60] sm:$0xff]  ;;  %v4779_v38 = vld [vmem:[%s7367_s21 + $0x68] sm:$0xff] }
 0x454   : > { %4866 = vst [vmem:[%s8751_s12 + $0x20] sm:$0xff] %v4834_v3  ;;  %v4835_v19 = vmax.f32 %v4803_v49, 0.0  ;;  %v4703_v41 = vmul.f32 %v8720_v24, %v4594_v37  ;;  %v4597_v1 = vadd.f32 %v4596_v15, %v8655_v45  ;;  %v4781_v3 = vld [vmem:[%s7367_s21 + $0x78] sm:$0xff] }
 0x455   : > { %4869 = vst [vmem:[%s8751_s12 + $0x38] sm:$0xff] %v4837_v36  ;;  %v4744_v30 = vadd.f32 %v8726_v59, %v4705_v47  ;;  %v4706_v40 = vmul.f32 %v8720_v24, %v4605_v61 }
 0x456   : > { %4867 = vst [vmem:[%s8751_s12 + $0x28] sm:$0xff] %v4835_v19  ;;  %v4742_v27 = vadd.f32 %v8726_v59, %v4703_v41  ;;  %v4704_v39 = vmul.f32 %v8720_v24, %v4597_v1 }
 0x457   : > { %v4808_v11 = vadd.f32 %v4776_v58, %v4744_v30  ;;  %v4745_v13 = vadd.f32 %v8726_v59, %v4706_v40 }
 0x458   : > { %v4806_v9 = vadd.f32 %v4774_v43, %v4742_v27  ;;  %v4743_v45 = vadd.f32 %v8726_v59, %v4704_v39  ;;  %v6742_v8 = vpop.f32.mrb[12].mxu1 }
 0x459   : > { %v4840_v55 = vmax.f32 %v4808_v11, 0.0  ;;  %v4809_v23 = vadd.f32 %v4777_v5, %v4745_v13  ;;  %v4618_v50 = vadd.f32 %v6742_v8, %v8670_v46  ;;  %v4609_v12 = vpop.f32.mrb[13].mxu1  ;;  %v4784_v11 = vld [vmem:[%s7367_s21 + $0x90] sm:$0xff] }
 0x45a   : > { %v4838_v63 = vmax.f32 %v4806_v9, 0.0  ;;  %v4807_v2 = vadd.f32 %v4775_v52, %v4743_v45  ;;  %v4610_v0 = vadd.f32 %v4609_v12, %v8664_v51  ;;  %v6743_v57 = vpop.f32.mrb[14].mxu1  ;;  %v4782_v9 = vld [vmem:[%s7367_s21 + $0x80] sm:$0xff]  ;;  %v4783_v12 = vld [vmem:[%s7367_s21 + $0x88] sm:$0xff] }
 0x45b   : > { %4872 = vst [vmem:[%s8751_s12 + $0x50] sm:$0xff] %v4840_v55  ;;  %v4841_v33 = vmax.f32 %v4809_v23, 0.0  ;;  %v4709_v29 = vmul.f32 %v8720_v24, %v4618_v50  ;;  %v4621_v62 = vadd.f32 %v6743_v57, %v8673_v60  ;;  %v4612_v6 = vpop.f32.mrb[15].mxu1  ;;  %v4785_v55 = vld [vmem:[%s7367_s21 + $0x98] sm:$0xff] }
 0x45c   : > { %4870 = vst [vmem:[%s8751_s12 + $0x40] sm:$0xff] %v4838_v63  ;;  %v4839_v46 = vmax.f32 %v4807_v2, 0.0  ;;  %v4707_v48 = vmul.f32 %v8720_v24, %v4610_v0  ;;  %v4613_v4 = vadd.f32 %v4612_v6, %v8667_v21 }
 0x45d   : > { %4873 = vst [vmem:[%s8751_s12 + $0x58] sm:$0xff] %v4841_v33  ;;  %v4748_v51 = vadd.f32 %v8726_v59, %v4709_v29  ;;  %v4710_v42 = vmul.f32 %v8720_v24, %v4621_v62 }
 0x45e   : > { %4871 = vst [vmem:[%s8751_s12 + $0x48] sm:$0xff] %v4839_v46  ;;  %v4746_v35 = vadd.f32 %v8726_v59, %v4707_v48  ;;  %v4708_v60 = vmul.f32 %v8720_v24, %v4613_v4 }
 0x45f   : > { %v4812_v49 = vadd.f32 %v4780_v32, %v4748_v51  ;;  %v4749_v37 = vadd.f32 %v8726_v59, %v4710_v42  ;;  %v4788_v42 = vld [vmem:[%s7367_s21 + $0xb0] sm:$0xff] }
 0x460   : > { %v4810_v36 = vadd.f32 %v4778_v53, %v4746_v35  ;;  %v4747_v21 = vadd.f32 %v8726_v59, %v4708_v60  ;;  %v6746_v47 = vpop.f32.mrb[16].mxu1  ;;  %v4786_v60 = vld [vmem:[%s7367_s21 + $0xa0] sm:$0xff] }
 0x461   : > { %v4844_v61 = vmax.f32 %v4812_v49, 0.0  ;;  %v4813_v15 = vadd.f32 %v4781_v3, %v4749_v37  ;;  %v4634_v19 = vadd.f32 %v6746_v47, %v8682_v18  ;;  %v4625_v58 = vpop.f32.mrb[17].mxu1  ;;  %v4787_v47 = vld [vmem:[%s7367_s21 + $0xa8] sm:$0xff] }
 0x462   : > { %v4842_v41 = vmax.f32 %v4810_v36, 0.0  ;;  %v4811_v1 = vadd.f32 %v4779_v38, %v4747_v21  ;;  %v4626_v30 = vadd.f32 %v4625_v58, %v8676_v22  ;;  %v6747_v43 = vpop.f32.mrb[18].mxu1  ;;  %v4789_v38 = vld [vmem:[%s7367_s21 + $0xb8] sm:$0xff] }
 0x463   : > { %4876 = vst [vmem:[%s8751_s12 + $0x70] sm:$0xff] %v4844_v61  ;;  %v4845_v40 = vmax.f32 %v4813_v15, 0.0  ;;  %v4713_v27 = vmul.f32 %v8720_v24, %v4634_v19  ;;  %v4637_v5 = vadd.f32 %v6747_v43, %v8685_v16  ;;  %v4628_v39 = vpop.f32.mrb[19].mxu1 }
 0x464   : > { %4874 = vst [vmem:[%s8751_s12 + $0x60] sm:$0xff] %v4842_v41  ;;  %v4843_v18 = vmax.f32 %v4811_v1, 0.0  ;;  %v4711_v13 = vmul.f32 %v8720_v24, %v4626_v30  ;;  %v4629_v52 = vadd.f32 %v4628_v39, %v8679_v54 }
 0x465   : > { %4877 = vst [vmem:[%s8751_s12 + $0x78] sm:$0xff] %v4845_v40  ;;  %v4752_v22 = vadd.f32 %v8726_v59, %v4713_v27  ;;  %v4714_v45 = vmul.f32 %v8720_v24, %v4637_v5 }
 0x466   : > { %4875 = vst [vmem:[%s8751_s12 + $0x68] sm:$0xff] %v4843_v18  ;;  %v4750_v8 = vadd.f32 %v8726_v59, %v4711_v13  ;;  %v4712_v16 = vmul.f32 %v8720_v24, %v4629_v52  ;;  %v4792_v13 = vld [vmem:[%s7367_s21 + $0xd0] sm:$0xff] }
 0x467   : > { %v4816_v23 = vadd.f32 %v4784_v11, %v4752_v22  ;;  %v4753_v50 = vadd.f32 %v8726_v59, %v4714_v45 }
 0x468   : > { %v4814_v63 = vadd.f32 %v4782_v9, %v4750_v8  ;;  %v4751_v54 = vadd.f32 %v8726_v59, %v4712_v16  ;;  %v6750_v2 = vpop.f32.mrb[20].mxu1  ;;  %v4790_v9 = vld [vmem:[%s7367_s21 + $0xc0] sm:$0xff] }
 0x469   : > { %v4848_v0 = vmax.f32 %v4816_v23, 0.0  ;;  %v4817_v57 = vadd.f32 %v4785_v55, %v4753_v50  ;;  %v4650_v33 = vadd.f32 %v6750_v2, %v8694_v10  ;;  %v4641_v29 = vpop.f32.mrb[21].mxu1  ;;  %v4793_v55 = vld [vmem:[%s7367_s21 + $0xd8] sm:$0xff]  ;;  %v4791_v50 = vld [vmem:[%s7367_s21 + $0xc8] sm:$0xff] }
 0x46a   : > { %v4846_v62 = vmax.f32 %v4814_v63, 0.0  ;;  %v4815_v6 = vadd.f32 %v4783_v12, %v4751_v54  ;;  %v4642_v46 = vadd.f32 %v4641_v29, %v8688_v34  ;;  %v6751_v32 = vpop.f32.mrb[22].mxu1 }
 0x46b   : > { %4880 = vst [vmem:[%s8751_s12 + $0x90] sm:$0xff] %v4848_v0  ;;  %v4849_v48 = vmax.f32 %v4817_v57, 0.0  ;;  %v4717_v4 = vmul.f32 %v8720_v24, %v4650_v33  ;;  %v4653_v51 = vadd.f32 %v6751_v32, %v8697_v28  ;;  %v4644_v53 = vpop.f32.mrb[23].mxu1 }
 0x46c   : > { %4878 = vst [vmem:[%s8751_s12 + $0x80] sm:$0xff] %v4846_v62  ;;  %v4847_v10 = vmax.f32 %v4815_v6, 0.0  ;;  %v4715_v35 = vmul.f32 %v8720_v24, %v4642_v46  ;;  %v4645_v3 = vadd.f32 %v4644_v53, %v8691_v14 }
 0x46d   : > { %4881 = vst [vmem:[%s8751_s12 + $0x98] sm:$0xff] %v4849_v48  ;;  %v4756_v34 = vadd.f32 %v8726_v59, %v4717_v4  ;;  %v4718_v49 = vmul.f32 %v8720_v24, %v4653_v51  ;;  %v4796_v51 = vld [vmem:[%s7367_s21 + $0xf0] sm:$0xff] }
 0x46e   : > { %4879 = vst [vmem:[%s8751_s12 + $0x88] sm:$0xff] %v4847_v10  ;;  %v4754_v37 = vadd.f32 %v8726_v59, %v4715_v35  ;;  %v4716_v28 = vmul.f32 %v8720_v24, %v4645_v3  ;;  %v4797_v3 = vld [vmem:[%s7367_s21 + $0xf8] sm:$0xff] }
 0x46f   : > { %v4820_v36 = vadd.f32 %v4788_v42, %v4756_v34  ;;  %v4757_v21 = vadd.f32 %v8726_v59, %v4718_v49  ;;  %v4794_v42 = vld [vmem:[%s7367_s21 + $0xe0] sm:$0xff] }
 0x470   : > { %v4818_v61 = vadd.f32 %v4786_v60, %v4754_v37  ;;  %v4755_v14 = vadd.f32 %v8726_v59, %v4716_v28  ;;  %v6754_v15 = vpop.f32.mrb[24].mxu1  ;;  %v4795_v37 = vld [vmem:[%s7367_s21 + $0xe8] sm:$0xff]  ;;  %s7065_s21 = scalar_lea.vmem %s8899_s29, 4096 }
 0x471   : > { %v4852_v19 = vmax.f32 %v4820_v36, 0.0  ;;  %v4821_v58 = vadd.f32 %v4789_v38, %v4757_v21  ;;  %v4666_v41 = vadd.f32 %v6754_v15, %v8706_v44  ;;  %v4657_v1 = vpop.f32.mrb[25].mxu1  ;;  %p7066_p11 = scmp.ne.s32.totalorder %s8899_s29, %s7065_s21  ;;  %p7073_p9 = scmp.lt.s32.totalorder %s7071_s22, %s7065_s21 }
 0x472   : > { %v4850_v30 = vmax.f32 %v4818_v61, 0.0  ;;  %v4819_v43 = vadd.f32 %v4787_v47, %v4755_v14  ;;  %v4658_v40 = vadd.f32 %v4657_v1, %v8700_v17  ;;  %v6755_v27 = vpop.f32.mrb[26].mxu1 }
 0x473   : > { %4884 = vst [vmem:[%s8751_s12 + $0xb0] sm:$0xff] %v4852_v19  ;;  %v4853_v5 = vmax.f32 %v4821_v58, 0.0  ;;  %v4721_v39 = vmul.f32 %v8720_v24, %v4666_v41  ;;  %v4669_v18 = vadd.f32 %v6755_v27, %v8709_v56  ;;  %v4660_v11 = vpop.f32.mrb[27].mxu1  ;;  %p7067_p1 = pnand %p7066_p11, %p8971_p0  ;;  %p7074_p12 = por %p7073_p9, %p7072_p7 }
 0x474   : > { %4882 = vst [vmem:[%s8751_s12 + $0xa0] sm:$0xff] %v4850_v30  ;;  %v4851_v44 = vmax.f32 %v4819_v43, 0.0  ;;  %v4719_v52 = vmul.f32 %v8720_v24, %v4658_v40  ;;  %v4661_v22 = vadd.f32 %v4660_v11, %v8703_v20 }
 0x475   : > { %4885 = vst [vmem:[%s8751_s12 + $0xb8] sm:$0xff] %v4853_v5  ;;  %v4760_v17 = vadd.f32 %v8726_v59, %v4721_v39  ;;  %v4722_v45 = vmul.f32 %v8720_v24, %v4669_v18  ;;  %p7068_p3 = pneg %p7067_p1 }
 0x476   : > { %4883 = vst [vmem:[%s8751_s12 + $0xa8] sm:$0xff] %v4851_v44  ;;  %v4758_v8 = vadd.f32 %v8726_v59, %v4719_v52  ;;  %v4720_v56 = vmul.f32 %v8720_v24, %v4661_v22 }
 0x477   : > { %v4824_v16 = vadd.f32 %v4792_v13, %v4760_v17  ;;  %v4761_v23 = vadd.f32 %v8726_v59, %v4722_v45  ;;  %p7075_p2 = pnand %p7074_p12, %p7068_p3 }
 0x478   : > { %v4822_v12 = vadd.f32 %v4790_v9, %v4758_v8  ;;  %v4759_v20 = vadd.f32 %v8726_v59, %v4720_v56  ;;  %v6758_v63 = vpop.f32.mrb[28].mxu1 }
 0x479   : > { %v4856_v54 = vmax.f32 %v4824_v16, 0.0  ;;  %v4825_v2 = vadd.f32 %v4793_v55, %v4761_v23  ;;  %v4682_v0 = vadd.f32 %v6758_v63, %v8737_v31  ;;  %v4673_v57 = vpop.f32.mrb[29].mxu1 }
 0x47a   : > { %v4854_v33 = vmax.f32 %v4822_v12, 0.0  ;;  %v4823_v29 = vadd.f32 %v4791_v50, %v4759_v20  ;;  %v4674_v62 = vadd.f32 %v4673_v57, %v8712_v25  ;;  %v6759_v6 = vpop.f32.mrb[30].mxu1 }
 0x47b   : > { %4888 = vst [vmem:[%s8751_s12 + $0xd0] sm:$0xff] %v4856_v54  ;;  %v4857_v46 = vmax.f32 %v4825_v2, 0.0  ;;  %v4725_v32 = vmul.f32 %v8720_v24, %v4682_v0  ;;  %v4685_v48 = vadd.f32 %v6759_v6, %v8744_v26  ;;  %v4676_v4 = vpop.f32.mrb[31].mxu1 }
 0x47c   : > { %4886 = vst [vmem:[%s8751_s12 + $0xc0] sm:$0xff] %v4854_v33  ;;  %v4855_v31 = vmax.f32 %v4823_v29, 0.0  ;;  %v4723_v53 = vmul.f32 %v8720_v24, %v4674_v62  ;;  %v4677_v25 = vadd.f32 %v4676_v4, %v8715_v7 }
 0x47d   : > { %4889 = vst [vmem:[%s8751_s12 + $0xd8] sm:$0xff] %v4857_v46  ;;  %v4764_v10 = vadd.f32 %v8726_v59, %v4725_v32  ;;  %v4726_v35 = vmul.f32 %v8720_v24, %v4685_v48 }
 0x47e   : > { %4887 = vst [vmem:[%s8751_s12 + $0xc8] sm:$0xff] %v4855_v31  ;;  %v4762_v26 = vadd.f32 %v8726_v59, %v4723_v53  ;;  %v4724_v34 = vmul.f32 %v8720_v24, %v4677_v25 }
 0x47f   : > { %v4828_v60 = vadd.f32 %v4796_v51, %v4764_v10  ;;  %v4765_v49 = vadd.f32 %v8726_v59, %v4726_v35 }
 0x480   : > { %v4826_v7 = vadd.f32 %v4794_v42, %v4762_v26  ;;  %v4763_v38 = vadd.f32 %v8726_v59, %v4724_v34 }
 0x481   : > { %v4860_v28 = vmax.f32 %v4828_v60, 0.0  ;;  %v4829_v36 = vadd.f32 %v4797_v3, %v4765_v49 }
 0x482   : > { %v4858_v21 = vmax.f32 %v4826_v7, 0.0  ;;  %v4827_v47 = vadd.f32 %v4795_v37, %v4763_v38 }
 0x483   : > { %4892 = vst [vmem:[%s8751_s12 + $0xf0] sm:$0xff] %v4860_v28  ;;  %v4861_v24 = vmax.f32 %v4829_v36, 0.0 }
 0x484   : > { %4890 = vst [vmem:[%s8751_s12 + $0xe0] sm:$0xff] %v4858_v21  ;;  %v4859_v59 = vmax.f32 %v4827_v47, 0.0 }
 0x485   : > { %4893 = vst [vmem:[%s8751_s12 + $0xf8] sm:$0xff] %v4861_v24 }
 0x486   : > { %4891 = vst [vmem:[%s8751_s12 + $0xe8] sm:$0xff] %v4859_v59 }
 0x487   : > { %7078 = shalt.err (!%p7075_p2)
}
 0x488   : > { %s7079_s10 = scalar_lea.hbm %s8897_s9, 4096  ;;  %s7083_s12 = scalar_lea.hbm %s8953_s7, 8192 }
 0x489   : > { %p7080_p13 = scmp.ne.s32.totalorder %s8897_s9, %s7079_s10  ;;  %p7084_p4 = scmp.lt.u32.totalorder %s8897_s9, %s8953_s7 }
 0x48a   : > { %p7085_p5 = scmp.lt.u32.totalorder %s7083_s12, %s7079_s10  ;;  %p7087_p11 = scmp.lt.u32.totalorder %s7079_s10, %s8897_s9 }
 0x48b   : > { %p7081_p6 = pnand %p7080_p13, %p8971_p0 }
 0x48c   : > { %p7086_p8 = por %p7085_p5, %p7084_p4 }
 0x48d   : > { %p7082_p10 = pneg %p7081_p6 }
 0x48e   : > { %p7088_p1 = por %p7087_p11, %p7086_p8 }
 0x490   : > { %p7089_p3 = pnand %p7088_p1, %p7082_p10 }
 0x492   : > { %7092 = shalt.err (!%p7089_p3)
}
 0x493   : > { %s7147_s30 = smov 128   ;;  %s7148_s21 = smov 8  }
 0x494   : > { %6770 = dma.vmem_to_hbm [thread:$0]  (%p8971_p0), %s8899_s29, 4096, %s8897_s9, %s4895_s28, %s7147_s30, %s7147_s30, %s7148_s21  }
 0x495 PF: > { %s4923_s20 = sand.u32 1, %s7123_s24   ;;  %p8972_p7 = scmp.ne.s32.totalorder %s8958_s8, 0 }
 0x496   : > { %p8973_p9 = scmp.ge.s32.totalorder %s7135_s27, 2  ;;  %s4924_s11 = scalar_lea.sflag [#allocation5], %s4923_s20 }
 0x498   : > { %p6784_p12 = pnand %p8973_p9, %p8972_p7 }
 0x49a   : > { %7118 = dma.done.wait (!%p6784_p12), %s4924_s11, 4096  }
 0x49b   : > { %7120 = vsyncadd (!%p6784_p12), %s4924_s11, 4294963200  ;;  %p21_p2 = scmp.ge.s32.totalorder %s7299_s13, 4   ;;  %s8974_s24 = smov %s7127_s25 }
 0x49c   : > { %s8975_s25 = smov %s7131_s26  ;;  %s8976_s26 = smov %s7315_s17 }
 0x49d   : > { %s8977_s27 = smov %s7299_s13  ;;  %23 = sbr.rel (!%p21_p2) target bundleno = 6 (0x6), region = 103 }
 0x4a4   :  { %4929 = vsyncpa [#allocation4], 1 }
 0x4a5   :  { %4931 = vsyncpa [#allocation4 + $0x1], 1 }
 0x4a6   :  { %4932 = vsyncpa [#allocation7], 1 }
 0x4a7   :  { %4933 = vsyncpa [#allocation5], 1 }
 0x4a8   :  { %4935 = vsyncpa [#allocation5 + $0x1], 1 }

</bundles_post_ra>
